<compile_context>
chip_gen: v7x
topology: tpu7x:2x2x1
jax: 0.10.0
libtpu: 0.0.40
codegen_flags: <defaults>
</compile_context>

<pallas_src>
import math
import functools
from types import SimpleNamespace

import jax
import jax.numpy as jnp
from jax.experimental import pallas as pl
from jax.experimental.pallas import tpu as pltpu


# --------------------------------------------------------------------------
# Pallas kernels: fused matmul (+ bias + ReLU), single- and two-stage variants,
# plus the fused pool+linear classifier head.
# --------------------------------------------------------------------------
def _row_tile(M):
    # Full-array block unless an even 256-row split is possible (gives >=2
    # parallel grid steps for v7x's two TensorCores; harmless on v5e/v6e).
    if M > 256 and M % 256 == 0:
        return 256
    return M


def _fused_kernel(x_ref, w_ref, b_ref, o_ref, *, relu):
    acc = jnp.dot(x_ref[...], w_ref[...], preferred_element_type=jnp.float32)
    y = acc + b_ref[...]
    if relu:
        y = jnp.maximum(y, 0.0)
    o_ref[...] = y.astype(o_ref.dtype)


def _fused2_kernel(x_ref, w1_ref, b1_ref, w2_ref, b2_ref, o_ref, *, relu):
    # stage 1: bottleneck 1x1 conv (as kron-expanded matmul) + BN + ReLU
    h = jnp.dot(x_ref[...], w1_ref[...], preferred_element_type=jnp.float32)
    h = jnp.maximum(h + b1_ref[...], 0.0).astype(jnp.bfloat16)
    # stage 2: 3x3 conv (as matmul over im2col taps) + BN (+ ReLU)
    acc = jnp.dot(h, w2_ref[...], preferred_element_type=jnp.float32)
    y = acc + b2_ref[...]
    if relu:
        y = jnp.maximum(y, 0.0)
    o_ref[...] = y.astype(o_ref.dtype)


def _pool_linear_kernel(x_ref, wp_ref, wl_ref, b_ref, feat_ref, pred_ref):
    x = x_ref[...]
    # pooled features: X @ tile(I/P)  -> mean over the P spatial positions
    feat_ref[...] = jnp.dot(x, wp_ref[...], preferred_element_type=jnp.float32)
    # logits: X @ tile(W_lin/P) + b   == (pooled @ W_lin) + b
    pred_ref[...] = (
        jnp.dot(x, wl_ref[...], preferred_element_type=jnp.float32) + b_ref[...]
    )


def fused_matmul(x, w, bias, relu=True, out_dtype=jnp.bfloat16):
    """relu?((x @ w) + bias), bf16 operands, f32 accumulation/epilogue."""
    M, K = x.shape
    K2, N = w.shape
    assert K == K2
    x = x.astype(jnp.bfloat16)
    w = w.astype(jnp.bfloat16)
    b2 = bias.reshape(1, N).astype(jnp.float32)
    tm = _row_tile(M)
    cost = pl.CostEstimate(
        flops=2 * M * K * N,
        transcendentals=0,
        bytes_accessed=2 * (M * K + K * N) + 4 * N + M * N * jnp.dtype(out_dtype).itemsize,
    )
    return pl.pallas_call(
        functools.partial(_fused_kernel, relu=relu),
        out_shape=jax.ShapeDtypeStruct((M, N), out_dtype),
        grid=(M // tm,),
        in_specs=[
            pl.BlockSpec((tm, K), lambda i: (i, 0)),
            pl.BlockSpec((K, N), lambda i: (0, 0)),
            pl.BlockSpec((1, N), lambda i: (0, 0)),
        ],
        out_specs=pl.BlockSpec((tm, N), lambda i: (i, 0)),
        compiler_params=pltpu.CompilerParams(dimension_semantics=("parallel",)),
        cost_estimate=cost,
    )(x, w, b2)


def fused_two_stage_matmul(x, w1, b1, w2, b2, relu=True, out_dtype=jnp.bfloat16):
    """relu?(relu(x @ w1 + b1) @ w2 + b2) in one Pallas call."""
    M, K = x.shape
    K1, H = w1.shape
    H2, N = w2.shape
    assert K == K1 and H == H2
    x = x.astype(jnp.bfloat16)
    b1r = b1.reshape(1, H).astype(jnp.float32)
    b2r = b2.reshape(1, N).astype(jnp.float32)
    tm = _row_tile(M)
    cost = pl.CostEstimate(
        flops=2 * M * K * H + 2 * M * H * N,
        transcendentals=0,
        bytes_accessed=2 * (M * K + K * H + H * N) + 4 * (H + N)
        + M * N * jnp.dtype(out_dtype).itemsize,
    )
    return pl.pallas_call(
        functools.partial(_fused2_kernel, relu=relu),
        out_shape=jax.ShapeDtypeStruct((M, N), out_dtype),
        grid=(M // tm,),
        in_specs=[
            pl.BlockSpec((tm, K), lambda i: (i, 0)),
            pl.BlockSpec((K, H), lambda i: (0, 0)),
            pl.BlockSpec((1, H), lambda i: (0, 0)),
            pl.BlockSpec((H, N), lambda i: (0, 0)),
            pl.BlockSpec((1, N), lambda i: (0, 0)),
        ],
        out_specs=pl.BlockSpec((tm, N), lambda i: (i, 0)),
        compiler_params=pltpu.CompilerParams(dimension_semantics=("parallel",)),
        cost_estimate=cost,
    )(x, w1.astype(jnp.bfloat16), b1r, w2.astype(jnp.bfloat16), b2r)


def fused_pool_linear(x_flat, w_pool, w_lin, bias):
    """Single call producing (pooled_features, logits) from the flattened conv map."""
    M, K = x_flat.shape
    C = w_pool.shape[1]
    N = w_lin.shape[1]
    x_flat = x_flat.astype(jnp.bfloat16)
    b2 = bias.reshape(1, N).astype(jnp.float32)
    cost = pl.CostEstimate(
        flops=2 * M * K * (C + N),
        transcendentals=0,
        bytes_accessed=2 * (M * K + K * C + K * N) + 4 * (N + M * C + M * N),
    )
    return pl.pallas_call(
        _pool_linear_kernel,
        out_shape=(
            jax.ShapeDtypeStruct((M, C), jnp.float32),
            jax.ShapeDtypeStruct((M, N), jnp.float32),
        ),
        grid=(1,),
        in_specs=[
            pl.BlockSpec((M, K), lambda i: (0, 0)),
            pl.BlockSpec((K, C), lambda i: (0, 0)),
            pl.BlockSpec((K, N), lambda i: (0, 0)),
            pl.BlockSpec((1, N), lambda i: (0, 0)),
        ],
        out_specs=(
            pl.BlockSpec((M, C), lambda i: (0, 0)),
            pl.BlockSpec((M, N), lambda i: (0, 0)),
        ),
        compiler_params=pltpu.CompilerParams(dimension_semantics=("arbitrary",)),
        cost_estimate=cost,
    )(x_flat, w_pool.astype(jnp.bfloat16), w_lin.astype(jnp.bfloat16), b2)


def im2col(x, kh, kw, stride, padding):
    """Extract conv patches (glue). x: (B,H,W,C) -> (B*Ho*Wo, kh*kw*C)."""
    B, H, W, C = x.shape
    if kh == 1 and kw == 1 and padding == 0:
        if stride != 1:
            x = x[:, ::stride, ::stride, :]
        B, Ho, Wo, C = x.shape
        return x.reshape(B * Ho * Wo, C), (B, Ho, Wo)
    xp = jnp.pad(x, ((0, 0), (padding, padding), (padding, padding), (0, 0)))
    Ho = (H + 2 * padding - kh) // stride + 1
    Wo = (W + 2 * padding - kw) // stride + 1
    cols = []
    for i in range(kh):
        for j in range(kw):
            cols.append(xp[:, i:i + stride * Ho:stride, j:j + stride * Wo:stride, :])
    patches = jnp.concatenate(cols, axis=-1)  # (B, Ho, Wo, kh*kw*C)
    return patches.reshape(B * Ho * Wo, kh * kw * C), (B, Ho, Wo)


def _block_diag(mats):
    if len(mats) == 1:
        return mats[0]
    K = sum(m.shape[0] for m in mats)
    N = sum(m.shape[1] for m in mats)
    out = jnp.zeros((K, N), jnp.float32)
    r = c = 0
    for m in mats:
        out = out.at[r:r + m.shape[0], c:c + m.shape[1]].set(m)
        r += m.shape[0]
        c += m.shape[1]
    return out


def key_iter(key):
    while True:
        key, sub = jax.random.split(key)
        yield sub


# --------------------------------------------------------------------------
# Functional "modules" mirroring the PyTorch structure
# --------------------------------------------------------------------------
class ConvBNRelu:
    """nn.Conv2d(bias=False) + nn.BatchNorm2d (inference, folded) + ReLU == ConvBasic."""

    def __init__(self, keygen, nIn, nOut, kernel=3, stride=1, padding=1):
        std = math.sqrt(2.0 / (kernel * kernel * nOut))  # matches torch _init_weights
        w = std * jax.random.normal(next(keygen), (kernel, kernel, nIn, nOut), jnp.float32)
        eps = 1e-5
        gamma = jnp.ones((nOut,), jnp.float32)    # BN weight = 1
        beta = jnp.zeros((nOut,), jnp.float32)    # BN bias = 0
        rmean = jnp.zeros((nOut,), jnp.float32)
        rvar = jnp.ones((nOut,), jnp.float32)
        scale = gamma / jnp.sqrt(rvar + eps)
        self.bias = beta - rmean * scale                                   # folded BN shift
        self.w_f32 = (w * scale).reshape(kernel * kernel * nIn, nOut)      # folded BN scale
        self.w = self.w_f32.astype(jnp.bfloat16)
        self.kernel, self.stride, self.padding = kernel, stride, padding
        self.nIn, self.nOut = nIn, nOut

    def __call__(self, x):
        patches, (B, Ho, Wo) = im2col(x, self.kernel, self.kernel, self.stride, self.padding)
        y = fused_matmul(patches, self.w, self.bias, relu=True)
        return y.reshape(B, Ho, Wo, self.nOut)


def make_convbn_branch(keygen, nIn, nOut, type_, bottleneck, bnWidth):
    """Parameters of one ConvBN: optional 1x1 bottleneck + 3x3 ('normal'/'down')."""
    nInner = nIn
    bt = None
    if bottleneck is True:
        nInner = min(nInner, bnWidth * nOut)
        bt = ConvBNRelu(keygen, nIn, nInner, kernel=1, stride=1, padding=0)
    if type_ == 'normal':
        main = ConvBNRelu(keygen, nInner, nOut, kernel=3, stride=1, padding=1)
    elif type_ == 'down':
        main = ConvBNRelu(keygen, nInner, nOut, kernel=3, stride=2, padding=1)
    else:
        raise ValueError
    return bt, main


class PackedConvBN:
    """One or more ConvBN branches (same output resolution) packed into a single
    fused Pallas call via block-diagonal weights; outputs come out already
    channel-concatenated in branch order."""

    def __init__(self, branches):
        self.branches = branches  # list of (bottleneck_or_None, main ConvBNRelu)
        self.has_bottleneck = any(bt is not None for bt, _ in branches)
        self.nOut = sum(m.nOut for _, m in branches)
        self.b2 = jnp.concatenate([m.bias for _, m in branches])
        w2 = _block_diag([m.w_f32 for _, m in branches])
        self.w2 = w2.astype(jnp.bfloat16)
        if self.has_bottleneck:
            w1_blocks, b1_parts = [], []
            for bt, m in branches:
                taps = m.kernel * m.kernel
                if bt is not None:
                    # 1x1 conv applied per im2col tap: kron(I_taps, W1).
                    w1_blocks.append(jnp.kron(jnp.eye(taps, dtype=jnp.float32), bt.w_f32))
                    b1_parts.append(jnp.tile(bt.bias, taps))
                else:
                    # Identity stage-1 block; inputs are post-ReLU (>=0) so the
                    # in-kernel ReLU between stages is a no-op on them.
                    w1_blocks.append(jnp.eye(taps * m.nIn, dtype=jnp.float32))
                    b1_parts.append(jnp.zeros((taps * m.nIn,), jnp.float32))
            self.w1 = _block_diag(w1_blocks).astype(jnp.bfloat16)
            self.b1 = jnp.concatenate(b1_parts)

    def __call__(self, inputs):
        patch_list, shapes = [], []
        for (bt, m), x in zip(self.branches, inputs):
            p, shp = im2col(x, m.kernel, m.kernel, m.stride, m.padding)
            patch_list.append(p)
            shapes.append(shp)
        B, Ho, Wo = shapes[0]
        for s in shapes[1:]:
            assert s == (B, Ho, Wo)
        patches = patch_list[0] if len(patch_list) == 1 else jnp.concatenate(patch_list, axis=1)
        if self.has_bottleneck:
            y = fused_two_stage_matmul(patches, self.w1, self.b1, self.w2, self.b2, relu=True)
        else:
            y = fused_matmul(patches, self.w2, self.b2, relu=True)
        return y.reshape(B, Ho, Wo, self.nOut)


class ConvDownNormal:
    def __init__(self, keygen, nIn1, nIn2, nOut, bottleneck, bnWidth1, bnWidth2):
        down = make_convbn_branch(keygen, nIn1, nOut // 2, 'down', bottleneck, bnWidth1)
        normal = make_convbn_branch(keygen, nIn2, nOut // 2, 'normal', bottleneck, bnWidth2)
        self.packed = PackedConvBN([down, normal])

    def __call__(self, x):
        y = self.packed([x[0], x[1]])  # == cat([conv_down(x[0]), conv_normal(x[1])], -1)
        return jnp.concatenate([x[1], y], axis=-1)


class ConvNormal:
    def __init__(self, keygen, nIn, nOut, bottleneck, bnWidth):
        self.packed = PackedConvBN(
            [make_convbn_branch(keygen, nIn, nOut, 'normal', bottleneck, bnWidth)])

    def __call__(self, x):
        if not isinstance(x, list):
            x = [x]
        return jnp.concatenate([x[0], self.packed([x[0]])], axis=-1)


class MSDNFirstLayer:
    def __init__(self, keygen, nIn, nOut, args):
        self.layers = []
        if args.data.startswith('cifar'):
            self.layers.append(ConvBNRelu(keygen, nIn, nOut * args.grFactor[0],
                                          kernel=3, stride=1, padding=1))
        else:
            # TODO(synk): ImageNet stem (7x7 s2 conv + maxpool) not needed for the cifar config.
            raise NotImplementedError
        nIn = nOut * args.grFactor[0]
        for i in range(1, args.nScales):
            self.layers.append(ConvBNRelu(keygen, nIn, nOut * args.grFactor[i],
                                          kernel=3, stride=2, padding=1))
            nIn = nOut * args.grFactor[i]

    def __call__(self, x):
        res = []
        for l in self.layers:
            x = l(x)
            res.append(x)
        return res


class MSDNLayer:
    def __init__(self, keygen, nIn, nOut, args, inScales=None, outScales=None):
        self.inScales = inScales if inScales is not None else args.nScales
        self.outScales = outScales if outScales is not None else args.nScales
        self.nScales = args.nScales
        self.discard = self.inScales - self.outScales
        self.offset = self.nScales - self.outScales
        self.layers = []
        if self.discard > 0:
            nIn1 = nIn * args.grFactor[self.offset - 1]
            nIn2 = nIn * args.grFactor[self.offset]
            _nOut = nOut * args.grFactor[self.offset]
            self.layers.append(ConvDownNormal(keygen, nIn1, nIn2, _nOut, args.bottleneck,
                                              args.bnFactor[self.offset - 1],
                                              args.bnFactor[self.offset]))
        else:
            self.layers.append(ConvNormal(keygen, nIn * args.grFactor[self.offset],
                                          nOut * args.grFactor[self.offset],
                                          args.bottleneck, args.bnFactor[self.offset]))
        for i in range(self.offset + 1, self.nScales):
            nIn1 = nIn * args.grFactor[i - 1]
            nIn2 = nIn * args.grFactor[i]
            _nOut = nOut * args.grFactor[i]
            self.layers.append(ConvDownNormal(keygen, nIn1, nIn2, _nOut, args.bottleneck,
                                              args.bnFactor[i - 1], args.bnFactor[i]))

    def __call__(self, x):
        if self.discard > 0:
            inp = [[x[i - 1], x[i]] for i in range(1, self.outScales + 1)]
        else:
            inp = [[x[0]]] + [[x[i - 1], x[i]] for i in range(1, self.outScales)]
        return [self.layers[i](inp[i]) for i in range(self.outScales)]


class ParallelModule:
    def __init__(self, modules):
        self.m = modules

    def __call__(self, x):
        return [self.m[i](x[i]) for i in range(len(x))]


class Sequential:
    def __init__(self, *mods):
        self.mods = list(mods)

    def __call__(self, x):
        for m in self.mods:
            x = m(x)
        return x


class ClassifierModule:
    """conv stack -> (AvgPool2d(2) + flatten + Dropout + Linear), with the pool and
    linear fused into a single two-output Pallas call."""

    def __init__(self, keygen, m, channel, num_classes):
        self.m = m
        self.channel = channel
        self.num_classes = num_classes
        bound = 1.0 / math.sqrt(channel)
        self.lin_w = jax.random.uniform(next(keygen), (channel, num_classes),
                                        jnp.float32, -bound, bound)
        self.lin_b = jnp.zeros((num_classes,), jnp.float32)  # _init_weights zeros the bias

    def __call__(self, x):
        h = self.m(x[-1])                       # (B, Hp, Wp, C) bf16 from the conv stack
        B, Hp, Wp, C = h.shape
        assert C == self.channel
        # Torch applies AvgPool2d(2) then flattens into Linear(channel); that only
        # type-checks when the map is 2x2, i.e. the pool is a global average.
        assert Hp == 2 and Wp == 2
        P = Hp * Wp
        xf = h.reshape(B, P * C)                # channel-minor flatten (lane-dense)
        inv = 1.0 / P
        w_pool = jnp.tile(jnp.eye(C, dtype=jnp.float32) * inv, (P, 1))   # (P*C, C)
        w_lin = jnp.tile(self.lin_w * inv, (P, 1))                       # (P*C, num_classes)
        # nn.Dropout(0.5) is identity in inference mode.
        feat, pred = fused_pool_linear(xf, w_pool, w_lin, self.lin_b)
        return pred, feat


def feature_reroute_func(x, chanel_axis, ratio, use_dns, use_fr):
    # TODO(synk): feature_reroute_func is not defined in the provided source.
    # With use_dns=False and use_fr=False the feature passes through unchanged.
    if (not use_dns) and (not use_fr):
        return x, x
    return x, x


class MSDNet:
    def __init__(self, args, key):
        self.args = args
        self.nBlocks = args.nBlocks
        self.steps = [args.base]
        keygen = key_iter(key)
        n_layers_all, n_layer_curr = args.base, 0
        for i in range(1, self.nBlocks):
            self.steps.append(args.step if args.stepmode == 'even' else args.step * i + 1)
            n_layers_all += self.steps[-1]
        self.blocks, self.classifier = [], []
        nIn = args.nChannels
        for i in range(self.nBlocks):
            m, nIn = self._build_block(keygen, nIn, args, self.steps[i],
                                       n_layers_all, n_layer_curr)
            self.blocks.append(m)
            n_layer_curr += self.steps[i]
            if args.data.startswith('cifar100'):
                self.classifier.append(
                    self._build_classifier_cifar(keygen, nIn * args.grFactor[-1], 100))
            elif args.data.startswith('cifar10'):
                self.classifier.append(
                    self._build_classifier_cifar(keygen, nIn * args.grFactor[-1], 10))
            else:
                raise NotImplementedError

    def _build_block(self, keygen, nIn, args, step, n_layer_all, n_layer_curr):
        layers = [MSDNFirstLayer(keygen, 3, nIn, args)] if n_layer_curr == 0 else []
        for i in range(step):
            n_layer_curr += 1
            if args.prune == 'min':
                inScales = min(args.nScales, n_layer_all - n_layer_curr + 2)
                outScales = min(args.nScales, n_layer_all - n_layer_curr + 1)
            elif args.prune == 'max':
                interval = math.ceil(1.0 * n_layer_all / args.nScales)
                inScales = args.nScales - math.floor(1.0 * max(0, n_layer_curr - 2) / interval)
                outScales = args.nScales - math.floor(1.0 * (n_layer_curr - 1) / interval)
            else:
                raise ValueError
            layers.append(MSDNLayer(keygen, nIn, args.growthRate, args, inScales, outScales))
            nIn += args.growthRate
            if args.prune == 'max' and inScales > outScales and args.reduction > 0:
                offset = args.nScales - outScales
                layers.append(self._build_transition(keygen, nIn,
                                                     math.floor(1.0 * args.reduction * nIn),
                                                     outScales, offset, args))
                nIn = math.floor(1.0 * args.reduction * nIn)
            elif args.prune == 'min' and args.reduction > 0 and (
                    n_layer_curr == math.floor(1.0 * n_layer_all / 3) or
                    n_layer_curr == math.floor(2.0 * n_layer_all / 3)):
                offset = args.nScales - outScales
                layers.append(self._build_transition(keygen, nIn,
                                                     math.floor(1.0 * args.reduction * nIn),
                                                     outScales, offset, args))
                nIn = math.floor(1.0 * args.reduction * nIn)
        return Sequential(*layers), nIn

    def _build_transition(self, keygen, nIn, nOut, outScales, offset, args):
        return ParallelModule([
            ConvBNRelu(keygen, nIn * args.grFactor[offset + i], nOut * args.grFactor[offset + i],
                       kernel=1, stride=1, padding=0)
            for i in range(outScales)])

    def _build_classifier_cifar(self, keygen, nIn, num_classes):
        conv = Sequential(ConvBNRelu(keygen, nIn, 128, kernel=3, stride=2, padding=1),
                          ConvBNRelu(keygen, 128, 128, kernel=3, stride=2, padding=1))
        return ClassifierModule(keygen, conv, 128, num_classes)

    def __call__(self, x):
        x = x.astype(jnp.bfloat16)  # activations flow in bf16 (MXU-native)
        res, feat = [], []
        for i in range(self.nBlocks):
            x = self.blocks[i](x)
            if i < self.nBlocks - 1:
                # channel axis is -1 in NHWC (torch passes chanel_axis=1 for NCHW)
                x_plus, x_sub = feature_reroute_func(x[-1], chanel_axis=-1,
                                                     ratio=self.args.dns_ratio,
                                                     use_dns=self.args.use_dns,
                                                     use_fr=self.args.use_fr)
                pred, t = self.classifier[i]([x_sub])
                x[-1] = x_plus
            else:
                pred, t = self.classifier[i](x)
            res.append(pred)
            feat.append(t)
        return res, feat


if __name__ == "__main__":
    args = SimpleNamespace(
        data='cifar10', nBlocks=2, base=1, step=1, stepmode='even',
        nChannels=4, growthRate=4, nScales=2, grFactor=[1, 2], bnFactor=[1, 2],
        prune='max', reduction=0.5, bottleneck=True,
        dns_ratio=0.5, use_dns=False, use_fr=False)

    root = jax.random.PRNGKey(0)
    param_key, input_key = jax.random.split(root)
    net = MSDNet(args, param_key)

    # NHWC input (equivalent to torch NCHW (2, 3, 16, 16))
    x = jax.random.normal(input_key, (2, 16, 16, 3), jnp.float32)

    fwd = jax.jit(lambda inp: net(inp))
    preds, feats = fwd(x)
    preds = [jax.block_until_ready(p) for p in preds]
    feats = [jax.block_until_ready(f) for f in feats]

    assert len(preds) == 2 and len(feats) == 2
    assert preds[0].shape == (2, 10) and preds[1].shape == (2, 10)
    assert feats[0].shape == (2, 128) and feats[1].shape == (2, 128)
    print("KERNEL_OK")
</pallas_src>

<mosaic_0001>
module attributes {stable_mosaic.version = 11 : i64} {
  func.func @_fused_kernel(%arg0: i32, %arg1: memref<256x27xbf16, #tpu.memory_space<vmem>>, %arg2: memref<27x4xbf16, #tpu.memory_space<vmem>>, %arg3: memref<1x4xf32, #tpu.memory_space<vmem>>, %arg4: memref<256x4xbf16, #tpu.memory_space<vmem>>) attributes {dimension_semantics = [#tpu.dimension_semantics<parallel>], iteration_bounds = array<i64: 2>, scalar_prefetch = 0 : i64, scratch_operands = 0 : i64, tpu.core_type = #tpu.core_type<tc>, window_params = [{transform_indices = @transform_0, window_bounds = array<i64: 256, 27>}, {pipeline_mode = #tpu.pipeline_mode<synchronous>, transform_indices = @transform_1, window_bounds = array<i64: 27, 4>}, {pipeline_mode = #tpu.pipeline_mode<synchronous>, transform_indices = @transform_2, window_bounds = array<i64: 1, 4>}, {transform_indices = @transform_3, window_bounds = array<i64: 256, 4>}]} {
    %c0 = arith.constant 0 : index
    %c0_0 = arith.constant 0 : index
    %0 = vector.load %arg1[%c0, %c0_0] : memref<256x27xbf16, #tpu.memory_space<vmem>>, vector<256x27xbf16>
    %c0_1 = arith.constant 0 : index
    %c0_2 = arith.constant 0 : index
    %1 = vector.load %arg2[%c0_1, %c0_2] : memref<27x4xbf16, #tpu.memory_space<vmem>>, vector<27x4xbf16>
    %cst = arith.constant dense<0.000000e+00> : vector<256x4xf32>
    %2 = tpu.matmul %0, %1, %cst {dimension_numbers = #tpu.dot_dimension_numbers<[1], [0], [0], [1], [0, 0, 1, 1], [], []>} : vector<256x27xbf16>, vector<27x4xbf16>, vector<256x4xf32> -> vector<256x4xf32>
    %c0_3 = arith.constant 0 : index
    %c0_4 = arith.constant 0 : index
    %3 = vector.load %arg3[%c0_3, %c0_4] : memref<1x4xf32, #tpu.memory_space<vmem>>, vector<1x4xf32>
    %4 = vector.broadcast %3 : vector<1x4xf32> to vector<256x4xf32>
    %5 = arith.addf %2, %4 : vector<256x4xf32>
    %cst_5 = arith.constant 0.000000e+00 : f32
    %6 = vector.broadcast %cst_5 : f32 to vector<256x4xf32>
    %7 = arith.maximumf %5, %6 : vector<256x4xf32>
    %8 = arith.truncf %7 : vector<256x4xf32> to vector<256x4xbf16>
    %c0_6 = arith.constant 0 : index
    %c0_7 = arith.constant 0 : index
    %9 = vector.load %arg4[%c0_6, %c0_7] : memref<256x4xbf16, #tpu.memory_space<vmem>>, vector<256x4xbf16>
    tpu.vector_store %arg4[%c0_6, %c0_7], %8 {strides = array<i32>} : memref<256x4xbf16, #tpu.memory_space<vmem>>, vector<256x4xbf16>,
    return
  }
  func.func @transform_0(%arg0: i32) -> (i32, i32) {
    %c0_i32 = arith.constant 0 : i32
    %c0_i32_0 = arith.constant 0 : i32
    return %arg0, %c0_i32 : i32, i32
  }
  func.func @transform_1(%arg0: i32) -> (i32, i32) {
    %c0_i32 = arith.constant 0 : i32
    %c0_i32_0 = arith.constant 0 : i32
    %c0_i32_1 = arith.constant 0 : i32
    return %c0_i32, %c0_i32_0 : i32, i32
  }
  func.func @transform_2(%arg0: i32) -> (i32, i32) {
    %c0_i32 = arith.constant 0 : i32
    %c0_i32_0 = arith.constant 0 : i32
    %c0_i32_1 = arith.constant 0 : i32
    return %c0_i32, %c0_i32_0 : i32, i32
  }
  func.func @transform_3(%arg0: i32) -> (i32, i32) {
    %c0_i32 = arith.constant 0 : i32
    %c0_i32_0 = arith.constant 0 : i32
    return %arg0, %c0_i32 : i32, i32
  }
}

module attributes {stable_mosaic.version = 11 : i64} {
  func.func @_fused2_kernel(%arg0: i32, %arg1: memref<256x36xbf16, #tpu.memory_space<vmem>>, %arg2: memref<36x36xbf16, #tpu.memory_space<vmem>>, %arg3: memref<1x36xf32, #tpu.memory_space<vmem>>, %arg4: memref<36x4xbf16, #tpu.memory_space<vmem>>, %arg5: memref<1x4xf32, #tpu.memory_space<vmem>>, %arg6: memref<256x4xbf16, #tpu.memory_space<vmem>>) attributes {dimension_semantics = [#tpu.dimension_semantics<parallel>], iteration_bounds = array<i64: 2>, scalar_prefetch = 0 : i64, scratch_operands = 0 : i64, tpu.core_type = #tpu.core_type<tc>, window_params = [{transform_indices = @transform_0, window_bounds = array<i64: 256, 36>}, {pipeline_mode = #tpu.pipeline_mode<synchronous>, transform_indices = @transform_1, window_bounds = array<i64: 36, 36>}, {pipeline_mode = #tpu.pipeline_mode<synchronous>, transform_indices = @transform_2, window_bounds = array<i64: 1, 36>}, {pipeline_mode = #tpu.pipeline_mode<synchronous>, transform_indices = @transform_3, window_bounds = array<i64: 36, 4>}, {pipeline_mode = #tpu.pipeline_mode<synchronous>, transform_indices = @transform_4, window_bounds = array<i64: 1, 4>}, {transform_indices = @transform_5, window_bounds = array<i64: 256, 4>}]} {
    %c0 = arith.constant 0 : index
    %c0_0 = arith.constant 0 : index
    %0 = vector.load %arg1[%c0, %c0_0] : memref<256x36xbf16, #tpu.memory_space<vmem>>, vector<256x36xbf16>
    %c0_1 = arith.constant 0 : index
    %c0_2 = arith.constant 0 : index
    %1 = vector.load %arg2[%c0_1, %c0_2] : memref<36x36xbf16, #tpu.memory_space<vmem>>, vector<36x36xbf16>
    %cst = arith.constant dense<0.000000e+00> : vector<256x36xf32>
    %2 = tpu.matmul %0, %1, %cst {dimension_numbers = #tpu.dot_dimension_numbers<[1], [0], [0], [1], [0, 0, 1, 1], [], []>} : vector<256x36xbf16>, vector<36x36xbf16>, vector<256x36xf32> -> vector<256x36xf32>
    %c0_3 = arith.constant 0 : index
    %c0_4 = arith.constant 0 : index
    %3 = vector.load %arg3[%c0_3, %c0_4] : memref<1x36xf32, #tpu.memory_space<vmem>>, vector<1x36xf32>
    %4 = vector.broadcast %3 : vector<1x36xf32> to vector<256x36xf32>
    %5 = arith.addf %2, %4 : vector<256x36xf32>
    %cst_5 = arith.constant 0.000000e+00 : f32
    %6 = vector.broadcast %cst_5 : f32 to vector<256x36xf32>
    %7 = arith.maximumf %5, %6 : vector<256x36xf32>
    %8 = arith.truncf %7 : vector<256x36xf32> to vector<256x36xbf16>
    %c0_6 = arith.constant 0 : index
    %c0_7 = arith.constant 0 : index
    %9 = vector.load %arg4[%c0_6, %c0_7] : memref<36x4xbf16, #tpu.memory_space<vmem>>, vector<36x4xbf16>
    %cst_8 = arith.constant dense<0.000000e+00> : vector<256x4xf32>
    %10 = tpu.matmul %8, %9, %cst_8 {dimension_numbers = #tpu.dot_dimension_numbers<[1], [0], [0], [1], [0, 0, 1, 1], [], []>} : vector<256x36xbf16>, vector<36x4xbf16>, vector<256x4xf32> -> vector<256x4xf32>
    %c0_9 = arith.constant 0 : index
    %c0_10 = arith.constant 0 : index
    %11 = vector.load %arg5[%c0_9, %c0_10] : memref<1x4xf32, #tpu.memory_space<vmem>>, vector<1x4xf32>
    %12 = vector.broadcast %11 : vector<1x4xf32> to vector<256x4xf32>
    %13 = arith.addf %10, %12 : vector<256x4xf32>
    %cst_11 = arith.constant 0.000000e+00 : f32
    %14 = vector.broadcast %cst_11 : f32 to vector<256x4xf32>
    %15 = arith.maximumf %13, %14 : vector<256x4xf32>
    %16 = arith.truncf %15 : vector<256x4xf32> to vector<256x4xbf16>
    %c0_12 = arith.constant 0 : index
    %c0_13 = arith.constant 0 : index
    %17 = vector.load %arg6[%c0_12, %c0_13] : memref<256x4xbf16, #tpu.memory_space<vmem>>, vector<256x4xbf16>
    tpu.vector_store %arg6[%c0_12, %c0_13], %16 {strides = array<i32>} : memref<256x4xbf16, #tpu.memory_space<vmem>>, vector<256x4xbf16>,
    return
  }
  func.func @transform_0(%arg0: i32) -> (i32, i32) {
    %c0_i32 = arith.constant 0 : i32
    %c0_i32_0 = arith.constant 0 : i32
    return %arg0, %c0_i32 : i32, i32
  }
  func.func @transform_1(%arg0: i32) -> (i32, i32) {
    %c0_i32 = arith.constant 0 : i32
    %c0_i32_0 = arith.constant 0 : i32
    %c0_i32_1 = arith.constant 0 : i32
    return %c0_i32, %c0_i32_0 : i32, i32
  }
  func.func @transform_2(%arg0: i32) -> (i32, i32) {
    %c0_i32 = arith.constant 0 : i32
    %c0_i32_0 = arith.constant 0 : i32
    %c0_i32_1 = arith.constant 0 : i32
    return %c0_i32, %c0_i32_0 : i32, i32
  }
  func.func @transform_3(%arg0: i32) -> (i32, i32) {
    %c0_i32 = arith.constant 0 : i32
    %c0_i32_0 = arith.constant 0 : i32
    %c0_i32_1 = arith.constant 0 : i32
    return %c0_i32, %c0_i32_0 : i32, i32
  }
  func.func @transform_4(%arg0: i32) -> (i32, i32) {
    %c0_i32 = arith.constant 0 : i32
    %c0_i32_0 = arith.constant 0 : i32
    %c0_i32_1 = arith.constant 0 : i32
    return %c0_i32, %c0_i32_0 : i32, i32
  }
  func.func @transform_5(%arg0: i32) -> (i32, i32) {
    %c0_i32 = arith.constant 0 : i32
    %c0_i32_0 = arith.constant 0 : i32
    return %arg0, %c0_i32 : i32, i32
  }
}

module attributes {stable_mosaic.version = 11 : i64} {
  func.func @_fused_kernel(%arg0: i32, %arg1: memref<128x36xbf16, #tpu.memory_space<vmem>>, %arg2: memref<36x8xbf16, #tpu.memory_space<vmem>>, %arg3: memref<1x8xf32, #tpu.memory_space<vmem>>, %arg4: memref<128x8xbf16, #tpu.memory_space<vmem>>) attributes {dimension_semantics = [#tpu.dimension_semantics<parallel>], iteration_bounds = array<i64: 1>, scalar_prefetch = 0 : i64, scratch_operands = 0 : i64, tpu.core_type = #tpu.core_type<tc>, window_params = [{transform_indices = @transform_0, window_bounds = array<i64: 128, 36>}, {pipeline_mode = #tpu.pipeline_mode<synchronous>, transform_indices = @transform_1, window_bounds = array<i64: 36, 8>}, {pipeline_mode = #tpu.pipeline_mode<synchronous>, transform_indices = @transform_2, window_bounds = array<i64: 1, 8>}, {transform_indices = @transform_3, window_bounds = array<i64: 128, 8>}]} {
    %c0 = arith.constant 0 : index
    %c0_0 = arith.constant 0 : index
    %0 = vector.load %arg1[%c0, %c0_0] : memref<128x36xbf16, #tpu.memory_space<vmem>>, vector<128x36xbf16>
    %c0_1 = arith.constant 0 : index
    %c0_2 = arith.constant 0 : index
    %1 = vector.load %arg2[%c0_1, %c0_2] : memref<36x8xbf16, #tpu.memory_space<vmem>>, vector<36x8xbf16>
    %cst = arith.constant dense<0.000000e+00> : vector<128x8xf32>
    %2 = tpu.matmul %0, %1, %cst {dimension_numbers = #tpu.dot_dimension_numbers<[1], [0], [0], [1], [0, 0, 1, 1], [], []>} : vector<128x36xbf16>, vector<36x8xbf16>, vector<128x8xf32> -> vector<128x8xf32>
    %c0_3 = arith.constant 0 : index
    %c0_4 = arith.constant 0 : index
    %3 = vector.load %arg3[%c0_3, %c0_4] : memref<1x8xf32, #tpu.memory_space<vmem>>, vector<1x8xf32>
    %4 = vector.broadcast %3 : vector<1x8xf32> to vector<128x8xf32>
    %5 = arith.addf %2, %4 : vector<128x8xf32>
    %cst_5 = arith.constant 0.000000e+00 : f32
    %6 = vector.broadcast %cst_5 : f32 to vector<128x8xf32>
    %7 = arith.maximumf %5, %6 : vector<128x8xf32>
    %8 = arith.truncf %7 : vector<128x8xf32> to vector<128x8xbf16>
    %c0_6 = arith.constant 0 : index
    %c0_7 = arith.constant 0 : index
    %9 = vector.load %arg4[%c0_6, %c0_7] : memref<128x8xbf16, #tpu.memory_space<vmem>>, vector<128x8xbf16>
    tpu.vector_store %arg4[%c0_6, %c0_7], %8 {strides = array<i32>} : memref<128x8xbf16, #tpu.memory_space<vmem>>, vector<128x8xbf16>,
    return
  }
  func.func @transform_0(%arg0: i32) -> (i32, i32) {
    %c0_i32 = arith.constant 0 : i32
    %c0_i32_0 = arith.constant 0 : i32
    return %arg0, %c0_i32 : i32, i32
  }
  func.func @transform_1(%arg0: i32) -> (i32, i32) {
    %c0_i32 = arith.constant 0 : i32
    %c0_i32_0 = arith.constant 0 : i32
    %c0_i32_1 = arith.constant 0 : i32
    return %c0_i32, %c0_i32_0 : i32, i32
  }
  func.func @transform_2(%arg0: i32) -> (i32, i32) {
    %c0_i32 = arith.constant 0 : i32
    %c0_i32_0 = arith.constant 0 : i32
    %c0_i32_1 = arith.constant 0 : i32
    return %c0_i32, %c0_i32_0 : i32, i32
  }
  func.func @transform_3(%arg0: i32) -> (i32, i32) {
    %c0_i32 = arith.constant 0 : i32
    %c0_i32_0 = arith.constant 0 : i32
    return %arg0, %c0_i32 : i32, i32
  }
}

module attributes {stable_mosaic.version = 11 : i64} {
  func.func @_fused2_kernel(%arg0: i32, %arg1: memref<128x108xbf16, #tpu.memory_space<vmem>>, %arg2: memref<108x108xbf16, #tpu.memory_space<vmem>>, %arg3: memref<1x108xf32, #tpu.memory_space<vmem>>, %arg4: memref<108x8xbf16, #tpu.memory_space<vmem>>, %arg5: memref<1x8xf32, #tpu.memory_space<vmem>>, %arg6: memref<128x8xbf16, #tpu.memory_space<vmem>>) attributes {dimension_semantics = [#tpu.dimension_semantics<parallel>], iteration_bounds = array<i64: 1>, scalar_prefetch = 0 : i64, scratch_operands = 0 : i64, tpu.core_type = #tpu.core_type<tc>, window_params = [{transform_indices = @transform_0, window_bounds = array<i64: 128, 108>}, {pipeline_mode = #tpu.pipeline_mode<synchronous>, transform_indices = @transform_1, window_bounds = array<i64: 108, 108>}, {pipeline_mode = #tpu.pipeline_mode<synchronous>, transform_indices = @transform_2, window_bounds = array<i64: 1, 108>}, {pipeline_mode = #tpu.pipeline_mode<synchronous>, transform_indices = @transform_3, window_bounds = array<i64: 108, 8>}, {pipeline_mode = #tpu.pipeline_mode<synchronous>, transform_indices = @transform_4, window_bounds = array<i64: 1, 8>}, {transform_indices = @transform_5, window_bounds = array<i64: 128, 8>}]} {
    %c0 = arith.constant 0 : index
    %c0_0 = arith.constant 0 : index
    %0 = vector.load %arg1[%c0, %c0_0] : memref<128x108xbf16, #tpu.memory_space<vmem>>, vector<128x108xbf16>
    %c0_1 = arith.constant 0 : index
    %c0_2 = arith.constant 0 : index
    %1 = vector.load %arg2[%c0_1, %c0_2] : memref<108x108xbf16, #tpu.memory_space<vmem>>, vector<108x108xbf16>
    %cst = arith.constant dense<0.000000e+00> : vector<128x108xf32>
    %2 = tpu.matmul %0, %1, %cst {dimension_numbers = #tpu.dot_dimension_numbers<[1], [0], [0], [1], [0, 0, 1, 1], [], []>} : vector<128x108xbf16>, vector<108x108xbf16>, vector<128x108xf32> -> vector<128x108xf32>
    %c0_3 = arith.constant 0 : index
    %c0_4 = arith.constant 0 : index
    %3 = vector.load %arg3[%c0_3, %c0_4] : memref<1x108xf32, #tpu.memory_space<vmem>>, vector<1x108xf32>
    %4 = vector.broadcast %3 : vector<1x108xf32> to vector<128x108xf32>
    %5 = arith.addf %2, %4 : vector<128x108xf32>
    %cst_5 = arith.constant 0.000000e+00 : f32
    %6 = vector.broadcast %cst_5 : f32 to vector<128x108xf32>
    %7 = arith.maximumf %5, %6 : vector<128x108xf32>
    %8 = arith.truncf %7 : vector<128x108xf32> to vector<128x108xbf16>
    %c0_6 = arith.constant 0 : index
    %c0_7 = arith.constant 0 : index
    %9 = vector.load %arg4[%c0_6, %c0_7] : memref<108x8xbf16, #tpu.memory_space<vmem>>, vector<108x8xbf16>
    %cst_8 = arith.constant dense<0.000000e+00> : vector<128x8xf32>
    %10 = tpu.matmul %8, %9, %cst_8 {dimension_numbers = #tpu.dot_dimension_numbers<[1], [0], [0], [1], [0, 0, 1, 1], [], []>} : vector<128x108xbf16>, vector<108x8xbf16>, vector<128x8xf32> -> vector<128x8xf32>
    %c0_9 = arith.constant 0 : index
    %c0_10 = arith.constant 0 : index
    %11 = vector.load %arg5[%c0_9, %c0_10] : memref<1x8xf32, #tpu.memory_space<vmem>>, vector<1x8xf32>
    %12 = vector.broadcast %11 : vector<1x8xf32> to vector<128x8xf32>
    %13 = arith.addf %10, %12 : vector<128x8xf32>
    %cst_11 = arith.constant 0.000000e+00 : f32
    %14 = vector.broadcast %cst_11 : f32 to vector<128x8xf32>
    %15 = arith.maximumf %13, %14 : vector<128x8xf32>
    %16 = arith.truncf %15 : vector<128x8xf32> to vector<128x8xbf16>
    %c0_12 = arith.constant 0 : index
    %c0_13 = arith.constant 0 : index
    %17 = vector.load %arg6[%c0_12, %c0_13] : memref<128x8xbf16, #tpu.memory_space<vmem>>, vector<128x8xbf16>
    tpu.vector_store %arg6[%c0_12, %c0_13], %16 {strides = array<i32>} : memref<128x8xbf16, #tpu.memory_space<vmem>>, vector<128x8xbf16>,
    return
  }
  func.func @transform_0(%arg0: i32) -> (i32, i32) {
    %c0_i32 = arith.constant 0 : i32
    %c0_i32_0 = arith.constant 0 : i32
    return %arg0, %c0_i32 : i32, i32
  }
  func.func @transform_1(%arg0: i32) -> (i32, i32) {
    %c0_i32 = arith.constant 0 : i32
    %c0_i32_0 = arith.constant 0 : i32
    %c0_i32_1 = arith.constant 0 : i32
    return %c0_i32, %c0_i32_0 : i32, i32
  }
  func.func @transform_2(%arg0: i32) -> (i32, i32) {
    %c0_i32 = arith.constant 0 : i32
    %c0_i32_0 = arith.constant 0 : i32
    %c0_i32_1 = arith.constant 0 : i32
    return %c0_i32, %c0_i32_0 : i32, i32
  }
  func.func @transform_3(%arg0: i32) -> (i32, i32) {
    %c0_i32 = arith.constant 0 : i32
    %c0_i32_0 = arith.constant 0 : i32
    %c0_i32_1 = arith.constant 0 : i32
    return %c0_i32, %c0_i32_0 : i32, i32
  }
  func.func @transform_4(%arg0: i32) -> (i32, i32) {
    %c0_i32 = arith.constant 0 : i32
    %c0_i32_0 = arith.constant 0 : i32
    %c0_i32_1 = arith.constant 0 : i32
    return %c0_i32, %c0_i32_0 : i32, i32
  }
  func.func @transform_5(%arg0: i32) -> (i32, i32) {
    %c0_i32 = arith.constant 0 : i32
    %c0_i32_0 = arith.constant 0 : i32
    return %arg0, %c0_i32 : i32, i32
  }
}

module attributes {stable_mosaic.version = 11 : i64} {
  func.func @_fused2_kernel(%arg0: i32, %arg1: memref<128x216xbf16, #tpu.memory_space<vmem>>, %arg2: memref<216x108xbf16, #tpu.memory_space<vmem>>, %arg3: memref<1x108xf32, #tpu.memory_space<vmem>>, %arg4: memref<108x8xbf16, #tpu.memory_space<vmem>>, %arg5: memref<1x8xf32, #tpu.memory_space<vmem>>, %arg6: memref<128x8xbf16, #tpu.memory_space<vmem>>) attributes {dimension_semantics = [#tpu.dimension_semantics<parallel>], iteration_bounds = array<i64: 1>, scalar_prefetch = 0 : i64, scratch_operands = 0 : i64, tpu.core_type = #tpu.core_type<tc>, window_params = [{transform_indices = @transform_0, window_bounds = array<i64: 128, 216>}, {pipeline_mode = #tpu.pipeline_mode<synchronous>, transform_indices = @transform_1, window_bounds = array<i64: 216, 108>}, {pipeline_mode = #tpu.pipeline_mode<synchronous>, transform_indices = @transform_2, window_bounds = array<i64: 1, 108>}, {pipeline_mode = #tpu.pipeline_mode<synchronous>, transform_indices = @transform_3, window_bounds = array<i64: 108, 8>}, {pipeline_mode = #tpu.pipeline_mode<synchronous>, transform_indices = @transform_4, window_bounds = array<i64: 1, 8>}, {transform_indices = @transform_5, window_bounds = array<i64: 128, 8>}]} {
    %c0 = arith.constant 0 : index
    %c0_0 = arith.constant 0 : index
    %0 = vector.load %arg1[%c0, %c0_0] : memref<128x216xbf16, #tpu.memory_space<vmem>>, vector<128x216xbf16>
    %c0_1 = arith.constant 0 : index
    %c0_2 = arith.constant 0 : index
    %1 = vector.load %arg2[%c0_1, %c0_2] : memref<216x108xbf16, #tpu.memory_space<vmem>>, vector<216x108xbf16>
    %cst = arith.constant dense<0.000000e+00> : vector<128x108xf32>
    %2 = tpu.matmul %0, %1, %cst {dimension_numbers = #tpu.dot_dimension_numbers<[1], [0], [0], [1], [0, 0, 1, 1], [], []>} : vector<128x216xbf16>, vector<216x108xbf16>, vector<128x108xf32> -> vector<128x108xf32>
    %c0_3 = arith.constant 0 : index
    %c0_4 = arith.constant 0 : index
    %3 = vector.load %arg3[%c0_3, %c0_4] : memref<1x108xf32, #tpu.memory_space<vmem>>, vector<1x108xf32>
    %4 = vector.broadcast %3 : vector<1x108xf32> to vector<128x108xf32>
    %5 = arith.addf %2, %4 : vector<128x108xf32>
    %cst_5 = arith.constant 0.000000e+00 : f32
    %6 = vector.broadcast %cst_5 : f32 to vector<128x108xf32>
    %7 = arith.maximumf %5, %6 : vector<128x108xf32>
    %8 = arith.truncf %7 : vector<128x108xf32> to vector<128x108xbf16>
    %c0_6 = arith.constant 0 : index
    %c0_7 = arith.constant 0 : index
    %9 = vector.load %arg4[%c0_6, %c0_7] : memref<108x8xbf16, #tpu.memory_space<vmem>>, vector<108x8xbf16>
    %cst_8 = arith.constant dense<0.000000e+00> : vector<128x8xf32>
    %10 = tpu.matmul %8, %9, %cst_8 {dimension_numbers = #tpu.dot_dimension_numbers<[1], [0], [0], [1], [0, 0, 1, 1], [], []>} : vector<128x108xbf16>, vector<108x8xbf16>, vector<128x8xf32> -> vector<128x8xf32>
    %c0_9 = arith.constant 0 : index
    %c0_10 = arith.constant 0 : index
    %11 = vector.load %arg5[%c0_9, %c0_10] : memref<1x8xf32, #tpu.memory_space<vmem>>, vector<1x8xf32>
    %12 = vector.broadcast %11 : vector<1x8xf32> to vector<128x8xf32>
    %13 = arith.addf %10, %12 : vector<128x8xf32>
    %cst_11 = arith.constant 0.000000e+00 : f32
    %14 = vector.broadcast %cst_11 : f32 to vector<128x8xf32>
    %15 = arith.maximumf %13, %14 : vector<128x8xf32>
    %16 = arith.truncf %15 : vector<128x8xf32> to vector<128x8xbf16>
    %c0_12 = arith.constant 0 : index
    %c0_13 = arith.constant 0 : index
    %17 = vector.load %arg6[%c0_12, %c0_13] : memref<128x8xbf16, #tpu.memory_space<vmem>>, vector<128x8xbf16>
    tpu.vector_store %arg6[%c0_12, %c0_13], %16 {strides = array<i32>} : memref<128x8xbf16, #tpu.memory_space<vmem>>, vector<128x8xbf16>,
    return
  }
  func.func @transform_0(%arg0: i32) -> (i32, i32) {
    %c0_i32 = arith.constant 0 : i32
    %c0_i32_0 = arith.constant 0 : i32
    return %arg0, %c0_i32 : i32, i32
  }
  func.func @transform_1(%arg0: i32) -> (i32, i32) {
    %c0_i32 = arith.constant 0 : i32
    %c0_i32_0 = arith.constant 0 : i32
    %c0_i32_1 = arith.constant 0 : i32
    return %c0_i32, %c0_i32_0 : i32, i32
  }
  func.func @transform_2(%arg0: i32) -> (i32, i32) {
    %c0_i32 = arith.constant 0 : i32
    %c0_i32_0 = arith.constant 0 : i32
    %c0_i32_1 = arith.constant 0 : i32
    return %c0_i32, %c0_i32_0 : i32, i32
  }
  func.func @transform_3(%arg0: i32) -> (i32, i32) {
    %c0_i32 = arith.constant 0 : i32
    %c0_i32_0 = arith.constant 0 : i32
    %c0_i32_1 = arith.constant 0 : i32
    return %c0_i32, %c0_i32_0 : i32, i32
  }
  func.func @transform_4(%arg0: i32) -> (i32, i32) {
    %c0_i32 = arith.constant 0 : i32
    %c0_i32_0 = arith.constant 0 : i32
    %c0_i32_1 = arith.constant 0 : i32
    return %c0_i32, %c0_i32_0 : i32, i32
  }
  func.func @transform_5(%arg0: i32) -> (i32, i32) {
    %c0_i32 = arith.constant 0 : i32
    %c0_i32_0 = arith.constant 0 : i32
    return %arg0, %c0_i32 : i32, i32
  }
}

module attributes {stable_mosaic.version = 11 : i64} {
  func.func @_fused_kernel(%arg0: i32, %arg1: memref<128x24xbf16, #tpu.memory_space<vmem>>, %arg2: memref<24x12xbf16, #tpu.memory_space<vmem>>, %arg3: memref<1x12xf32, #tpu.memory_space<vmem>>, %arg4: memref<128x12xbf16, #tpu.memory_space<vmem>>) attributes {dimension_semantics = [#tpu.dimension_semantics<parallel>], iteration_bounds = array<i64: 1>, scalar_prefetch = 0 : i64, scratch_operands = 0 : i64, tpu.core_type = #tpu.core_type<tc>, window_params = [{transform_indices = @transform_0, window_bounds = array<i64: 128, 24>}, {pipeline_mode = #tpu.pipeline_mode<synchronous>, transform_indices = @transform_1, window_bounds = array<i64: 24, 12>}, {pipeline_mode = #tpu.pipeline_mode<synchronous>, transform_indices = @transform_2, window_bounds = array<i64: 1, 12>}, {transform_indices = @transform_3, window_bounds = array<i64: 128, 12>}]} {
    %c0 = arith.constant 0 : index
    %c0_0 = arith.constant 0 : index
    %0 = vector.load %arg1[%c0, %c0_0] : memref<128x24xbf16, #tpu.memory_space<vmem>>, vector<128x24xbf16>
    %c0_1 = arith.constant 0 : index
    %c0_2 = arith.constant 0 : index
    %1 = vector.load %arg2[%c0_1, %c0_2] : memref<24x12xbf16, #tpu.memory_space<vmem>>, vector<24x12xbf16>
    %cst = arith.constant dense<0.000000e+00> : vector<128x12xf32>
    %2 = tpu.matmul %0, %1, %cst {dimension_numbers = #tpu.dot_dimension_numbers<[1], [0], [0], [1], [0, 0, 1, 1], [], []>} : vector<128x24xbf16>, vector<24x12xbf16>, vector<128x12xf32> -> vector<128x12xf32>
    %c0_3 = arith.constant 0 : index
    %c0_4 = arith.constant 0 : index
    %3 = vector.load %arg3[%c0_3, %c0_4] : memref<1x12xf32, #tpu.memory_space<vmem>>, vector<1x12xf32>
    %4 = vector.broadcast %3 : vector<1x12xf32> to vector<128x12xf32>
    %5 = arith.addf %2, %4 : vector<128x12xf32>
    %cst_5 = arith.constant 0.000000e+00 : f32
    %6 = vector.broadcast %cst_5 : f32 to vector<128x12xf32>
    %7 = arith.maximumf %5, %6 : vector<128x12xf32>
    %8 = arith.truncf %7 : vector<128x12xf32> to vector<128x12xbf16>
    %c0_6 = arith.constant 0 : index
    %c0_7 = arith.constant 0 : index
    %9 = vector.load %arg4[%c0_6, %c0_7] : memref<128x12xbf16, #tpu.memory_space<vmem>>, vector<128x12xbf16>
    tpu.vector_store %arg4[%c0_6, %c0_7], %8 {strides = array<i32>} : memref<128x12xbf16, #tpu.memory_space<vmem>>, vector<128x12xbf16>,
    return
  }
  func.func @transform_0(%arg0: i32) -> (i32, i32) {
    %c0_i32 = arith.constant 0 : i32
    %c0_i32_0 = arith.constant 0 : i32
    return %arg0, %c0_i32 : i32, i32
  }
  func.func @transform_1(%arg0: i32) -> (i32, i32) {
    %c0_i32 = arith.constant 0 : i32
    %c0_i32_0 = arith.constant 0 : i32
    %c0_i32_1 = arith.constant 0 : i32
    return %c0_i32, %c0_i32_0 : i32, i32
  }
  func.func @transform_2(%arg0: i32) -> (i32, i32) {
    %c0_i32 = arith.constant 0 : i32
    %c0_i32_0 = arith.constant 0 : i32
    %c0_i32_1 = arith.constant 0 : i32
    return %c0_i32, %c0_i32_0 : i32, i32
  }
  func.func @transform_3(%arg0: i32) -> (i32, i32) {
    %c0_i32 = arith.constant 0 : i32
    %c0_i32_0 = arith.constant 0 : i32
    return %arg0, %c0_i32 : i32, i32
  }
}

module attributes {stable_mosaic.version = 11 : i64} {
  func.func @_fused_kernel(%arg0: i32, %arg1: memref<32x108xbf16, #tpu.memory_space<vmem>>, %arg2: memref<108x128xbf16, #tpu.memory_space<vmem>>, %arg3: memref<1x128xf32, #tpu.memory_space<vmem>>, %arg4: memref<32x128xbf16, #tpu.memory_space<vmem>>) attributes {dimension_semantics = [#tpu.dimension_semantics<parallel>], iteration_bounds = array<i64: 1>, scalar_prefetch = 0 : i64, scratch_operands = 0 : i64, tpu.core_type = #tpu.core_type<tc>, window_params = [{transform_indices = @transform_0, window_bounds = array<i64: 32, 108>}, {pipeline_mode = #tpu.pipeline_mode<synchronous>, transform_indices = @transform_1, window_bounds = array<i64: 108, 128>}, {pipeline_mode = #tpu.pipeline_mode<synchronous>, transform_indices = @transform_2, window_bounds = array<i64: 1, 128>}, {transform_indices = @transform_3, window_bounds = array<i64: 32, 128>}]} {
    %c0 = arith.constant 0 : index
    %c0_0 = arith.constant 0 : index
    %0 = vector.load %arg1[%c0, %c0_0] : memref<32x108xbf16, #tpu.memory_space<vmem>>, vector<32x108xbf16>
    %c0_1 = arith.constant 0 : index
    %c0_2 = arith.constant 0 : index
    %1 = vector.load %arg2[%c0_1, %c0_2] : memref<108x128xbf16, #tpu.memory_space<vmem>>, vector<108x128xbf16>
    %cst = arith.constant dense<0.000000e+00> : vector<32x128xf32>
    %2 = tpu.matmul %0, %1, %cst {dimension_numbers = #tpu.dot_dimension_numbers<[1], [0], [0], [1], [0, 0, 1, 1], [], []>} : vector<32x108xbf16>, vector<108x128xbf16>, vector<32x128xf32> -> vector<32x128xf32>
    %c0_3 = arith.constant 0 : index
    %c0_4 = arith.constant 0 : index
    %3 = vector.load %arg3[%c0_3, %c0_4] : memref<1x128xf32, #tpu.memory_space<vmem>>, vector<1x128xf32>
    %4 = vector.broadcast %3 : vector<1x128xf32> to vector<32x128xf32>
    %5 = arith.addf %2, %4 : vector<32x128xf32>
    %cst_5 = arith.constant 0.000000e+00 : f32
    %6 = vector.broadcast %cst_5 : f32 to vector<32x128xf32>
    %7 = arith.maximumf %5, %6 : vector<32x128xf32>
    %8 = arith.truncf %7 : vector<32x128xf32> to vector<32x128xbf16>
    %c0_6 = arith.constant 0 : index
    %c0_7 = arith.constant 0 : index
    %9 = vector.load %arg4[%c0_6, %c0_7] : memref<32x128xbf16, #tpu.memory_space<vmem>>, vector<32x128xbf16>
    tpu.vector_store %arg4[%c0_6, %c0_7], %8 {strides = array<i32>} : memref<32x128xbf16, #tpu.memory_space<vmem>>, vector<32x128xbf16>,
    return
  }
  func.func @transform_0(%arg0: i32) -> (i32, i32) {
    %c0_i32 = arith.constant 0 : i32
    %c0_i32_0 = arith.constant 0 : i32
    return %arg0, %c0_i32 : i32, i32
  }
  func.func @transform_1(%arg0: i32) -> (i32, i32) {
    %c0_i32 = arith.constant 0 : i32
    %c0_i32_0 = arith.constant 0 : i32
    %c0_i32_1 = arith.constant 0 : i32
    return %c0_i32, %c0_i32_0 : i32, i32
  }
  func.func @transform_2(%arg0: i32) -> (i32, i32) {
    %c0_i32 = arith.constant 0 : i32
    %c0_i32_0 = arith.constant 0 : i32
    %c0_i32_1 = arith.constant 0 : i32
    return %c0_i32, %c0_i32_0 : i32, i32
  }
  func.func @transform_3(%arg0: i32) -> (i32, i32) {
    %c0_i32 = arith.constant 0 : i32
    %c0_i32_0 = arith.constant 0 : i32
    return %arg0, %c0_i32 : i32, i32
  }
}

module attributes {stable_mosaic.version = 11 : i64} {
  func.func @_fused_kernel(%arg0: i32, %arg1: memref<8x1152xbf16, #tpu.memory_space<vmem>>, %arg2: memref<1152x128xbf16, #tpu.memory_space<vmem>>, %arg3: memref<1x128xf32, #tpu.memory_space<vmem>>, %arg4: memref<8x128xbf16, #tpu.memory_space<vmem>>) attributes {dimension_semantics = [#tpu.dimension_semantics<parallel>], iteration_bounds = array<i64: 1>, scalar_prefetch = 0 : i64, scratch_operands = 0 : i64, tpu.core_type = #tpu.core_type<tc>, window_params = [{transform_indices = @transform_0, window_bounds = array<i64: 8, 1152>}, {pipeline_mode = #tpu.pipeline_mode<synchronous>, transform_indices = @transform_1, window_bounds = array<i64: 1152, 128>}, {pipeline_mode = #tpu.pipeline_mode<synchronous>, transform_indices = @transform_2, window_bounds = array<i64: 1, 128>}, {transform_indices = @transform_3, window_bounds = array<i64: 8, 128>}]} {
    %c0 = arith.constant 0 : index
    %c0_0 = arith.constant 0 : index
    %0 = vector.load %arg1[%c0, %c0_0] : memref<8x1152xbf16, #tpu.memory_space<vmem>>, vector<8x1152xbf16>
    %c0_1 = arith.constant 0 : index
    %c0_2 = arith.constant 0 : index
    %1 = vector.load %arg2[%c0_1, %c0_2] : memref<1152x128xbf16, #tpu.memory_space<vmem>>, vector<1152x128xbf16>
    %cst = arith.constant dense<0.000000e+00> : vector<8x128xf32>
    %2 = tpu.matmul %0, %1, %cst {dimension_numbers = #tpu.dot_dimension_numbers<[1], [0], [0], [1], [0, 0, 1, 1], [], []>} : vector<8x1152xbf16>, vector<1152x128xbf16>, vector<8x128xf32> -> vector<8x128xf32>
    %c0_3 = arith.constant 0 : index
    %c0_4 = arith.constant 0 : index
    %3 = vector.load %arg3[%c0_3, %c0_4] : memref<1x128xf32, #tpu.memory_space<vmem>>, vector<1x128xf32>
    %4 = vector.broadcast %3 : vector<1x128xf32> to vector<8x128xf32>
    %5 = arith.addf %2, %4 : vector<8x128xf32>
    %cst_5 = arith.constant 0.000000e+00 : f32
    %6 = vector.broadcast %cst_5 : f32 to vector<8x128xf32>
    %7 = arith.maximumf %5, %6 : vector<8x128xf32>
    %8 = arith.truncf %7 : vector<8x128xf32> to vector<8x128xbf16>
    %c0_6 = arith.constant 0 : index
    %c0_7 = arith.constant 0 : index
    %9 = vector.load %arg4[%c0_6, %c0_7] : memref<8x128xbf16, #tpu.memory_space<vmem>>, vector<8x128xbf16>
    tpu.vector_store %arg4[%c0_6, %c0_7], %8 {strides = array<i32>} : memref<8x128xbf16, #tpu.memory_space<vmem>>, vector<8x128xbf16>,
    return
  }
  func.func @transform_0(%arg0: i32) -> (i32, i32) {
    %c0_i32 = arith.constant 0 : i32
    %c0_i32_0 = arith.constant 0 : i32
    return %arg0, %c0_i32 : i32, i32
  }
  func.func @transform_1(%arg0: i32) -> (i32, i32) {
    %c0_i32 = arith.constant 0 : i32
    %c0_i32_0 = arith.constant 0 : i32
    %c0_i32_1 = arith.constant 0 : i32
    return %c0_i32, %c0_i32_0 : i32, i32
  }
  func.func @transform_2(%arg0: i32) -> (i32, i32) {
    %c0_i32 = arith.constant 0 : i32
    %c0_i32_0 = arith.constant 0 : i32
    %c0_i32_1 = arith.constant 0 : i32
    return %c0_i32, %c0_i32_0 : i32, i32
  }
  func.func @transform_3(%arg0: i32) -> (i32, i32) {
    %c0_i32 = arith.constant 0 : i32
    %c0_i32_0 = arith.constant 0 : i32
    return %arg0, %c0_i32 : i32, i32
  }
}

module attributes {stable_mosaic.version = 11 : i64} {
  func.func @_pool_linear_kernel(%arg0: i32, %arg1: memref<2x512xbf16, #tpu.memory_space<vmem>>, %arg2: memref<512x128xbf16, #tpu.memory_space<vmem>>, %arg3: memref<512x10xbf16, #tpu.memory_space<vmem>>, %arg4: memref<1x10xf32, #tpu.memory_space<vmem>>, %arg5: memref<2x128xf32, #tpu.memory_space<vmem>>, %arg6: memref<2x10xf32, #tpu.memory_space<vmem>>) attributes {dimension_semantics = [#tpu.dimension_semantics<arbitrary>], iteration_bounds = array<i64: 1>, scalar_prefetch = 0 : i64, scratch_operands = 0 : i64, tpu.core_type = #tpu.core_type<tc>, window_params = [{pipeline_mode = #tpu.pipeline_mode<synchronous>, transform_indices = @transform_0, window_bounds = array<i64: 2, 512>}, {pipeline_mode = #tpu.pipeline_mode<synchronous>, transform_indices = @transform_1, window_bounds = array<i64: 512, 128>}, {pipeline_mode = #tpu.pipeline_mode<synchronous>, transform_indices = @transform_2, window_bounds = array<i64: 512, 10>}, {pipeline_mode = #tpu.pipeline_mode<synchronous>, transform_indices = @transform_3, window_bounds = array<i64: 1, 10>}, {pipeline_mode = #tpu.pipeline_mode<synchronous>, transform_indices = @transform_4, window_bounds = array<i64: 2, 128>}, {pipeline_mode = #tpu.pipeline_mode<synchronous>, transform_indices = @transform_5, window_bounds = array<i64: 2, 10>}]} {
    %c0 = arith.constant 0 : index
    %c0_0 = arith.constant 0 : index
    %0 = vector.load %arg1[%c0, %c0_0] : memref<2x512xbf16, #tpu.memory_space<vmem>>, vector<2x512xbf16>
    %c0_1 = arith.constant 0 : index
    %c0_2 = arith.constant 0 : index
    %1 = vector.load %arg2[%c0_1, %c0_2] : memref<512x128xbf16, #tpu.memory_space<vmem>>, vector<512x128xbf16>
    %cst = arith.constant dense<0.000000e+00> : vector<2x128xf32>
    %2 = tpu.matmul %0, %1, %cst {dimension_numbers = #tpu.dot_dimension_numbers<[1], [0], [0], [1], [0, 0, 1, 1], [], []>} : vector<2x512xbf16>, vector<512x128xbf16>, vector<2x128xf32> -> vector<2x128xf32>
    %c0_3 = arith.constant 0 : index
    %c0_4 = arith.constant 0 : index
    %3 = vector.load %arg5[%c0_3, %c0_4] : memref<2x128xf32, #tpu.memory_space<vmem>>, vector<2x128xf32>
    tpu.vector_store %arg5[%c0_3, %c0_4], %2 {strides = array<i32>} : memref<2x128xf32, #tpu.memory_space<vmem>>, vector<2x128xf32>,
    %c0_5 = arith.constant 0 : index
    %c0_6 = arith.constant 0 : index
    %4 = vector.load %arg3[%c0_5, %c0_6] : memref<512x10xbf16, #tpu.memory_space<vmem>>, vector<512x10xbf16>
    %cst_7 = arith.constant dense<0.000000e+00> : vector<2x10xf32>
    %5 = tpu.matmul %0, %4, %cst_7 {dimension_numbers = #tpu.dot_dimension_numbers<[1], [0], [0], [1], [0, 0, 1, 1], [], []>} : vector<2x512xbf16>, vector<512x10xbf16>, vector<2x10xf32> -> vector<2x10xf32>
    %c0_8 = arith.constant 0 : index
    %c0_9 = arith.constant 0 : index
    %6 = vector.load %arg4[%c0_8, %c0_9] : memref<1x10xf32, #tpu.memory_space<vmem>>, vector<1x10xf32>
    %7 = vector.broadcast %6 : vector<1x10xf32> to vector<2x10xf32>
    %8 = arith.addf %5, %7 : vector<2x10xf32>
    %c0_10 = arith.constant 0 : index
    %c0_11 = arith.constant 0 : index
    %9 = vector.load %arg6[%c0_10, %c0_11] : memref<2x10xf32, #tpu.memory_space<vmem>>, vector<2x10xf32>
    tpu.vector_store %arg6[%c0_10, %c0_11], %8 {strides = array<i32>} : memref<2x10xf32, #tpu.memory_space<vmem>>, vector<2x10xf32>,
    return
  }
  func.func @transform_0(%arg0: i32) -> (i32, i32) {
    %c0_i32 = arith.constant 0 : i32
    %c0_i32_0 = arith.constant 0 : i32
    %c0_i32_1 = arith.constant 0 : i32
    return %c0_i32, %c0_i32_0 : i32, i32
  }
  func.func @transform_1(%arg0: i32) -> (i32, i32) {
    %c0_i32 = arith.constant 0 : i32
    %c0_i32_0 = arith.constant 0 : i32
    %c0_i32_1 = arith.constant 0 : i32
    return %c0_i32, %c0_i32_0 : i32, i32
  }
  func.func @transform_2(%arg0: i32) -> (i32, i32) {
    %c0_i32 = arith.constant 0 : i32
    %c0_i32_0 = arith.constant 0 : i32
    %c0_i32_1 = arith.constant 0 : i32
    return %c0_i32, %c0_i32_0 : i32, i32
  }
  func.func @transform_3(%arg0: i32) -> (i32, i32) {
    %c0_i32 = arith.constant 0 : i32
    %c0_i32_0 = arith.constant 0 : i32
    %c0_i32_1 = arith.constant 0 : i32
    return %c0_i32, %c0_i32_0 : i32, i32
  }
  func.func @transform_4(%arg0: i32) -> (i32, i32) {
    %c0_i32 = arith.constant 0 : i32
    %c0_i32_0 = arith.constant 0 : i32
    %c0_i32_1 = arith.constant 0 : i32
    return %c0_i32, %c0_i32_0 : i32, i32
  }
  func.func @transform_5(%arg0: i32) -> (i32, i32) {
    %c0_i32 = arith.constant 0 : i32
    %c0_i32_0 = arith.constant 0 : i32
    %c0_i32_1 = arith.constant 0 : i32
    return %c0_i32, %c0_i32_0 : i32, i32
  }
}

module attributes {stable_mosaic.version = 11 : i64} {
  func.func @_fused_kernel(%arg0: i32, %arg1: memref<32x144xbf16, #tpu.memory_space<vmem>>, %arg2: memref<144x128xbf16, #tpu.memory_space<vmem>>, %arg3: memref<1x128xf32, #tpu.memory_space<vmem>>, %arg4: memref<32x128xbf16, #tpu.memory_space<vmem>>) attributes {dimension_semantics = [#tpu.dimension_semantics<parallel>], iteration_bounds = array<i64: 1>, scalar_prefetch = 0 : i64, scratch_operands = 0 : i64, tpu.core_type = #tpu.core_type<tc>, window_params = [{transform_indices = @transform_0, window_bounds = array<i64: 32, 144>}, {pipeline_mode = #tpu.pipeline_mode<synchronous>, transform_indices = @transform_1, window_bounds = array<i64: 144, 128>}, {pipeline_mode = #tpu.pipeline_mode<synchronous>, transform_indices = @transform_2, window_bounds = array<i64: 1, 128>}, {transform_indices = @transform_3, window_bounds = array<i64: 32, 128>}]} {
    %c0 = arith.constant 0 : index
    %c0_0 = arith.constant 0 : index
    %0 = vector.load %arg1[%c0, %c0_0] : memref<32x144xbf16, #tpu.memory_space<vmem>>, vector<32x144xbf16>
    %c0_1 = arith.constant 0 : index
    %c0_2 = arith.constant 0 : index
    %1 = vector.load %arg2[%c0_1, %c0_2] : memref<144x128xbf16, #tpu.memory_space<vmem>>, vector<144x128xbf16>
    %cst = arith.constant dense<0.000000e+00> : vector<32x128xf32>
    %2 = tpu.matmul %0, %1, %cst {dimension_numbers = #tpu.dot_dimension_numbers<[1], [0], [0], [1], [0, 0, 1, 1], [], []>} : vector<32x144xbf16>, vector<144x128xbf16>, vector<32x128xf32> -> vector<32x128xf32>
    %c0_3 = arith.constant 0 : index
    %c0_4 = arith.constant 0 : index
    %3 = vector.load %arg3[%c0_3, %c0_4] : memref<1x128xf32, #tpu.memory_space<vmem>>, vector<1x128xf32>
    %4 = vector.broadcast %3 : vector<1x128xf32> to vector<32x128xf32>
    %5 = arith.addf %2, %4 : vector<32x128xf32>
    %cst_5 = arith.constant 0.000000e+00 : f32
    %6 = vector.broadcast %cst_5 : f32 to vector<32x128xf32>
    %7 = arith.maximumf %5, %6 : vector<32x128xf32>
    %8 = arith.truncf %7 : vector<32x128xf32> to vector<32x128xbf16>
    %c0_6 = arith.constant 0 : index
    %c0_7 = arith.constant 0 : index
    %9 = vector.load %arg4[%c0_6, %c0_7] : memref<32x128xbf16, #tpu.memory_space<vmem>>, vector<32x128xbf16>
    tpu.vector_store %arg4[%c0_6, %c0_7], %8 {strides = array<i32>} : memref<32x128xbf16, #tpu.memory_space<vmem>>, vector<32x128xbf16>,
    return
  }
  func.func @transform_0(%arg0: i32) -> (i32, i32) {
    %c0_i32 = arith.constant 0 : i32
    %c0_i32_0 = arith.constant 0 : i32
    return %arg0, %c0_i32 : i32, i32
  }
  func.func @transform_1(%arg0: i32) -> (i32, i32) {
    %c0_i32 = arith.constant 0 : i32
    %c0_i32_0 = arith.constant 0 : i32
    %c0_i32_1 = arith.constant 0 : i32
    return %c0_i32, %c0_i32_0 : i32, i32
  }
  func.func @transform_2(%arg0: i32) -> (i32, i32) {
    %c0_i32 = arith.constant 0 : i32
    %c0_i32_0 = arith.constant 0 : i32
    %c0_i32_1 = arith.constant 0 : i32
    return %c0_i32, %c0_i32_0 : i32, i32
  }
  func.func @transform_3(%arg0: i32) -> (i32, i32) {
    %c0_i32 = arith.constant 0 : i32
    %c0_i32_0 = arith.constant 0 : i32
    return %arg0, %c0_i32 : i32, i32
  }
}

</mosaic_0001>

<bundles_post_ra>
// kernel: _lambda_.12
= control target key start
LH: loop header
LB: loop body
LE: loop exit
PB: predicated region body
PF: predicated region fallthrough
CT: control target
= control target key end

     0   :  { %s999_s12 = smov 0   ;;  %s1166_s0 = inlined_call_operand.vmem [shape: bf16[512,27], index: 0, kind: input, shape index: {}]   ;;  %s1167_s1 = inlined_call_operand.vmem [shape: bf16[27,4], index: 1, kind: input, shape index: {}]   ;;  %s1168_s2 = inlined_call_operand.vmem [shape: f32[1,4], index: 2, kind: input, shape index: {}]   ;;  %s1169_s3 = inlined_call_operand.vmem [shape: bf16[512,4], index: 3, kind: output, shape index: {}]  }
   0x1 LB: > { %s775_s13 = sadd.s32 4294967295, %s976_s12   ;;  %p779_p0 = scmp.ge.s32.totalorder %s976_s12, 1  ;;  %s976_s12 = sphi %s999_s12, %s13_s12  }
   0x2   : > { %p138_p1 = scmp.lt.s32.totalorder %s976_s12, 3 }
   0x4   : > { %p139_p2 = pnand %p779_p0, %p138_p1 }
   0x5   : > { %v952_v0 = vld [vmem:[%s1167_s1] sm:$0xff] (!%p139_p2)   ;;  %vm358_vm0 = vcmask (!%p139_p2), 1044480   ;;  %v953_v1 = vld [vmem:[%s1167_s1 + $0x8] sm:$0x3f] (!%p139_p2)   ;;  %vm359_vm1 = vcmask (!%p139_p2), 1045504   ;;  %s780_s18 = sshll.u32 (!%p139_p2), %s775_s13, 5 }
   0x6   : > { %142 = sbr.rel (%p139_p2) target bundleno = 265 (0x109), region = 32  ;;  %903 = vmatprep.subr.bf16.mxu0 (!%p139_p2), %v952_v0  ;;  %939 = vmatprep.subr.bf16.mxu1 (!%p139_p2), %v952_v0  ;;  %v978_v2 = vmov (!%p139_p2), 65535   ;;  %p163_p3 = scmp.lt.s32.totalorder (!%p139_p2), %s780_s18, 63  ;;  %vm309_vm2 = vcmask (!%p139_p2), 220160   ;;  %v1058_v22 = vld [vmem:[%s1168_s2] ss:$0 sm:$0xff] (!%p139_p2) }
   0x7   : > { %904 = vmatpush3.bf16.msra.mxu0 (!%p139_p2), %v952_v0  ;;  %941 = vmatpush3.bf16.msra.mxu1 (!%p139_p2), %v952_v0  ;;  %v360_v3 = vsel (!%p139_p2), %vm358_vm0, 4294967295, %v978_v2  ;;  %vm686_vm3 = vcmask (!%p139_p2), 27648  }
   0x8   : > { %v361_v4 = vsel (!%p139_p2), %vm359_vm1, %v360_v3, 0 }
   0x9   : > { %v363_v5 = vand.u32 (!%p139_p2), %v953_v1, %v361_v4 }
   0xb   : > { %905 = vmatprep.subr.bf16.mxu0 (!%p139_p2), %v363_v5  ;;  %940 = vmatprep.subr.bf16.mxu1 (!%p139_p2), %v363_v5 }
   0xc   : > { %906 = vmatpush3.bf16.msra.mxu0 (!%p139_p2), %v363_v5  ;;  %942 = vmatpush3.bf16.msra.mxu1 (!%p139_p2), %v363_v5 }
   0xd   : > { %s1171_s18 = smov (!%p163_p3, %s780_s18), 63 }
   0xe   : > { %s781_s19 = sshll.u32 %s1171_s18, 2 }
   0xf   : > { %s1021_s22 = scalar_lea.vmem %s1166_s0, %s781_s19  ;;  %s1070_s27 = scalar_lea.vmem %s1169_s3, %s781_s19 }
  0x10   : > { %v954_v6 = vld [vmem:[%s1021_s22] sm:$0xff]   ;;  %v956_v8 = vld [vmem:[%s1021_s22 + $0x8] sm:$0xff]   ;;  %v958_v10 = vld [vmem:[%s1021_s22 + $0x10] sm:$0xff]  }
  0x11   : > { %v955_v7 = vld [vmem:[%s1021_s22 + $0x40] sm:$0xff]   ;;  %907 = vmatprep.mubr.msk.bf16.mxu0 %vm309_vm2, %v954_v6  ;;  %v957_v9 = vld [vmem:[%s1021_s22 + $0x48] sm:$0xff]   ;;  %v959_v11 = vld [vmem:[%s1021_s22 + $0x50] sm:$0xff]  }
  0x12   : > { %923 = vmatprep.mubr.msk.bf16.mxu1 %vm309_vm2, %v955_v7  ;;  %908 = vmatmul.mubr.msk.bf16.vlgmr.msra.gmra.mrb[0].mxu0 %vm309_vm2, %v956_v8  ;;  %v960_v12 = vld [vmem:[%s1021_s22 + $0x18] sm:$0xff]   ;;  %v962_v14 = vld [vmem:[%s1021_s22 + $0x20] sm:$0xff]   ;;  %v964_v16 = vld [vmem:[%s1021_s22 + $0x28] sm:$0xff]  }
  0x13   : > { %924 = vmatmul.mubr.msk.bf16.vlgmr.msra.gmra.mrb[0].mxu1 %vm309_vm2, %v957_v9  ;;  %911 = vmatprep.mubr.msk.bf16.mxu0 %vm309_vm2, %v958_v10  ;;  %v961_v13 = vld [vmem:[%s1021_s22 + $0x58] sm:$0xff]   ;;  %v963_v15 = vld [vmem:[%s1021_s22 + $0x60] sm:$0xff]   ;;  %v965_v17 = vld [vmem:[%s1021_s22 + $0x68] sm:$0xff]  }
  0x14   : > { %927 = vmatprep.mubr.msk.bf16.mxu1 %vm309_vm2, %v959_v11  ;;  %v966_v18 = vld [vmem:[%s1021_s22 + $0x30] sm:$0xff]   ;;  %v968_v20 = vld [vmem:[%s1021_s22 + $0x38] sm:$0xff]  }
  0x15   : > { %v967_v19 = vld [vmem:[%s1021_s22 + $0x70] sm:$0xff]   ;;  %v969_v21 = vld [vmem:[%s1021_s22 + $0x78] sm:$0xff]  }
  0x1a   : > { %912 = vmatmul.mubr.msk.bf16.gmra.mrb[4].mxu0 %vm309_vm2, %v960_v12 }
  0x1b   : > { %928 = vmatmul.mubr.msk.bf16.gmra.mrb[4].mxu1 %vm309_vm2, %v961_v13  ;;  %915 = vmatprep.mubr.msk.bf16.mxu0 %vm309_vm2, %v962_v14 }
  0x1c   : > { %931 = vmatprep.mubr.msk.bf16.mxu1 %vm309_vm2, %v963_v15 }
  0x22   : > { %916 = vmatmul.mubr.msk.bf16.gmra.mrb[8].mxu0 %vm309_vm2, %v964_v16 }
  0x23   : > { %932 = vmatmul.mubr.msk.bf16.gmra.mrb[8].mxu1 %vm309_vm2, %v965_v17  ;;  %919 = vmatprep.mubr.msk.bf16.mxu0 %vm309_vm2, %v966_v18 }
  0x24   : > { %935 = vmatprep.mubr.msk.bf16.mxu1 %vm309_vm2, %v967_v19 }
  0x2a   : > { %920 = vmatmul.mubr.msk.bf16.gmra.mrb[12].mxu0 %vm309_vm2, %v968_v20 }
  0x2b   : > { %936 = vmatmul.mubr.msk.bf16.gmra.mrb[12].mxu1 %vm309_vm2, %v969_v21 }
  0xe5   : > { %v909_v23 = vpop.f32.mrb[0].mxu0 }
  0xe6   : > { %v408_v24 = vadd.f32 %v909_v23, %v1058_v22  ;;  %v925_v25 = vpop.f32.mrb[0].mxu1  ;;  %v399_v26 = vpop.f32.mrb[1].mxu0 }
  0xe7   : > { %v472_v27 = vadd.f32 %v925_v25, %v1058_v22  ;;  %v400_v28 = vadd.f32 %v1058_v22, %v399_v26  ;;  %v463_v29 = vpop.f32.mrb[1].mxu1  ;;  %v910_v30 = vpop.f32.mrb[2].mxu0 }
  0xe8   : > { %v528_v31 = vmax.f32 %v408_v24, 0.0  ;;  %v464_v32 = vadd.f32 %v1058_v22, %v463_v29  ;;  %v411_v33 = vadd.f32 %v910_v30, %v1058_v22  ;;  %v926_v34 = vpop.f32.mrb[2].mxu1  ;;  %v402_v35 = vpop.f32.mrb[3].mxu0 }
  0xe9   : > { %v544_v36 = vmax.f32 %v472_v27, 0.0  ;;  %v526_v37 = vmax.f32 %v400_v28, 0.0  ;;  %v475_v38 = vadd.f32 %v926_v34, %v1058_v22  ;;  %v403_v39 = vadd.f32 %v1058_v22, %v402_v35  ;;  %v466_v40 = vpop.f32.mrb[3].mxu1 }
  0xea   : > { %v855_v41 = vpack.c.bf16 %v528_v31, %v528_v31  ;;  %v542_v42 = vmax.f32 %v464_v32, 0.0  ;;  %v529_v43 = vmax.f32 %v411_v33, 0.0  ;;  %v467_v44 = vadd.f32 %v1058_v22, %v466_v40 }
  0xeb   : > { %v871_v45 = vpack.c.bf16 %v544_v36, %v544_v36  ;;  %v853_v46 = vpack.c.bf16 %v526_v37, %v526_v37  ;;  %v545_v47 = vmax.f32 %v475_v38, 0.0  ;;  %v527_v48 = vmax.f32 %v403_v39, 0.0 }
  0xec   : > { %689 = vst.msk [vmem:[%s1070_s27 + $0x8] sm:$0xf] %vm686_vm3, %v855_v41  ;;  %v869_v49 = vpack.c.bf16 %v542_v42, %v542_v42  ;;  %v856_v50 = vpack.c.bf16 %v529_v43, %v529_v43  ;;  %v543_v51 = vmax.f32 %v467_v44, 0.0 }
  0xed   : > { %705 = vst.msk [vmem:[%s1070_s27 + $0x48] sm:$0xf] %vm686_vm3, %v871_v45  ;;  %687 = vst.msk [vmem:[%s1070_s27] sm:$0xf] %vm686_vm3, %v853_v46  ;;  %v872_v52 = vpack.c.bf16 %v545_v47, %v545_v47  ;;  %v854_v53 = vpack.c.bf16 %v527_v48, %v527_v48  ;;  %v913_v54 = vpop.f32.mrb[4].mxu0 }
  0xee   : > { %703 = vst.msk [vmem:[%s1070_s27 + $0x40] sm:$0xf] %vm686_vm3, %v869_v49  ;;  %690 = vst.msk [vmem:[%s1070_s27 + $0xc] sm:$0xf] %vm686_vm3, %v856_v50  ;;  %v870_v55 = vpack.c.bf16 %v543_v51, %v543_v51  ;;  %v424_v56 = vadd.f32 %v913_v54, %v1058_v22  ;;  %v929_v57 = vpop.f32.mrb[4].mxu1  ;;  %v415_v58 = vpop.f32.mrb[5].mxu0 }
  0xef   : > { %706 = vst.msk [vmem:[%s1070_s27 + $0x4c] sm:$0xf] %vm686_vm3, %v872_v52  ;;  %688 = vst.msk [vmem:[%s1070_s27 + $0x4] sm:$0xf] %vm686_vm3, %v854_v53  ;;  %v488_v59 = vadd.f32 %v929_v57, %v1058_v22  ;;  %v416_v60 = vadd.f32 %v1058_v22, %v415_v58  ;;  %v479_v61 = vpop.f32.mrb[5].mxu1  ;;  %v914_v62 = vpop.f32.mrb[6].mxu0 }
  0xf0   : > { %704 = vst.msk [vmem:[%s1070_s27 + $0x44] sm:$0xf] %vm686_vm3, %v870_v55  ;;  %v532_v63 = vmax.f32 %v424_v56, 0.0  ;;  %v480_v0 = vadd.f32 %v1058_v22, %v479_v61  ;;  %v427_v1 = vadd.f32 %v914_v62, %v1058_v22  ;;  %v930_v2 = vpop.f32.mrb[6].mxu1  ;;  %v418_v3 = vpop.f32.mrb[7].mxu0 }
  0xf1   : > { %v548_v4 = vmax.f32 %v488_v59, 0.0  ;;  %v530_v5 = vmax.f32 %v416_v60, 0.0  ;;  %v491_v6 = vadd.f32 %v930_v2, %v1058_v22  ;;  %v419_v7 = vadd.f32 %v1058_v22, %v418_v3  ;;  %v482_v8 = vpop.f32.mrb[7].mxu1 }
  0xf2   : > { %v859_v9 = vpack.c.bf16 %v532_v63, %v532_v63  ;;  %v546_v10 = vmax.f32 %v480_v0, 0.0  ;;  %v533_v11 = vmax.f32 %v427_v1, 0.0  ;;  %v483_v12 = vadd.f32 %v1058_v22, %v482_v8 }
  0xf3   : > { %v875_v13 = vpack.c.bf16 %v548_v4, %v548_v4  ;;  %v857_v14 = vpack.c.bf16 %v530_v5, %v530_v5  ;;  %v549_v15 = vmax.f32 %v491_v6, 0.0  ;;  %v531_v16 = vmax.f32 %v419_v7, 0.0 }
  0xf4   : > { %693 = vst.msk [vmem:[%s1070_s27 + $0x18] sm:$0xf] %vm686_vm3, %v859_v9  ;;  %v873_v17 = vpack.c.bf16 %v546_v10, %v546_v10  ;;  %v860_v18 = vpack.c.bf16 %v533_v11, %v533_v11  ;;  %v547_v19 = vmax.f32 %v483_v12, 0.0 }
  0xf5   : > { %709 = vst.msk [vmem:[%s1070_s27 + $0x58] sm:$0xf] %vm686_vm3, %v875_v13  ;;  %691 = vst.msk [vmem:[%s1070_s27 + $0x10] sm:$0xf] %vm686_vm3, %v857_v14  ;;  %v876_v20 = vpack.c.bf16 %v549_v15, %v549_v15  ;;  %v858_v21 = vpack.c.bf16 %v531_v16, %v531_v16  ;;  %v917_v23 = vpop.f32.mrb[8].mxu0 }
  0xf6   : > { %707 = vst.msk [vmem:[%s1070_s27 + $0x50] sm:$0xf] %vm686_vm3, %v873_v17  ;;  %694 = vst.msk [vmem:[%s1070_s27 + $0x1c] sm:$0xf] %vm686_vm3, %v860_v18  ;;  %v874_v24 = vpack.c.bf16 %v547_v19, %v547_v19  ;;  %v440_v25 = vadd.f32 %v917_v23, %v1058_v22  ;;  %v933_v26 = vpop.f32.mrb[8].mxu1  ;;  %v431_v27 = vpop.f32.mrb[9].mxu0 }
  0xf7   : > { %710 = vst.msk [vmem:[%s1070_s27 + $0x5c] sm:$0xf] %vm686_vm3, %v876_v20  ;;  %692 = vst.msk [vmem:[%s1070_s27 + $0x14] sm:$0xf] %vm686_vm3, %v858_v21  ;;  %v504_v28 = vadd.f32 %v933_v26, %v1058_v22  ;;  %v432_v29 = vadd.f32 %v1058_v22, %v431_v27  ;;  %v495_v30 = vpop.f32.mrb[9].mxu1  ;;  %v918_v31 = vpop.f32.mrb[10].mxu0 }
  0xf8   : > { %708 = vst.msk [vmem:[%s1070_s27 + $0x54] sm:$0xf] %vm686_vm3, %v874_v24  ;;  %v536_v32 = vmax.f32 %v440_v25, 0.0  ;;  %v496_v33 = vadd.f32 %v1058_v22, %v495_v30  ;;  %v443_v34 = vadd.f32 %v918_v31, %v1058_v22  ;;  %v934_v35 = vpop.f32.mrb[10].mxu1  ;;  %v434_v36 = vpop.f32.mrb[11].mxu0 }
  0xf9   : > { %v552_v37 = vmax.f32 %v504_v28, 0.0  ;;  %v534_v38 = vmax.f32 %v432_v29, 0.0  ;;  %v507_v39 = vadd.f32 %v934_v35, %v1058_v22  ;;  %v435_v40 = vadd.f32 %v1058_v22, %v434_v36  ;;  %v498_v41 = vpop.f32.mrb[11].mxu1 }
  0xfa   : > { %v863_v42 = vpack.c.bf16 %v536_v32, %v536_v32  ;;  %v550_v43 = vmax.f32 %v496_v33, 0.0  ;;  %v537_v44 = vmax.f32 %v443_v34, 0.0  ;;  %v499_v45 = vadd.f32 %v1058_v22, %v498_v41 }
  0xfb   : > { %v879_v46 = vpack.c.bf16 %v552_v37, %v552_v37  ;;  %v861_v47 = vpack.c.bf16 %v534_v38, %v534_v38  ;;  %v553_v48 = vmax.f32 %v507_v39, 0.0  ;;  %v535_v49 = vmax.f32 %v435_v40, 0.0 }
  0xfc   : > { %697 = vst.msk [vmem:[%s1070_s27 + $0x28] sm:$0xf] %vm686_vm3, %v863_v42  ;;  %v877_v50 = vpack.c.bf16 %v550_v43, %v550_v43  ;;  %v864_v51 = vpack.c.bf16 %v537_v44, %v537_v44  ;;  %v551_v52 = vmax.f32 %v499_v45, 0.0 }
  0xfd   : > { %713 = vst.msk [vmem:[%s1070_s27 + $0x68] sm:$0xf] %vm686_vm3, %v879_v46  ;;  %695 = vst.msk [vmem:[%s1070_s27 + $0x20] sm:$0xf] %vm686_vm3, %v861_v47  ;;  %v880_v53 = vpack.c.bf16 %v553_v48, %v553_v48  ;;  %v862_v54 = vpack.c.bf16 %v535_v49, %v535_v49  ;;  %v921_v55 = vpop.f32.mrb[12].mxu0 }
  0xfe   : > { %711 = vst.msk [vmem:[%s1070_s27 + $0x60] sm:$0xf] %vm686_vm3, %v877_v50  ;;  %698 = vst.msk [vmem:[%s1070_s27 + $0x2c] sm:$0xf] %vm686_vm3, %v864_v51  ;;  %v878_v56 = vpack.c.bf16 %v551_v52, %v551_v52  ;;  %v456_v57 = vadd.f32 %v921_v55, %v1058_v22  ;;  %v937_v58 = vpop.f32.mrb[12].mxu1  ;;  %v447_v59 = vpop.f32.mrb[13].mxu0 }
  0xff   : > { %714 = vst.msk [vmem:[%s1070_s27 + $0x6c] sm:$0xf] %vm686_vm3, %v880_v53  ;;  %696 = vst.msk [vmem:[%s1070_s27 + $0x24] sm:$0xf] %vm686_vm3, %v862_v54  ;;  %v520_v60 = vadd.f32 %v937_v58, %v1058_v22  ;;  %v448_v61 = vadd.f32 %v1058_v22, %v447_v59  ;;  %v511_v62 = vpop.f32.mrb[13].mxu1  ;;  %v922_v63 = vpop.f32.mrb[14].mxu0 }
 0x100   : > { %712 = vst.msk [vmem:[%s1070_s27 + $0x64] sm:$0xf] %vm686_vm3, %v878_v56  ;;  %v540_v0 = vmax.f32 %v456_v57, 0.0  ;;  %v512_v1 = vadd.f32 %v1058_v22, %v511_v62  ;;  %v459_v2 = vadd.f32 %v922_v63, %v1058_v22  ;;  %v938_v3 = vpop.f32.mrb[14].mxu1  ;;  %v450_v4 = vpop.f32.mrb[15].mxu0 }
 0x101   : > { %v556_v5 = vmax.f32 %v520_v60, 0.0  ;;  %v538_v6 = vmax.f32 %v448_v61, 0.0  ;;  %v523_v7 = vadd.f32 %v938_v3, %v1058_v22  ;;  %v451_v8 = vadd.f32 %v1058_v22, %v450_v4  ;;  %v514_v9 = vpop.f32.mrb[15].mxu1 }
 0x102   : > { %v867_v10 = vpack.c.bf16 %v540_v0, %v540_v0  ;;  %v554_v11 = vmax.f32 %v512_v1, 0.0  ;;  %v541_v12 = vmax.f32 %v459_v2, 0.0  ;;  %v515_v13 = vadd.f32 %v1058_v22, %v514_v9 }
 0x103   : > { %v883_v14 = vpack.c.bf16 %v556_v5, %v556_v5  ;;  %v865_v15 = vpack.c.bf16 %v538_v6, %v538_v6  ;;  %v557_v16 = vmax.f32 %v523_v7, 0.0  ;;  %v539_v17 = vmax.f32 %v451_v8, 0.0 }
 0x104   : > { %701 = vst.msk [vmem:[%s1070_s27 + $0x38] sm:$0xf] %vm686_vm3, %v867_v10  ;;  %v881_v18 = vpack.c.bf16 %v554_v11, %v554_v11  ;;  %v868_v19 = vpack.c.bf16 %v541_v12, %v541_v12  ;;  %v555_v20 = vmax.f32 %v515_v13, 0.0 }
 0x105   : > { %717 = vst.msk [vmem:[%s1070_s27 + $0x78] sm:$0xf] %vm686_vm3, %v883_v14  ;;  %699 = vst.msk [vmem:[%s1070_s27 + $0x30] sm:$0xf] %vm686_vm3, %v865_v15  ;;  %v884_v21 = vpack.c.bf16 %v557_v16, %v557_v16  ;;  %v866_v23 = vpack.c.bf16 %v539_v17, %v539_v17 }
 0x106   : > { %715 = vst.msk [vmem:[%s1070_s27 + $0x70] sm:$0xf] %vm686_vm3, %v881_v18  ;;  %702 = vst.msk [vmem:[%s1070_s27 + $0x3c] sm:$0xf] %vm686_vm3, %v868_v19  ;;  %v882_v22 = vpack.c.bf16 %v555_v20, %v555_v20 }
 0x107   : > { %718 = vst.msk [vmem:[%s1070_s27 + $0x7c] sm:$0xf] %vm686_vm3, %v884_v21  ;;  %700 = vst.msk [vmem:[%s1070_s27 + $0x34] sm:$0xf] %vm686_vm3, %v866_v23 }
 0x108   : > { %716 = vst.msk [vmem:[%s1070_s27 + $0x74] sm:$0xf] %vm686_vm3, %v882_v22 }
 0x109 PF: > { %s13_s12 = sadd.s32 1, %s976_s12  }
 0x10a   : > { %p10_p4 = scmp.ge.s32.totalorder %s13_s12, 4  }
 0x10c   :  { %12 = sbr.rel (!%p10_p4) target bundleno = 1 (0x1), region = 62 }

// kernel: _lambda_.14
= control target key start
LH: loop header
LB: loop body
LE: loop exit
PB: predicated region body
PF: predicated region fallthrough
CT: control target
= control target key end

     0   :  { %s1433_s18 = smov 0   ;;  %s1669_s0 = inlined_call_operand.vmem [shape: bf16[512,36], index: 0, kind: input, shape index: {}]   ;;  %s1670_s1 = inlined_call_operand.vmem [shape: bf16[36,36], index: 1, kind: input, shape index: {}]   ;;  %s1671_s2 = inlined_call_operand.vmem [shape: f32[1,36], index: 2, kind: input, shape index: {}]   ;;  %s1672_s3 = inlined_call_operand.vmem [shape: bf16[36,4], index: 3, kind: input, shape index: {}]   ;;  %s1673_s4 = inlined_call_operand.vmem [shape: f32[1,4], index: 4, kind: input, shape index: {}]   ;;  %s1674_s5 = inlined_call_operand.vmem [shape: bf16[512,4], index: 5, kind: output, shape index: {}]  }
   0x1 LB: > { %s1118_s19 = sadd.s32 4294967295, %s1401_s18   ;;  %p1122_p0 = scmp.ge.s32.totalorder %s1401_s18, 1  ;;  %s1401_s18 = sphi %s1433_s18, %s15_s18  }
   0x2   : > { %p188_p1 = scmp.lt.s32.totalorder %s1401_s18, 3 }
   0x4   : > { %p189_p2 = pnand %p1122_p0, %p188_p1 }
   0x5   : > { %v1373_v0 = vld [vmem:[%s1670_s1] sm:$0xff] (!%p189_p2)   ;;  %v1374_v1 = vld [vmem:[%s1670_s1 + $0x8] sm:$0xff] (!%p189_p2)   ;;  %s1123_s24 = sshll.u32 (!%p189_p2), %s1118_s19, 5  ;;  %v1375_v2 = vld [vmem:[%s1670_s1 + $0x10] ss:$0 sps:$4 sm:$0x33] (!%p189_p2)  }
   0x6   : > { %192 = sbr.rel (%p189_p2) target bundleno = 518 (0x206), region = 40  ;;  %1287 = vmatprep.subr.bf16.mxu0 (!%p189_p2), %v1373_v0  ;;  %p217_p3 = scmp.lt.s32.totalorder (!%p189_p2), %s1123_s24, 63  ;;  %v1392_v3 = vld [vmem:[%s1672_s3] sm:$0xff] (!%p189_p2)   ;;  %vm417_vm0 = vcmask (!%p189_p2), 1041408   ;;  %vm368_vm1 = vcmask (!%p189_p2), 293888   ;;  %v1393_v21 = vld [vmem:[%s1672_s3 + $0x8] sm:$0xff] (!%p189_p2)  }
   0x7   : > { %1288 = vmatpush3.bf16.msra.mxu0 (!%p189_p2), %v1373_v0  ;;  %1325 = vmatprep.subr.bf16.mxu1 (!%p189_p2), %v1392_v3  ;;  %v419_v4 = vsel (!%p189_p2), %vm417_vm0, %v1375_v2, 0  ;;  %v1394_v22 = vld [vmem:[%s1672_s3 + $0x10] ss:$0 sps:$4 sm:$0x33] (!%p189_p2)   ;;  %v1508_v24 = vld [vmem:[%s1671_s2] ss:$0 sm:$0xff] (!%p189_p2) }
   0x8   : > { %1289 = vmatprep.subr.bf16.mxu0 (!%p189_p2), %v1374_v1  ;;  %1326 = vmatpush3.bf16.msra.mxu1 (!%p189_p2), %v1392_v3  ;;  %v706_v23 = vsel (!%p189_p2), %vm417_vm0, %v1394_v22, 0  ;;  %vm1029_vm2 = vcmask (!%p189_p2), 27648  }
   0x9   : > { %1327 = vmatprep.subr.bf16.mxu1 (!%p189_p2), %v1393_v21 }
   0xb   : > { %1290 = vmatpush3.bf16.msra.mxu0 (!%p189_p2), %v1374_v1 }
   0xc   : > { %1363 = vmatprep.subr.msk.bf16.mxu0 (!%p189_p2), %vm417_vm0, %v1375_v2  ;;  %1328 = vmatpush3.bf16.msra.mxu1 (!%p189_p2), %v1393_v21 }
   0xd   : > { %s1676_s24 = smov (!%p217_p3, %s1123_s24), 63  ;;  %1364 = vmatprep.subr.msk.bf16.mxu1 %vm417_vm0, %v1394_v22 }
   0xe   : > { %s1124_s29 = sshll.u32 %s1676_s24, 2 }
   0xf   : > { %s1461_s7 = scalar_lea.vmem %s1669_s0, %s1124_s29  ;;  %1292 = vmatpush3.bf16.msra.mxu0 %v419_v4  ;;  %s1571_s19 = scalar_lea.vmem %s1674_s5, %s1124_s29 }
  0x10   : > { %v1376_v5 = vld [vmem:[%s1461_s7] sm:$0xff]   ;;  %v1377_v6 = vld [vmem:[%s1461_s7 + $0x8] sm:$0xff]   ;;  %v1378_v7 = vld [vmem:[%s1461_s7 + $0x10] sm:$0xff]   ;;  %1330 = vmatpush3.bf16.msra.mxu1 %v706_v23 }
  0x11   : > { %1293 = vmatprep.mubr.msk.bf16.mxu0 %vm368_vm1, %v1376_v5  ;;  %v1379_v8 = vld [vmem:[%s1461_s7 + $0x18] sm:$0xff]   ;;  %v1380_v9 = vld [vmem:[%s1461_s7 + $0x20] sm:$0xff]   ;;  %v1381_v10 = vld [vmem:[%s1461_s7 + $0x28] sm:$0xff]  }
  0x12   : > { %1294 = vmatmul.mubr.msk.bf16.vlgmr.msra.gmra.mrb[0].mxu0 %vm368_vm1, %v1377_v6  ;;  %v1382_v11 = vld [vmem:[%s1461_s7 + $0x30] sm:$0xff]   ;;  %v1383_v12 = vld [vmem:[%s1461_s7 + $0x38] sm:$0xff]   ;;  %v1384_v13 = vld [vmem:[%s1461_s7 + $0x40] sm:$0xff]  }
  0x13   : > { %1297 = vmatprep.mubr.msk.bf16.mxu0 %vm368_vm1, %v1378_v7  ;;  %v1385_v14 = vld [vmem:[%s1461_s7 + $0x48] sm:$0xff]   ;;  %v1386_v15 = vld [vmem:[%s1461_s7 + $0x50] sm:$0xff]   ;;  %v1387_v16 = vld [vmem:[%s1461_s7 + $0x58] sm:$0xff]  }
  0x14   : > { %v1388_v17 = vld [vmem:[%s1461_s7 + $0x60] sm:$0xff]   ;;  %v1389_v18 = vld [vmem:[%s1461_s7 + $0x68] sm:$0xff]   ;;  %v1390_v19 = vld [vmem:[%s1461_s7 + $0x70] sm:$0xff]  }
  0x15   : > { %v1391_v20 = vld [vmem:[%s1461_s7 + $0x78] sm:$0xff]  }
  0x1a   : > { %1298 = vmatmul.mubr.msk.bf16.gmra.mrb[4].mxu0 %vm368_vm1, %v1379_v8 }
  0x1b   : > { %1301 = vmatprep.mubr.msk.bf16.mxu0 %vm368_vm1, %v1380_v9 }
  0x22   : > { %1302 = vmatmul.mubr.msk.bf16.gmra.mrb[8].mxu0 %vm368_vm1, %v1381_v10 }
  0x23   : > { %1305 = vmatprep.mubr.msk.bf16.mxu0 %vm368_vm1, %v1382_v11 }
  0x2a   : > { %1306 = vmatmul.mubr.msk.bf16.gmra.mrb[12].mxu0 %vm368_vm1, %v1383_v12 }
  0x2b   : > { %1309 = vmatprep.mubr.msk.bf16.mxu0 %vm368_vm1, %v1384_v13 }
  0x32   : > { %1310 = vmatmul.mubr.msk.bf16.gmra.mrb[16].mxu0 %vm368_vm1, %v1385_v14 }
  0x33   : > { %1313 = vmatprep.mubr.msk.bf16.mxu0 %vm368_vm1, %v1386_v15 }
  0x3a   : > { %1314 = vmatmul.mubr.msk.bf16.gmra.mrb[20].mxu0 %vm368_vm1, %v1387_v16 }
  0x3b   : > { %1317 = vmatprep.mubr.msk.bf16.mxu0 %vm368_vm1, %v1388_v17 }
  0x42   : > { %1318 = vmatmul.mubr.msk.bf16.gmra.mrb[24].mxu0 %vm368_vm1, %v1389_v18 }
  0x43   : > { %1321 = vmatprep.mubr.msk.bf16.mxu0 %vm368_vm1, %v1390_v19 }
  0x4a   : > { %1322 = vmatmul.mubr.msk.bf16.gmra.mrb[28].mxu0 %vm368_vm1, %v1391_v20 }
  0xe5   : > { %v1295_v25 = vpop.f32.mrb[0].mxu0 }
  0xe6   : > { %v464_v26 = vadd.f32 %v1295_v25, %v1508_v24  ;;  %v455_v27 = vpop.f32.mrb[1].mxu0 }
  0xe7   : > { %v456_v28 = vadd.f32 %v1508_v24, %v455_v27  ;;  %v1296_v29 = vpop.f32.mrb[2].mxu0 }
  0xe8   : > { %v467_v30 = vadd.f32 %v1296_v29, %v1508_v24  ;;  %v458_v31 = vpop.f32.mrb[3].mxu0  ;;  %v584_v33 = vmax.f32 %v464_v26, 0.0 }
  0xe9   : > { %v459_v32 = vadd.f32 %v1508_v24, %v458_v31  ;;  %v582_v35 = vmax.f32 %v456_v28, 0.0 }
  0xea   : > { %v585_v34 = vmax.f32 %v467_v30, 0.0 }
  0xeb   : > { %v583_v36 = vmax.f32 %v459_v32, 0.0 }
  0xec   : > { %v615_v37 = vpack.c.bf16 %v585_v34, %v584_v33 }
  0xed   : > { %v1299_v38 = vpop.f32.mrb[4].mxu0  ;;  %v614_v39 = vpack.c.bf16 %v583_v36, %v582_v35 }
  0xee   : > { %v480_v40 = vadd.f32 %v1299_v38, %v1508_v24  ;;  %v471_v41 = vpop.f32.mrb[5].mxu0 }
  0xef   : > { %v472_v42 = vadd.f32 %v1508_v24, %v471_v41  ;;  %v1300_v43 = vpop.f32.mrb[6].mxu0  ;;  %1331 = vmatprep.mubr.msk.bf16.mxu1 %vm368_vm1, %v614_v39 }
  0xf0   : > { %v483_v44 = vadd.f32 %v1300_v43, %v1508_v24  ;;  %v474_v45 = vpop.f32.mrb[7].mxu0  ;;  %1332 = vmatmul.mubr.msk.bf16.vlgmr.msra.gmra.mrb[0].mxu1 %vm368_vm1, %v615_v37  ;;  %v588_v47 = vmax.f32 %v480_v40, 0.0 }
  0xf1   : > { %v475_v46 = vadd.f32 %v1508_v24, %v474_v45  ;;  %v586_v49 = vmax.f32 %v472_v42, 0.0 }
  0xf2   : > { %v589_v48 = vmax.f32 %v483_v44, 0.0 }
  0xf3   : > { %v587_v50 = vmax.f32 %v475_v46, 0.0 }
  0xf4   : > { %v617_v51 = vpack.c.bf16 %v589_v48, %v588_v47 }
  0xf5   : > { %v616_v52 = vpack.c.bf16 %v587_v50, %v586_v49  ;;  %v1303_v53 = vpop.f32.mrb[8].mxu0 }
  0xf6   : > { %v496_v54 = vadd.f32 %v1303_v53, %v1508_v24  ;;  %v487_v55 = vpop.f32.mrb[9].mxu0 }
  0xf7   : > { %v488_v56 = vadd.f32 %v1508_v24, %v487_v55  ;;  %v1304_v57 = vpop.f32.mrb[10].mxu0  ;;  %1335 = vmatprep.mubr.msk.bf16.mxu1 %vm368_vm1, %v616_v52 }
  0xf8   : > { %v499_v58 = vadd.f32 %v1304_v57, %v1508_v24  ;;  %v490_v59 = vpop.f32.mrb[11].mxu0  ;;  %1336 = vmatmul.mubr.msk.bf16.gmra.mrb[4].mxu1 %vm368_vm1, %v617_v51  ;;  %v592_v61 = vmax.f32 %v496_v54, 0.0 }
  0xf9   : > { %v491_v60 = vadd.f32 %v1508_v24, %v490_v59  ;;  %v590_v63 = vmax.f32 %v488_v56, 0.0 }
  0xfa   : > { %v593_v62 = vmax.f32 %v499_v58, 0.0 }
  0xfb   : > { %v591_v0 = vmax.f32 %v491_v60, 0.0 }
  0xfc   : > { %v619_v1 = vpack.c.bf16 %v593_v62, %v592_v61 }
  0xfd   : > { %v618_v2 = vpack.c.bf16 %v591_v0, %v590_v63  ;;  %v1307_v3 = vpop.f32.mrb[12].mxu0 }
  0xfe   : > { %v512_v4 = vadd.f32 %v1307_v3, %v1508_v24  ;;  %v503_v5 = vpop.f32.mrb[13].mxu0 }
  0xff   : > { %v504_v6 = vadd.f32 %v1508_v24, %v503_v5  ;;  %v1308_v7 = vpop.f32.mrb[14].mxu0  ;;  %1339 = vmatprep.mubr.msk.bf16.mxu1 %vm368_vm1, %v618_v2 }
 0x100   : > { %v515_v8 = vadd.f32 %v1308_v7, %v1508_v24  ;;  %v506_v9 = vpop.f32.mrb[15].mxu0  ;;  %1340 = vmatmul.mubr.msk.bf16.gmra.mrb[8].mxu1 %vm368_vm1, %v619_v1  ;;  %v596_v11 = vmax.f32 %v512_v4, 0.0 }
 0x101   : > { %v507_v10 = vadd.f32 %v1508_v24, %v506_v9  ;;  %v594_v13 = vmax.f32 %v504_v6, 0.0 }
 0x102   : > { %v597_v12 = vmax.f32 %v515_v8, 0.0 }
 0x103   : > { %v595_v14 = vmax.f32 %v507_v10, 0.0  ;;  %v1561_v10 = vld [vmem:[%s1673_s4] ss:$0 sm:$0xff] }
 0x104   : > { %v621_v15 = vpack.c.bf16 %v597_v12, %v596_v11 }
 0x105   : > { %v620_v16 = vpack.c.bf16 %v595_v14, %v594_v13  ;;  %v1311_v17 = vpop.f32.mrb[16].mxu0 }
 0x106   : > { %v528_v18 = vadd.f32 %v1311_v17, %v1508_v24  ;;  %v519_v19 = vpop.f32.mrb[17].mxu0 }
 0x107   : > { %v520_v20 = vadd.f32 %v1508_v24, %v519_v19  ;;  %v1312_v21 = vpop.f32.mrb[18].mxu0  ;;  %1343 = vmatprep.mubr.msk.bf16.mxu1 %vm368_vm1, %v620_v16 }
 0x108   : > { %v531_v22 = vadd.f32 %v1312_v21, %v1508_v24  ;;  %v522_v23 = vpop.f32.mrb[19].mxu0  ;;  %1344 = vmatmul.mubr.msk.bf16.gmra.mrb[12].mxu1 %vm368_vm1, %v621_v15  ;;  %v600_v26 = vmax.f32 %v528_v18, 0.0 }
 0x109   : > { %v523_v25 = vadd.f32 %v1508_v24, %v522_v23  ;;  %v598_v28 = vmax.f32 %v520_v20, 0.0 }
 0x10a   : > { %v601_v27 = vmax.f32 %v531_v22, 0.0 }
 0x10b   : > { %v599_v29 = vmax.f32 %v523_v25, 0.0 }
 0x10c   : > { %v623_v30 = vpack.c.bf16 %v601_v27, %v600_v26 }
 0x10d   : > { %v622_v31 = vpack.c.bf16 %v599_v29, %v598_v28  ;;  %v1315_v32 = vpop.f32.mrb[20].mxu0 }
 0x10e   : > { %v544_v33 = vadd.f32 %v1315_v32, %v1508_v24  ;;  %v535_v34 = vpop.f32.mrb[21].mxu0 }
 0x10f   : > { %v536_v35 = vadd.f32 %v1508_v24, %v535_v34  ;;  %v1316_v36 = vpop.f32.mrb[22].mxu0  ;;  %1347 = vmatprep.mubr.msk.bf16.mxu1 %vm368_vm1, %v622_v31 }
 0x110   : > { %v547_v37 = vadd.f32 %v1316_v36, %v1508_v24  ;;  %v538_v38 = vpop.f32.mrb[23].mxu0  ;;  %1348 = vmatmul.mubr.msk.bf16.gmra.mrb[16].mxu1 %vm368_vm1, %v623_v30  ;;  %v604_v40 = vmax.f32 %v544_v33, 0.0 }
 0x111   : > { %v539_v39 = vadd.f32 %v1508_v24, %v538_v38  ;;  %v602_v42 = vmax.f32 %v536_v35, 0.0 }
 0x112   : > { %v605_v41 = vmax.f32 %v547_v37, 0.0 }
 0x113   : > { %v603_v43 = vmax.f32 %v539_v39, 0.0 }
 0x114   : > { %v625_v44 = vpack.c.bf16 %v605_v41, %v604_v40 }
 0x115   : > { %v624_v45 = vpack.c.bf16 %v603_v43, %v602_v42  ;;  %v1319_v46 = vpop.f32.mrb[24].mxu0 }
 0x116   : > { %v560_v47 = vadd.f32 %v1319_v46, %v1508_v24  ;;  %v551_v48 = vpop.f32.mrb[25].mxu0 }
 0x117   : > { %v552_v49 = vadd.f32 %v1508_v24, %v551_v48  ;;  %v1320_v50 = vpop.f32.mrb[26].mxu0  ;;  %1351 = vmatprep.mubr.msk.bf16.mxu1 %vm368_vm1, %v624_v45 }
 0x118   : > { %v563_v51 = vadd.f32 %v1320_v50, %v1508_v24  ;;  %v554_v52 = vpop.f32.mrb[27].mxu0  ;;  %1352 = vmatmul.mubr.msk.bf16.gmra.mrb[20].mxu1 %vm368_vm1, %v625_v44  ;;  %v608_v54 = vmax.f32 %v560_v47, 0.0 }
 0x119   : > { %v555_v53 = vadd.f32 %v1508_v24, %v554_v52  ;;  %v606_v56 = vmax.f32 %v552_v49, 0.0 }
 0x11a   : > { %v609_v55 = vmax.f32 %v563_v51, 0.0 }
 0x11b   : > { %v607_v57 = vmax.f32 %v555_v53, 0.0 }
 0x11c   : > { %v627_v58 = vpack.c.bf16 %v609_v55, %v608_v54 }
 0x11d   : > { %v626_v59 = vpack.c.bf16 %v607_v57, %v606_v56  ;;  %v1323_v60 = vpop.f32.mrb[28].mxu0 }
 0x11e   : > { %v576_v61 = vadd.f32 %v1323_v60, %v1508_v24  ;;  %v567_v62 = vpop.f32.mrb[29].mxu0 }
 0x11f   : > { %v568_v63 = vadd.f32 %v1508_v24, %v567_v62  ;;  %v1324_v0 = vpop.f32.mrb[30].mxu0  ;;  %1355 = vmatprep.mubr.msk.bf16.mxu1 %vm368_vm1, %v626_v59 }
 0x120   : > { %v579_v1 = vadd.f32 %v1324_v0, %v1508_v24  ;;  %v570_v2 = vpop.f32.mrb[31].mxu0  ;;  %1356 = vmatmul.mubr.msk.bf16.gmra.mrb[24].mxu1 %vm368_vm1, %v627_v58  ;;  %v612_v4 = vmax.f32 %v576_v61, 0.0 }
 0x121   : > { %v571_v3 = vadd.f32 %v1508_v24, %v570_v2  ;;  %v610_v6 = vmax.f32 %v568_v63, 0.0 }
 0x122   : > { %v613_v5 = vmax.f32 %v579_v1, 0.0 }
 0x123   : > { %v611_v7 = vmax.f32 %v571_v3, 0.0 }
 0x124   : > { %v629_v8 = vpack.c.bf16 %v613_v5, %v612_v4 }
 0x125   : > { %v628_v9 = vpack.c.bf16 %v611_v7, %v610_v6 }
 0x127   : > { %1359 = vmatprep.mubr.msk.bf16.mxu1 %vm368_vm1, %v628_v9 }
 0x128   : > { %1360 = vmatmul.mubr.msk.bf16.gmra.mrb[28].mxu1 %vm368_vm1, %v629_v8 }
 0x1c3   : > { %v1333_v11 = vpop.f32.mrb[0].mxu1 }
 0x1c4   : > { %v751_v12 = vadd.f32 %v1333_v11, %v1561_v10  ;;  %v742_v24 = vpop.f32.mrb[1].mxu1 }
 0x1c5   : > { %v743_v13 = vadd.f32 %v1561_v10, %v742_v24  ;;  %v1334_v14 = vpop.f32.mrb[2].mxu1 }
 0x1c6   : > { %v871_v15 = vmax.f32 %v751_v12, 0.0  ;;  %v754_v16 = vadd.f32 %v1334_v14, %v1561_v10  ;;  %v745_v17 = vpop.f32.mrb[3].mxu1 }
 0x1c7   : > { %v869_v18 = vmax.f32 %v743_v13, 0.0  ;;  %v746_v19 = vadd.f32 %v1561_v10, %v745_v17 }
 0x1c8   : > { %v1219_v20 = vpack.c.bf16 %v871_v15, %v871_v15  ;;  %v872_v21 = vmax.f32 %v754_v16, 0.0 }
 0x1c9   : > { %v1217_v22 = vpack.c.bf16 %v869_v18, %v869_v18  ;;  %v870_v23 = vmax.f32 %v746_v19, 0.0 }
 0x1ca   : > { %1032 = vst.msk [vmem:[%s1571_s19 + $0x8] sm:$0xf] %vm1029_vm2, %v1219_v20  ;;  %v1220_v25 = vpack.c.bf16 %v872_v21, %v872_v21 }
 0x1cb   : > { %1030 = vst.msk [vmem:[%s1571_s19] sm:$0xf] %vm1029_vm2, %v1217_v22  ;;  %v1218_v26 = vpack.c.bf16 %v870_v23, %v870_v23  ;;  %v1337_v27 = vpop.f32.mrb[4].mxu1 }
 0x1cc   : > { %1033 = vst.msk [vmem:[%s1571_s19 + $0xc] sm:$0xf] %vm1029_vm2, %v1220_v25  ;;  %v767_v28 = vadd.f32 %v1337_v27, %v1561_v10  ;;  %v758_v29 = vpop.f32.mrb[5].mxu1 }
 0x1cd   : > { %1031 = vst.msk [vmem:[%s1571_s19 + $0x4] sm:$0xf] %vm1029_vm2, %v1218_v26  ;;  %v759_v30 = vadd.f32 %v1561_v10, %v758_v29  ;;  %v1338_v31 = vpop.f32.mrb[6].mxu1 }
 0x1ce   : > { %v875_v32 = vmax.f32 %v767_v28, 0.0  ;;  %v770_v33 = vadd.f32 %v1338_v31, %v1561_v10  ;;  %v761_v34 = vpop.f32.mrb[7].mxu1 }
 0x1cf   : > { %v873_v35 = vmax.f32 %v759_v30, 0.0  ;;  %v762_v36 = vadd.f32 %v1561_v10, %v761_v34 }
 0x1d0   : > { %v1223_v37 = vpack.c.bf16 %v875_v32, %v875_v32  ;;  %v876_v38 = vmax.f32 %v770_v33, 0.0 }
 0x1d1   : > { %v1221_v39 = vpack.c.bf16 %v873_v35, %v873_v35  ;;  %v874_v40 = vmax.f32 %v762_v36, 0.0 }
 0x1d2   : > { %1036 = vst.msk [vmem:[%s1571_s19 + $0x18] sm:$0xf] %vm1029_vm2, %v1223_v37  ;;  %v1224_v41 = vpack.c.bf16 %v876_v38, %v876_v38 }
 0x1d3   : > { %1034 = vst.msk [vmem:[%s1571_s19 + $0x10] sm:$0xf] %vm1029_vm2, %v1221_v39  ;;  %v1222_v42 = vpack.c.bf16 %v874_v40, %v874_v40  ;;  %v1341_v43 = vpop.f32.mrb[8].mxu1 }
 0x1d4   : > { %1037 = vst.msk [vmem:[%s1571_s19 + $0x1c] sm:$0xf] %vm1029_vm2, %v1224_v41  ;;  %v783_v44 = vadd.f32 %v1341_v43, %v1561_v10  ;;  %v774_v45 = vpop.f32.mrb[9].mxu1 }
 0x1d5   : > { %1035 = vst.msk [vmem:[%s1571_s19 + $0x14] sm:$0xf] %vm1029_vm2, %v1222_v42  ;;  %v775_v46 = vadd.f32 %v1561_v10, %v774_v45  ;;  %v1342_v47 = vpop.f32.mrb[10].mxu1 }
 0x1d6   : > { %v879_v48 = vmax.f32 %v783_v44, 0.0  ;;  %v786_v49 = vadd.f32 %v1342_v47, %v1561_v10  ;;  %v777_v50 = vpop.f32.mrb[11].mxu1 }
 0x1d7   : > { %v877_v51 = vmax.f32 %v775_v46, 0.0  ;;  %v778_v52 = vadd.f32 %v1561_v10, %v777_v50 }
 0x1d8   : > { %v1227_v53 = vpack.c.bf16 %v879_v48, %v879_v48  ;;  %v880_v54 = vmax.f32 %v786_v49, 0.0 }
 0x1d9   : > { %v1225_v55 = vpack.c.bf16 %v877_v51, %v877_v51  ;;  %v878_v56 = vmax.f32 %v778_v52, 0.0 }
 0x1da   : > { %1040 = vst.msk [vmem:[%s1571_s19 + $0x28] sm:$0xf] %vm1029_vm2, %v1227_v53  ;;  %v1228_v57 = vpack.c.bf16 %v880_v54, %v880_v54 }
 0x1db   : > { %1038 = vst.msk [vmem:[%s1571_s19 + $0x20] sm:$0xf] %vm1029_vm2, %v1225_v55  ;;  %v1226_v58 = vpack.c.bf16 %v878_v56, %v878_v56  ;;  %v1345_v59 = vpop.f32.mrb[12].mxu1 }
 0x1dc   : > { %1041 = vst.msk [vmem:[%s1571_s19 + $0x2c] sm:$0xf] %vm1029_vm2, %v1228_v57  ;;  %v799_v60 = vadd.f32 %v1345_v59, %v1561_v10  ;;  %v790_v61 = vpop.f32.mrb[13].mxu1 }
 0x1dd   : > { %1039 = vst.msk [vmem:[%s1571_s19 + $0x24] sm:$0xf] %vm1029_vm2, %v1226_v58  ;;  %v791_v62 = vadd.f32 %v1561_v10, %v790_v61  ;;  %v1346_v63 = vpop.f32.mrb[14].mxu1 }
 0x1de   : > { %v883_v0 = vmax.f32 %v799_v60, 0.0  ;;  %v802_v1 = vadd.f32 %v1346_v63, %v1561_v10  ;;  %v793_v2 = vpop.f32.mrb[15].mxu1 }
 0x1df   : > { %v881_v3 = vmax.f32 %v791_v62, 0.0  ;;  %v794_v4 = vadd.f32 %v1561_v10, %v793_v2 }
 0x1e0   : > { %v1231_v5 = vpack.c.bf16 %v883_v0, %v883_v0  ;;  %v884_v6 = vmax.f32 %v802_v1, 0.0 }
 0x1e1   : > { %v1229_v7 = vpack.c.bf16 %v881_v3, %v881_v3  ;;  %v882_v8 = vmax.f32 %v794_v4, 0.0 }
 0x1e2   : > { %1044 = vst.msk [vmem:[%s1571_s19 + $0x38] sm:$0xf] %vm1029_vm2, %v1231_v5  ;;  %v1232_v9 = vpack.c.bf16 %v884_v6, %v884_v6 }
 0x1e3   : > { %1042 = vst.msk [vmem:[%s1571_s19 + $0x30] sm:$0xf] %vm1029_vm2, %v1229_v7  ;;  %v1230_v11 = vpack.c.bf16 %v882_v8, %v882_v8  ;;  %v1349_v12 = vpop.f32.mrb[16].mxu1 }
 0x1e4   : > { %1045 = vst.msk [vmem:[%s1571_s19 + $0x3c] sm:$0xf] %vm1029_vm2, %v1232_v9  ;;  %v815_v24 = vadd.f32 %v1349_v12, %v1561_v10  ;;  %v806_v13 = vpop.f32.mrb[17].mxu1 }
 0x1e5   : > { %1043 = vst.msk [vmem:[%s1571_s19 + $0x34] sm:$0xf] %vm1029_vm2, %v1230_v11  ;;  %v807_v14 = vadd.f32 %v1561_v10, %v806_v13  ;;  %v1350_v15 = vpop.f32.mrb[18].mxu1 }
 0x1e6   : > { %v887_v16 = vmax.f32 %v815_v24, 0.0  ;;  %v818_v17 = vadd.f32 %v1350_v15, %v1561_v10  ;;  %v809_v18 = vpop.f32.mrb[19].mxu1 }
 0x1e7   : > { %v885_v19 = vmax.f32 %v807_v14, 0.0  ;;  %v810_v20 = vadd.f32 %v1561_v10, %v809_v18 }
 0x1e8   : > { %v1235_v21 = vpack.c.bf16 %v887_v16, %v887_v16  ;;  %v888_v22 = vmax.f32 %v818_v17, 0.0 }
 0x1e9   : > { %v1233_v23 = vpack.c.bf16 %v885_v19, %v885_v19  ;;  %v886_v25 = vmax.f32 %v810_v20, 0.0 }
 0x1ea   : > { %1048 = vst.msk [vmem:[%s1571_s19 + $0x48] sm:$0xf] %vm1029_vm2, %v1235_v21  ;;  %v1236_v26 = vpack.c.bf16 %v888_v22, %v888_v22 }
 0x1eb   : > { %1046 = vst.msk [vmem:[%s1571_s19 + $0x40] sm:$0xf] %vm1029_vm2, %v1233_v23  ;;  %v1234_v27 = vpack.c.bf16 %v886_v25, %v886_v25  ;;  %v1353_v28 = vpop.f32.mrb[20].mxu1 }
 0x1ec   : > { %1049 = vst.msk [vmem:[%s1571_s19 + $0x4c] sm:$0xf] %vm1029_vm2, %v1236_v26  ;;  %v831_v29 = vadd.f32 %v1353_v28, %v1561_v10  ;;  %v822_v30 = vpop.f32.mrb[21].mxu1 }
 0x1ed   : > { %1047 = vst.msk [vmem:[%s1571_s19 + $0x44] sm:$0xf] %vm1029_vm2, %v1234_v27  ;;  %v823_v31 = vadd.f32 %v1561_v10, %v822_v30  ;;  %v1354_v32 = vpop.f32.mrb[22].mxu1 }
 0x1ee   : > { %v891_v33 = vmax.f32 %v831_v29, 0.0  ;;  %v834_v34 = vadd.f32 %v1354_v32, %v1561_v10  ;;  %v825_v35 = vpop.f32.mrb[23].mxu1 }
 0x1ef   : > { %v889_v36 = vmax.f32 %v823_v31, 0.0  ;;  %v826_v37 = vadd.f32 %v1561_v10, %v825_v35 }
 0x1f0   : > { %v1239_v38 = vpack.c.bf16 %v891_v33, %v891_v33  ;;  %v892_v39 = vmax.f32 %v834_v34, 0.0 }
 0x1f1   : > { %v1237_v40 = vpack.c.bf16 %v889_v36, %v889_v36  ;;  %v890_v41 = vmax.f32 %v826_v37, 0.0 }
 0x1f2   : > { %1052 = vst.msk [vmem:[%s1571_s19 + $0x58] sm:$0xf] %vm1029_vm2, %v1239_v38  ;;  %v1240_v42 = vpack.c.bf16 %v892_v39, %v892_v39 }
 0x1f3   : > { %1050 = vst.msk [vmem:[%s1571_s19 + $0x50] sm:$0xf] %vm1029_vm2, %v1237_v40  ;;  %v1238_v43 = vpack.c.bf16 %v890_v41, %v890_v41  ;;  %v1357_v44 = vpop.f32.mrb[24].mxu1 }
 0x1f4   : > { %1053 = vst.msk [vmem:[%s1571_s19 + $0x5c] sm:$0xf] %vm1029_vm2, %v1240_v42  ;;  %v847_v45 = vadd.f32 %v1357_v44, %v1561_v10  ;;  %v838_v46 = vpop.f32.mrb[25].mxu1 }
 0x1f5   : > { %1051 = vst.msk [vmem:[%s1571_s19 + $0x54] sm:$0xf] %vm1029_vm2, %v1238_v43  ;;  %v839_v47 = vadd.f32 %v1561_v10, %v838_v46  ;;  %v1358_v48 = vpop.f32.mrb[26].mxu1 }
 0x1f6   : > { %v895_v49 = vmax.f32 %v847_v45, 0.0  ;;  %v850_v50 = vadd.f32 %v1358_v48, %v1561_v10  ;;  %v841_v51 = vpop.f32.mrb[27].mxu1 }
 0x1f7   : > { %v893_v52 = vmax.f32 %v839_v47, 0.0  ;;  %v842_v53 = vadd.f32 %v1561_v10, %v841_v51 }
 0x1f8   : > { %v1243_v54 = vpack.c.bf16 %v895_v49, %v895_v49  ;;  %v896_v55 = vmax.f32 %v850_v50, 0.0 }
 0x1f9   : > { %v1241_v56 = vpack.c.bf16 %v893_v52, %v893_v52  ;;  %v894_v57 = vmax.f32 %v842_v53, 0.0 }
 0x1fa   : > { %1056 = vst.msk [vmem:[%s1571_s19 + $0x68] sm:$0xf] %vm1029_vm2, %v1243_v54  ;;  %v1244_v58 = vpack.c.bf16 %v896_v55, %v896_v55 }
 0x1fb   : > { %1054 = vst.msk [vmem:[%s1571_s19 + $0x60] sm:$0xf] %vm1029_vm2, %v1241_v56  ;;  %v1242_v59 = vpack.c.bf16 %v894_v57, %v894_v57  ;;  %v1361_v60 = vpop.f32.mrb[28].mxu1 }
 0x1fc   : > { %1057 = vst.msk [vmem:[%s1571_s19 + $0x6c] sm:$0xf] %vm1029_vm2, %v1244_v58  ;;  %v863_v61 = vadd.f32 %v1361_v60, %v1561_v10  ;;  %v854_v62 = vpop.f32.mrb[29].mxu1 }
 0x1fd   : > { %1055 = vst.msk [vmem:[%s1571_s19 + $0x64] sm:$0xf] %vm1029_vm2, %v1242_v59  ;;  %v855_v63 = vadd.f32 %v1561_v10, %v854_v62  ;;  %v1362_v0 = vpop.f32.mrb[30].mxu1 }
 0x1fe   : > { %v899_v1 = vmax.f32 %v863_v61, 0.0  ;;  %v866_v2 = vadd.f32 %v1362_v0, %v1561_v10  ;;  %v857_v3 = vpop.f32.mrb[31].mxu1 }
 0x1ff   : > { %v897_v4 = vmax.f32 %v855_v63, 0.0  ;;  %v858_v5 = vadd.f32 %v1561_v10, %v857_v3 }
 0x200   : > { %v1247_v6 = vpack.c.bf16 %v899_v1, %v899_v1  ;;  %v900_v7 = vmax.f32 %v866_v2, 0.0 }
 0x201   : > { %v1245_v8 = vpack.c.bf16 %v897_v4, %v897_v4  ;;  %v898_v9 = vmax.f32 %v858_v5, 0.0 }
 0x202   : > { %1060 = vst.msk [vmem:[%s1571_s19 + $0x78] sm:$0xf] %vm1029_vm2, %v1247_v6  ;;  %v1248_v11 = vpack.c.bf16 %v900_v7, %v900_v7 }
 0x203   : > { %1058 = vst.msk [vmem:[%s1571_s19 + $0x70] sm:$0xf] %vm1029_vm2, %v1245_v8  ;;  %v1246_v12 = vpack.c.bf16 %v898_v9, %v898_v9 }
 0x204   : > { %1061 = vst.msk [vmem:[%s1571_s19 + $0x7c] sm:$0xf] %vm1029_vm2, %v1248_v11 }
 0x205   : > { %1059 = vst.msk [vmem:[%s1571_s19 + $0x74] sm:$0xf] %vm1029_vm2, %v1246_v12 }
 0x206 PF: > { %s15_s18 = sadd.s32 1, %s1401_s18  }
 0x207   : > { %p12_p4 = scmp.ge.s32.totalorder %s15_s18, 4  }
 0x209   :  { %14 = sbr.rel (!%p12_p4) target bundleno = 1 (0x1), region = 70 }

// kernel: _lambda_.13
= control target key start
LH: loop header
LB: loop body
LE: loop exit
PB: predicated region body
PF: predicated region fallthrough
CT: control target
= control target key end

     0   :  { %vm98_vm0 = vcmask 293888   ;;  %vm123_vm1 = vcmask 1041408   ;;  %vm304_vm2 = vcmask 60416   ;;  %s557_s1 = inlined_call_operand.vmem [shape: bf16[36,8], index: 1, kind: input, shape index: {}]   ;;  %s558_s0 = inlined_call_operand.vmem [shape: bf16[128,36], index: 0, kind: input, shape index: {}]   ;;  %s559_s2 = inlined_call_operand.vmem [shape: f32[1,8], index: 2, kind: input, shape index: {}]   ;;  %s560_s3 = inlined_call_operand.vmem [shape: bf16[128,8], index: 3, kind: output, shape index: {}]  }
   0x1   :  { %v418_v0 = vld [vmem:[%s557_s1] sm:$0xff]   ;;  %v419_v1 = vld [vmem:[%s557_s1 + $0x8] sm:$0xff]   ;;  %v420_v2 = vld [vmem:[%s557_s1 + $0x10] ss:$0 sps:$4 sm:$0x33]  }
   0x2   :  { %388 = vmatprep.subr.bf16.mxu0 %v418_v0  ;;  %410 = vmatprep.subr.bf16.mxu1 %v418_v0  ;;  %v421_v3 = vld [vmem:[%s558_s0] sm:$0xff]   ;;  %v125_v5 = vsel %vm123_vm1, %v420_v2, 0  ;;  %v423_v6 = vld [vmem:[%s558_s0 + $0x8] sm:$0xff]   ;;  %v425_v8 = vld [vmem:[%s558_s0 + $0x10] sm:$0xff]  }
   0x3   :  { %389 = vmatpush3.bf16.msra.mxu0 %v418_v0  ;;  %413 = vmatpush3.bf16.msra.mxu1 %v418_v0  ;;  %v422_v4 = vld [vmem:[%s558_s0 + $0x20] sm:$0xff]   ;;  %v424_v7 = vld [vmem:[%s558_s0 + $0x28] sm:$0xff]   ;;  %v426_v9 = vld [vmem:[%s558_s0 + $0x30] sm:$0xff]  }
   0x4   :  { %390 = vmatprep.subr.bf16.mxu0 %v419_v1  ;;  %411 = vmatprep.subr.bf16.mxu1 %v419_v1  ;;  %v427_v10 = vld [vmem:[%s558_s0 + $0x18] sm:$0xff]   ;;  %v325_v12 = vld [vmem:[%s559_s2] ss:$0 sm:$0xff] }
   0x5   :  { %394 = vmatprep.mubr.msk.bf16.mxu0 %vm98_vm0, %v421_v3  ;;  %402 = vmatprep.mubr.msk.bf16.mxu1 %vm98_vm0, %v422_v4  ;;  %v428_v11 = vld [vmem:[%s558_s0 + $0x38] sm:$0xff]  }
   0x7   :  { %391 = vmatpush3.bf16.msra.mxu0 %v419_v1  ;;  %414 = vmatpush3.bf16.msra.mxu1 %v419_v1 }
   0x8   :  { %416 = vmatprep.subr.msk.bf16.mxu0 %vm123_vm1, %v420_v2  ;;  %417 = vmatprep.subr.msk.bf16.mxu1 %vm123_vm1, %v420_v2 }
   0xb   :  { %393 = vmatpush3.bf16.msra.mxu0 %v125_v5  ;;  %415 = vmatpush3.bf16.msra.mxu1 %v125_v5 }
   0xe   :  { %395 = vmatmul.mubr.msk.bf16.vlgmr.msra.gmra.mrb[0].mxu0 %vm98_vm0, %v423_v6  ;;  %403 = vmatmul.mubr.msk.bf16.vlgmr.msra.gmra.mrb[0].mxu1 %vm98_vm0, %v424_v7 }
   0xf   :  { %398 = vmatprep.mubr.msk.bf16.mxu0 %vm98_vm0, %v425_v8  ;;  %406 = vmatprep.mubr.msk.bf16.mxu1 %vm98_vm0, %v426_v9 }
  0x16   :  { %399 = vmatmul.mubr.msk.bf16.gmra.mrb[4].mxu0 %vm98_vm0, %v427_v10  ;;  %407 = vmatmul.mubr.msk.bf16.gmra.mrb[4].mxu1 %vm98_vm0, %v428_v11 }
  0xe1   :  { %v396_v13 = vpop.f32.mrb[0].mxu0  ;;  %v404_v14 = vpop.f32.mrb[0].mxu1 }
  0xe2   :  { %v170_v15 = vadd.f32 %v396_v13, %v325_v12  ;;  %v202_v16 = vadd.f32 %v404_v14, %v325_v12  ;;  %v161_v17 = vpop.f32.mrb[1].mxu0  ;;  %v193_v18 = vpop.f32.mrb[1].mxu1 }
  0xe3   :  { %v162_v19 = vadd.f32 %v325_v12, %v161_v17  ;;  %v194_v20 = vadd.f32 %v325_v12, %v193_v18  ;;  %v397_v21 = vpop.f32.mrb[2].mxu0  ;;  %v405_v22 = vpop.f32.mrb[2].mxu1 }
  0xe4   :  { %v226_v23 = vmax.f32 %v170_v15, 0.0  ;;  %v234_v24 = vmax.f32 %v202_v16, 0.0  ;;  %v173_v25 = vadd.f32 %v397_v21, %v325_v12  ;;  %v205_v26 = vadd.f32 %v405_v22, %v325_v12  ;;  %v164_v27 = vpop.f32.mrb[3].mxu0  ;;  %v196_v28 = vpop.f32.mrb[3].mxu1 }
  0xe5   :  { %v224_v29 = vmax.f32 %v162_v19, 0.0  ;;  %v232_v30 = vmax.f32 %v194_v20, 0.0  ;;  %v165_v31 = vadd.f32 %v325_v12, %v164_v27  ;;  %v197_v32 = vadd.f32 %v325_v12, %v196_v28 }
  0xe6   :  { %v363_v33 = vpack.c.bf16 %v226_v23, %v226_v23  ;;  %v371_v34 = vpack.c.bf16 %v234_v24, %v234_v24  ;;  %v227_v35 = vmax.f32 %v173_v25, 0.0  ;;  %v235_v36 = vmax.f32 %v205_v26, 0.0 }
  0xe7   :  { %v361_v37 = vpack.c.bf16 %v224_v29, %v224_v29  ;;  %v369_v38 = vpack.c.bf16 %v232_v30, %v232_v30  ;;  %v225_v39 = vmax.f32 %v165_v31, 0.0  ;;  %v233_v40 = vmax.f32 %v197_v32, 0.0 }
  0xe8   :  { %307 = vst.msk [vmem:[%s560_s3 + $0x8] sm:$0xf] %vm304_vm2, %v363_v33  ;;  %315 = vst.msk [vmem:[%s560_s3 + $0x28] sm:$0xf] %vm304_vm2, %v371_v34  ;;  %v364_v41 = vpack.c.bf16 %v227_v35, %v227_v35  ;;  %v372_v42 = vpack.c.bf16 %v235_v36, %v235_v36 }
  0xe9   :  { %305 = vst.msk [vmem:[%s560_s3] sm:$0xf] %vm304_vm2, %v361_v37  ;;  %313 = vst.msk [vmem:[%s560_s3 + $0x20] sm:$0xf] %vm304_vm2, %v369_v38  ;;  %v362_v43 = vpack.c.bf16 %v225_v39, %v225_v39  ;;  %v370_v44 = vpack.c.bf16 %v233_v40, %v233_v40  ;;  %v400_v45 = vpop.f32.mrb[4].mxu0  ;;  %v408_v46 = vpop.f32.mrb[4].mxu1 }
  0xea   :  { %308 = vst.msk [vmem:[%s560_s3 + $0xc] sm:$0xf] %vm304_vm2, %v364_v41  ;;  %316 = vst.msk [vmem:[%s560_s3 + $0x2c] sm:$0xf] %vm304_vm2, %v372_v42  ;;  %v186_v47 = vadd.f32 %v400_v45, %v325_v12  ;;  %v218_v48 = vadd.f32 %v408_v46, %v325_v12  ;;  %v177_v49 = vpop.f32.mrb[5].mxu0  ;;  %v209_v50 = vpop.f32.mrb[5].mxu1 }
  0xeb   :  { %306 = vst.msk [vmem:[%s560_s3 + $0x4] sm:$0xf] %vm304_vm2, %v362_v43  ;;  %314 = vst.msk [vmem:[%s560_s3 + $0x24] sm:$0xf] %vm304_vm2, %v370_v44  ;;  %v178_v51 = vadd.f32 %v325_v12, %v177_v49  ;;  %v210_v52 = vadd.f32 %v325_v12, %v209_v50  ;;  %v401_v53 = vpop.f32.mrb[6].mxu0  ;;  %v409_v54 = vpop.f32.mrb[6].mxu1 }
  0xec   :  { %v230_v55 = vmax.f32 %v186_v47, 0.0  ;;  %v238_v56 = vmax.f32 %v218_v48, 0.0  ;;  %v189_v57 = vadd.f32 %v401_v53, %v325_v12  ;;  %v221_v58 = vadd.f32 %v409_v54, %v325_v12  ;;  %v180_v59 = vpop.f32.mrb[7].mxu0  ;;  %v212_v60 = vpop.f32.mrb[7].mxu1 }
  0xed   :  { %v228_v61 = vmax.f32 %v178_v51, 0.0  ;;  %v236_v62 = vmax.f32 %v210_v52, 0.0  ;;  %v181_v63 = vadd.f32 %v325_v12, %v180_v59  ;;  %v213_v0 = vadd.f32 %v325_v12, %v212_v60 }
  0xee   :  { %v367_v1 = vpack.c.bf16 %v230_v55, %v230_v55  ;;  %v375_v2 = vpack.c.bf16 %v238_v56, %v238_v56  ;;  %v231_v3 = vmax.f32 %v189_v57, 0.0  ;;  %v239_v4 = vmax.f32 %v221_v58, 0.0 }
  0xef   :  { %v365_v5 = vpack.c.bf16 %v228_v61, %v228_v61  ;;  %v373_v6 = vpack.c.bf16 %v236_v62, %v236_v62  ;;  %v229_v7 = vmax.f32 %v181_v63, 0.0  ;;  %v237_v8 = vmax.f32 %v213_v0, 0.0 }
  0xf0   :  { %311 = vst.msk [vmem:[%s560_s3 + $0x18] sm:$0xf] %vm304_vm2, %v367_v1  ;;  %319 = vst.msk [vmem:[%s560_s3 + $0x38] sm:$0xf] %vm304_vm2, %v375_v2  ;;  %v368_v9 = vpack.c.bf16 %v231_v3, %v231_v3  ;;  %v376_v10 = vpack.c.bf16 %v239_v4, %v239_v4 }
  0xf1   :  { %309 = vst.msk [vmem:[%s560_s3 + $0x10] sm:$0xf] %vm304_vm2, %v365_v5  ;;  %317 = vst.msk [vmem:[%s560_s3 + $0x30] sm:$0xf] %vm304_vm2, %v373_v6  ;;  %v366_v11 = vpack.c.bf16 %v229_v7, %v229_v7  ;;  %v374_v12 = vpack.c.bf16 %v237_v8, %v237_v8 }
  0xf2   :  { %312 = vst.msk [vmem:[%s560_s3 + $0x1c] sm:$0xf] %vm304_vm2, %v368_v9  ;;  %320 = vst.msk [vmem:[%s560_s3 + $0x3c] sm:$0xf] %vm304_vm2, %v376_v10 }
  0xf3   :  { %310 = vst.msk [vmem:[%s560_s3 + $0x14] sm:$0xf] %vm304_vm2, %v366_v11  ;;  %318 = vst.msk [vmem:[%s560_s3 + $0x34] sm:$0xf] %vm304_vm2, %v374_v12 }

// kernel: _lambda_.15
= control target key start
LH: loop header
LB: loop body
LE: loop exit
PB: predicated region body
PF: predicated region fallthrough
CT: control target
= control target key end

     0   :  { %vm139_vm0 = vcmask 883712   ;;  %vm164_vm1 = vcmask 1045504   ;;  %vm555_vm2 = vcmask 60416   ;;  %s966_s1 = inlined_call_operand.vmem [shape: bf16[108,108], index: 1, kind: input, shape index: {}]   ;;  %s967_s0 = inlined_call_operand.vmem [shape: bf16[128,108], index: 0, kind: input, shape index: {}]   ;;  %s968_s3 = inlined_call_operand.vmem [shape: bf16[108,8], index: 3, kind: input, shape index: {}]   ;;  %s969_s2 = inlined_call_operand.vmem [shape: f32[1,108], index: 2, kind: input, shape index: {}]   ;;  %s970_s4 = inlined_call_operand.vmem [shape: f32[1,8], index: 4, kind: input, shape index: {}]   ;;  %s971_s5 = inlined_call_operand.vmem [shape: bf16[128,8], index: 5, kind: output, shape index: {}]  }
   0x1   :  { %v740_v0 = vld [vmem:[%s966_s1] sm:$0xff]   ;;  %v741_v1 = vld [vmem:[%s966_s1 + $0x8] sm:$0xff]   ;;  %v742_v2 = vld [vmem:[%s966_s1 + $0x10] sm:$0xff]  }
   0x2   :  { %678 = vmatprep.subr.bf16.mxu0 %v740_v0  ;;  %v747_v3 = vld [vmem:[%s967_s0] sm:$0xff]   ;;  %v743_v4 = vld [vmem:[%s966_s1 + $0x18] sm:$0xff]   ;;  %v745_v6 = vld [vmem:[%s966_s1 + $0x28] sm:$0xff]  }
   0x3   :  { %679 = vmatpush3.bf16.msra.mxu0 %v740_v0  ;;  %692 = vmatprep.mubr.msk.bf16.mxu0 %vm139_vm0, %v747_v3  ;;  %v744_v5 = vld [vmem:[%s966_s1 + $0x20] sm:$0xff]   ;;  %v756_v8 = vld [vmem:[%s968_s3 + $0x8] sm:$0xff]   ;;  %v746_v9 = vld [vmem:[%s966_s1 + $0x30] sm:$0x3f]  }
   0x4   :  { %680 = vmatprep.subr.bf16.mxu0 %v741_v1  ;;  %v755_v7 = vld [vmem:[%s968_s3] sm:$0xff]   ;;  %v757_v10 = vld [vmem:[%s968_s3 + $0x10] sm:$0xff]   ;;  %v758_v11 = vld [vmem:[%s968_s3 + $0x18] sm:$0xff]   ;;  %v166_v12 = vsel %vm164_vm1, %v746_v9, 0 }
   0x5   :  { %708 = vmatprep.subr.bf16.mxu1 %v755_v7  ;;  %v748_v13 = vld [vmem:[%s967_s0 + $0x8] sm:$0xff]   ;;  %v749_v14 = vld [vmem:[%s967_s0 + $0x10] sm:$0xff]   ;;  %v759_v15 = vld [vmem:[%s968_s3 + $0x20] sm:$0xff]  }
   0x6   :  { %709 = vmatpush3.bf16.msra.mxu1 %v755_v7  ;;  %v750_v16 = vld [vmem:[%s967_s0 + $0x18] sm:$0xff]   ;;  %v751_v17 = vld [vmem:[%s967_s0 + $0x20] sm:$0xff]   ;;  %v752_v18 = vld [vmem:[%s967_s0 + $0x28] sm:$0xff]  }
   0x7   :  { %681 = vmatpush3.bf16.msra.mxu0 %v741_v1  ;;  %710 = vmatprep.subr.bf16.mxu1 %v756_v8  ;;  %v753_v19 = vld [vmem:[%s967_s0 + $0x30] sm:$0xff]   ;;  %v754_v20 = vld [vmem:[%s967_s0 + $0x38] sm:$0xff]   ;;  %v760_v21 = vld [vmem:[%s968_s3 + $0x28] sm:$0xff]  }
   0x8   :  { %682 = vmatprep.subr.bf16.mxu0 %v742_v2  ;;  %v761_v22 = vld [vmem:[%s968_s3 + $0x30] sm:$0x3f]   ;;  %v576_v24 = vld [vmem:[%s969_s2] ss:$0 sm:$0xff] }
   0x9   :  { %v376_v23 = vsel %vm164_vm1, %v761_v22, 0 }
   0xa   :  { %711 = vmatpush3.bf16.msra.mxu1 %v756_v8 }
   0xb   :  { %683 = vmatpush3.bf16.msra.mxu0 %v742_v2  ;;  %712 = vmatprep.subr.bf16.mxu1 %v757_v10 }
   0xc   :  { %684 = vmatprep.subr.bf16.mxu0 %v743_v4 }
   0xe   :  { %713 = vmatpush3.bf16.msra.mxu1 %v757_v10 }
   0xf   :  { %685 = vmatpush3.bf16.msra.mxu0 %v743_v4  ;;  %714 = vmatprep.subr.bf16.mxu1 %v758_v11 }
  0x10   :  { %686 = vmatprep.subr.bf16.mxu0 %v744_v5 }
  0x12   :  { %715 = vmatpush3.bf16.msra.mxu1 %v758_v11 }
  0x13   :  { %687 = vmatpush3.bf16.msra.mxu0 %v744_v5  ;;  %716 = vmatprep.subr.bf16.mxu1 %v759_v15 }
  0x14   :  { %688 = vmatprep.subr.bf16.mxu0 %v745_v6 }
  0x16   :  { %717 = vmatpush3.bf16.msra.mxu1 %v759_v15 }
  0x17   :  { %689 = vmatpush3.bf16.msra.mxu0 %v745_v6  ;;  %718 = vmatprep.subr.bf16.mxu1 %v760_v21 }
  0x18   :  { %738 = vmatprep.subr.msk.bf16.mxu0 %vm164_vm1, %v746_v9 }
  0x1a   :  { %719 = vmatpush3.bf16.msra.mxu1 %v760_v21 }
  0x1b   :  { %691 = vmatpush3.bf16.msra.mxu0 %v166_v12  ;;  %739 = vmatprep.subr.msk.bf16.mxu1 %vm164_vm1, %v761_v22 }
  0x1e   :  { %693 = vmatmul.mubr.msk.bf16.vlgmr.msra.gmra.mrb[0].mxu0 %vm139_vm0, %v748_v13  ;;  %721 = vmatpush3.bf16.msra.mxu1 %v376_v23 }
  0x1f   :  { %696 = vmatprep.mubr.msk.bf16.mxu0 %vm139_vm0, %v749_v14 }
  0x26   :  { %697 = vmatmul.mubr.msk.bf16.gmra.mrb[4].mxu0 %vm139_vm0, %v750_v16 }
  0x27   :  { %700 = vmatprep.mubr.msk.bf16.mxu0 %vm139_vm0, %v751_v17  ;;  %v884_v17 = vld [vmem:[%s970_s4] ss:$0 sm:$0xff] }
  0x2e   :  { %701 = vmatmul.mubr.msk.bf16.gmra.mrb[8].mxu0 %vm139_vm0, %v752_v18 }
  0x2f   :  { %704 = vmatprep.mubr.msk.bf16.mxu0 %vm139_vm0, %v753_v19 }
  0x36   :  { %705 = vmatmul.mubr.msk.bf16.gmra.mrb[12].mxu0 %vm139_vm0, %v754_v20 }
  0xf1   :  { %v694_v25 = vpop.f32.mrb[0].mxu0 }
  0xf2   :  { %v211_v26 = vadd.f32 %v694_v25, %v576_v24  ;;  %v202_v27 = vpop.f32.mrb[1].mxu0 }
  0xf3   :  { %v203_v28 = vadd.f32 %v576_v24, %v202_v27  ;;  %v695_v29 = vpop.f32.mrb[2].mxu0 }
  0xf4   :  { %v214_v30 = vadd.f32 %v695_v29, %v576_v24  ;;  %v205_v31 = vpop.f32.mrb[3].mxu0  ;;  %v267_v33 = vmax.f32 %v211_v26, 0.0 }
  0xf5   :  { %v206_v32 = vadd.f32 %v576_v24, %v205_v31  ;;  %v265_v35 = vmax.f32 %v203_v28, 0.0 }
  0xf6   :  { %v268_v34 = vmax.f32 %v214_v30, 0.0 }
  0xf7   :  { %v266_v36 = vmax.f32 %v206_v32, 0.0 }
  0xf8   :  { %v282_v37 = vpack.c.bf16 %v268_v34, %v267_v33 }
  0xf9   :  { %v698_v38 = vpop.f32.mrb[4].mxu0  ;;  %v281_v39 = vpack.c.bf16 %v266_v36, %v265_v35 }
  0xfa   :  { %v227_v40 = vadd.f32 %v698_v38, %v576_v24  ;;  %v218_v41 = vpop.f32.mrb[5].mxu0 }
  0xfb   :  { %v219_v42 = vadd.f32 %v576_v24, %v218_v41  ;;  %v699_v43 = vpop.f32.mrb[6].mxu0  ;;  %722 = vmatprep.mubr.msk.bf16.mxu1 %vm139_vm0, %v281_v39 }
  0xfc   :  { %v230_v44 = vadd.f32 %v699_v43, %v576_v24  ;;  %v221_v45 = vpop.f32.mrb[7].mxu0  ;;  %723 = vmatmul.mubr.msk.bf16.vlgmr.msra.gmra.mrb[0].mxu1 %vm139_vm0, %v282_v37  ;;  %v271_v47 = vmax.f32 %v227_v40, 0.0 }
  0xfd   :  { %v222_v46 = vadd.f32 %v576_v24, %v221_v45  ;;  %v269_v49 = vmax.f32 %v219_v42, 0.0 }
  0xfe   :  { %v272_v48 = vmax.f32 %v230_v44, 0.0 }
  0xff   :  { %v270_v50 = vmax.f32 %v222_v46, 0.0 }
 0x100   :  { %v284_v51 = vpack.c.bf16 %v272_v48, %v271_v47 }
 0x101   :  { %v283_v52 = vpack.c.bf16 %v270_v50, %v269_v49  ;;  %v702_v53 = vpop.f32.mrb[8].mxu0 }
 0x102   :  { %v243_v54 = vadd.f32 %v702_v53, %v576_v24  ;;  %v234_v55 = vpop.f32.mrb[9].mxu0 }
 0x103   :  { %v235_v56 = vadd.f32 %v576_v24, %v234_v55  ;;  %v703_v57 = vpop.f32.mrb[10].mxu0  ;;  %726 = vmatprep.mubr.msk.bf16.mxu1 %vm139_vm0, %v283_v52 }
 0x104   :  { %v246_v58 = vadd.f32 %v703_v57, %v576_v24  ;;  %v237_v59 = vpop.f32.mrb[11].mxu0  ;;  %727 = vmatmul.mubr.msk.bf16.gmra.mrb[4].mxu1 %vm139_vm0, %v284_v51  ;;  %v275_v61 = vmax.f32 %v243_v54, 0.0 }
 0x105   :  { %v238_v60 = vadd.f32 %v576_v24, %v237_v59  ;;  %v273_v63 = vmax.f32 %v235_v56, 0.0 }
 0x106   :  { %v276_v62 = vmax.f32 %v246_v58, 0.0 }
 0x107   :  { %v274_v0 = vmax.f32 %v238_v60, 0.0 }
 0x108   :  { %v286_v1 = vpack.c.bf16 %v276_v62, %v275_v61 }
 0x109   :  { %v285_v2 = vpack.c.bf16 %v274_v0, %v273_v63  ;;  %v706_v3 = vpop.f32.mrb[12].mxu0 }
 0x10a   :  { %v259_v4 = vadd.f32 %v706_v3, %v576_v24  ;;  %v250_v5 = vpop.f32.mrb[13].mxu0 }
 0x10b   :  { %v251_v6 = vadd.f32 %v576_v24, %v250_v5  ;;  %v707_v7 = vpop.f32.mrb[14].mxu0  ;;  %730 = vmatprep.mubr.msk.bf16.mxu1 %vm139_vm0, %v285_v2 }
 0x10c   :  { %v262_v8 = vadd.f32 %v707_v7, %v576_v24  ;;  %v253_v9 = vpop.f32.mrb[15].mxu0  ;;  %731 = vmatmul.mubr.msk.bf16.gmra.mrb[8].mxu1 %vm139_vm0, %v286_v1  ;;  %v279_v11 = vmax.f32 %v259_v4, 0.0 }
 0x10d   :  { %v254_v10 = vadd.f32 %v576_v24, %v253_v9  ;;  %v277_v13 = vmax.f32 %v251_v6, 0.0 }
 0x10e   :  { %v280_v12 = vmax.f32 %v262_v8, 0.0 }
 0x10f   :  { %v278_v14 = vmax.f32 %v254_v10, 0.0 }
 0x110   :  { %v288_v15 = vpack.c.bf16 %v280_v12, %v279_v11 }
 0x111   :  { %v287_v16 = vpack.c.bf16 %v278_v14, %v277_v13 }
 0x113   :  { %734 = vmatprep.mubr.msk.bf16.mxu1 %vm139_vm0, %v287_v16 }
 0x114   :  { %735 = vmatmul.mubr.msk.bf16.gmra.mrb[12].mxu1 %vm139_vm0, %v288_v15 }
 0x1cf   :  { %v724_v18 = vpop.f32.mrb[0].mxu1 }
 0x1d0   :  { %v421_v19 = vadd.f32 %v724_v18, %v884_v17  ;;  %v412_v20 = vpop.f32.mrb[1].mxu1 }
 0x1d1   :  { %v413_v21 = vadd.f32 %v884_v17, %v412_v20  ;;  %v725_v22 = vpop.f32.mrb[2].mxu1 }
 0x1d2   :  { %v477_v23 = vmax.f32 %v421_v19, 0.0  ;;  %v424_v24 = vadd.f32 %v725_v22, %v884_v17  ;;  %v415_v25 = vpop.f32.mrb[3].mxu1 }
 0x1d3   :  { %v475_v26 = vmax.f32 %v413_v21, 0.0  ;;  %v416_v27 = vadd.f32 %v884_v17, %v415_v25 }
 0x1d4   :  { %v634_v28 = vpack.c.bf16 %v477_v23, %v477_v23  ;;  %v478_v29 = vmax.f32 %v424_v24, 0.0 }
 0x1d5   :  { %v632_v30 = vpack.c.bf16 %v475_v26, %v475_v26  ;;  %v476_v31 = vmax.f32 %v416_v27, 0.0 }
 0x1d6   :  { %558 = vst.msk [vmem:[%s971_s5 + $0x8] sm:$0xf] %vm555_vm2, %v634_v28  ;;  %v635_v32 = vpack.c.bf16 %v478_v29, %v478_v29 }
 0x1d7   :  { %556 = vst.msk [vmem:[%s971_s5] sm:$0xf] %vm555_vm2, %v632_v30  ;;  %v633_v33 = vpack.c.bf16 %v476_v31, %v476_v31  ;;  %v728_v34 = vpop.f32.mrb[4].mxu1 }
 0x1d8   :  { %559 = vst.msk [vmem:[%s971_s5 + $0xc] sm:$0xf] %vm555_vm2, %v635_v32  ;;  %v437_v35 = vadd.f32 %v728_v34, %v884_v17  ;;  %v428_v36 = vpop.f32.mrb[5].mxu1 }
 0x1d9   :  { %557 = vst.msk [vmem:[%s971_s5 + $0x4] sm:$0xf] %vm555_vm2, %v633_v33  ;;  %v429_v37 = vadd.f32 %v884_v17, %v428_v36  ;;  %v729_v38 = vpop.f32.mrb[6].mxu1 }
 0x1da   :  { %v481_v39 = vmax.f32 %v437_v35, 0.0  ;;  %v440_v40 = vadd.f32 %v729_v38, %v884_v17  ;;  %v431_v41 = vpop.f32.mrb[7].mxu1 }
 0x1db   :  { %v479_v42 = vmax.f32 %v429_v37, 0.0  ;;  %v432_v43 = vadd.f32 %v884_v17, %v431_v41 }
 0x1dc   :  { %v638_v44 = vpack.c.bf16 %v481_v39, %v481_v39  ;;  %v482_v45 = vmax.f32 %v440_v40, 0.0 }
 0x1dd   :  { %v636_v46 = vpack.c.bf16 %v479_v42, %v479_v42  ;;  %v480_v47 = vmax.f32 %v432_v43, 0.0 }
 0x1de   :  { %562 = vst.msk [vmem:[%s971_s5 + $0x18] sm:$0xf] %vm555_vm2, %v638_v44  ;;  %v639_v48 = vpack.c.bf16 %v482_v45, %v482_v45 }
 0x1df   :  { %560 = vst.msk [vmem:[%s971_s5 + $0x10] sm:$0xf] %vm555_vm2, %v636_v46  ;;  %v637_v49 = vpack.c.bf16 %v480_v47, %v480_v47  ;;  %v732_v50 = vpop.f32.mrb[8].mxu1 }
 0x1e0   :  { %563 = vst.msk [vmem:[%s971_s5 + $0x1c] sm:$0xf] %vm555_vm2, %v639_v48  ;;  %v453_v51 = vadd.f32 %v732_v50, %v884_v17  ;;  %v444_v52 = vpop.f32.mrb[9].mxu1 }
 0x1e1   :  { %561 = vst.msk [vmem:[%s971_s5 + $0x14] sm:$0xf] %vm555_vm2, %v637_v49  ;;  %v445_v53 = vadd.f32 %v884_v17, %v444_v52  ;;  %v733_v54 = vpop.f32.mrb[10].mxu1 }
 0x1e2   :  { %v485_v55 = vmax.f32 %v453_v51, 0.0  ;;  %v456_v56 = vadd.f32 %v733_v54, %v884_v17  ;;  %v447_v57 = vpop.f32.mrb[11].mxu1 }
 0x1e3   :  { %v483_v58 = vmax.f32 %v445_v53, 0.0  ;;  %v448_v59 = vadd.f32 %v884_v17, %v447_v57 }
 0x1e4   :  { %v642_v60 = vpack.c.bf16 %v485_v55, %v485_v55  ;;  %v486_v61 = vmax.f32 %v456_v56, 0.0 }
 0x1e5   :  { %v640_v62 = vpack.c.bf16 %v483_v58, %v483_v58  ;;  %v484_v63 = vmax.f32 %v448_v59, 0.0 }
 0x1e6   :  { %566 = vst.msk [vmem:[%s971_s5 + $0x28] sm:$0xf] %vm555_vm2, %v642_v60  ;;  %v643_v0 = vpack.c.bf16 %v486_v61, %v486_v61 }
 0x1e7   :  { %564 = vst.msk [vmem:[%s971_s5 + $0x20] sm:$0xf] %vm555_vm2, %v640_v62  ;;  %v641_v1 = vpack.c.bf16 %v484_v63, %v484_v63  ;;  %v736_v2 = vpop.f32.mrb[12].mxu1 }
 0x1e8   :  { %567 = vst.msk [vmem:[%s971_s5 + $0x2c] sm:$0xf] %vm555_vm2, %v643_v0  ;;  %v469_v3 = vadd.f32 %v736_v2, %v884_v17  ;;  %v460_v4 = vpop.f32.mrb[13].mxu1 }
 0x1e9   :  { %565 = vst.msk [vmem:[%s971_s5 + $0x24] sm:$0xf] %vm555_vm2, %v641_v1  ;;  %v461_v5 = vadd.f32 %v884_v17, %v460_v4  ;;  %v737_v6 = vpop.f32.mrb[14].mxu1 }
 0x1ea   :  { %v489_v7 = vmax.f32 %v469_v3, 0.0  ;;  %v472_v8 = vadd.f32 %v737_v6, %v884_v17  ;;  %v463_v9 = vpop.f32.mrb[15].mxu1 }
 0x1eb   :  { %v487_v10 = vmax.f32 %v461_v5, 0.0  ;;  %v464_v11 = vadd.f32 %v884_v17, %v463_v9 }
 0x1ec   :  { %v646_v12 = vpack.c.bf16 %v489_v7, %v489_v7  ;;  %v490_v13 = vmax.f32 %v472_v8, 0.0 }
 0x1ed   :  { %v644_v14 = vpack.c.bf16 %v487_v10, %v487_v10  ;;  %v488_v15 = vmax.f32 %v464_v11, 0.0 }
 0x1ee   :  { %570 = vst.msk [vmem:[%s971_s5 + $0x38] sm:$0xf] %vm555_vm2, %v646_v12  ;;  %v647_v16 = vpack.c.bf16 %v490_v13, %v490_v13 }
 0x1ef   :  { %568 = vst.msk [vmem:[%s971_s5 + $0x30] sm:$0xf] %vm555_vm2, %v644_v14  ;;  %v645_v18 = vpack.c.bf16 %v488_v15, %v488_v15 }
 0x1f0   :  { %571 = vst.msk [vmem:[%s971_s5 + $0x3c] sm:$0xf] %vm555_vm2, %v647_v16 }
 0x1f1   :  { %569 = vst.msk [vmem:[%s971_s5 + $0x34] sm:$0xf] %vm555_vm2, %v645_v18 }

// kernel: _lambda_.20
= control target key start
LH: loop header
LB: loop body
LE: loop exit
PB: predicated region body
PF: predicated region fallthrough
CT: control target
= control target key end

     0   :  { %vm115_vm0 = vcmask 1043456   ;;  %vm90_vm1 = vcmask 195584   ;;  %vm296_vm2 = vcmask 93184   ;;  %s539_s1 = inlined_call_operand.vmem [shape: bf16[24,12], index: 1, kind: input, shape index: {}]   ;;  %s540_s0 = inlined_call_operand.vmem [shape: bf16[128,24], index: 0, kind: input, shape index: {}]   ;;  %s541_s2 = inlined_call_operand.vmem [shape: f32[1,12], index: 2, kind: input, shape index: {}]   ;;  %s542_s3 = inlined_call_operand.vmem [shape: bf16[128,12], index: 3, kind: output, shape index: {}]  }
   0x1   :  { %v404_v0 = vld [vmem:[%s539_s1] sm:$0xff]   ;;  %v405_v1 = vld [vmem:[%s539_s1 + $0x8] ss:$0 sps:$4 sm:$0xff]   ;;  %v410_v7 = vld [vmem:[%s540_s0 + $0x10] sm:$0xff]  }
   0x2   :  { %378 = vmatprep.subr.bf16.mxu0 %v404_v0  ;;  %398 = vmatprep.subr.bf16.mxu1 %v404_v0  ;;  %v406_v2 = vld [vmem:[%s540_s0] sm:$0xff]   ;;  %v117_v4 = vsel %vm115_vm0, %v405_v1, 0  ;;  %v408_v5 = vld [vmem:[%s540_s0 + $0x8] sm:$0xff]   ;;  %v411_v8 = vld [vmem:[%s540_s0 + $0x30] sm:$0xff]  }
   0x3   :  { %379 = vmatpush3.bf16.msra.mxu0 %v404_v0  ;;  %400 = vmatpush3.bf16.msra.mxu1 %v404_v0  ;;  %v407_v3 = vld [vmem:[%s540_s0 + $0x20] sm:$0xff]   ;;  %v409_v6 = vld [vmem:[%s540_s0 + $0x28] sm:$0xff]   ;;  %v412_v9 = vld [vmem:[%s540_s0 + $0x18] sm:$0xff]  }
   0x4   :  { %402 = vmatprep.subr.msk.bf16.mxu0 %vm115_vm0, %v405_v1  ;;  %403 = vmatprep.subr.msk.bf16.mxu1 %vm115_vm0, %v405_v1  ;;  %v413_v10 = vld [vmem:[%s540_s0 + $0x38] sm:$0xff]   ;;  %v317_v11 = vld [vmem:[%s541_s2] ss:$0 sm:$0xff] }
   0x5   :  { %382 = vmatprep.mubr.msk.bf16.mxu0 %vm90_vm1, %v406_v2  ;;  %390 = vmatprep.mubr.msk.bf16.mxu1 %vm90_vm1, %v407_v3 }
   0x7   :  { %381 = vmatpush3.bf16.msra.mxu0 %v117_v4  ;;  %401 = vmatpush3.bf16.msra.mxu1 %v117_v4 }
   0xa   :  { %383 = vmatmul.mubr.msk.bf16.vlgmr.msra.gmra.mrb[0].mxu0 %vm90_vm1, %v408_v5  ;;  %391 = vmatmul.mubr.msk.bf16.vlgmr.msra.gmra.mrb[0].mxu1 %vm90_vm1, %v409_v6 }
   0xb   :  { %386 = vmatprep.mubr.msk.bf16.mxu0 %vm90_vm1, %v410_v7  ;;  %394 = vmatprep.mubr.msk.bf16.mxu1 %vm90_vm1, %v411_v8 }
  0x12   :  { %387 = vmatmul.mubr.msk.bf16.gmra.mrb[4].mxu0 %vm90_vm1, %v412_v9  ;;  %395 = vmatmul.mubr.msk.bf16.gmra.mrb[4].mxu1 %vm90_vm1, %v413_v10 }
  0xdd   :  { %v384_v12 = vpop.f32.mrb[0].mxu0  ;;  %v392_v13 = vpop.f32.mrb[0].mxu1 }
  0xde   :  { %v162_v14 = vadd.f32 %v384_v12, %v317_v11  ;;  %v194_v15 = vadd.f32 %v392_v13, %v317_v11  ;;  %v153_v16 = vpop.f32.mrb[1].mxu0  ;;  %v185_v17 = vpop.f32.mrb[1].mxu1 }
  0xdf   :  { %v154_v18 = vadd.f32 %v317_v11, %v153_v16  ;;  %v186_v19 = vadd.f32 %v317_v11, %v185_v17  ;;  %v385_v20 = vpop.f32.mrb[2].mxu0  ;;  %v393_v21 = vpop.f32.mrb[2].mxu1 }
  0xe0   :  { %v218_v22 = vmax.f32 %v162_v14, 0.0  ;;  %v226_v23 = vmax.f32 %v194_v15, 0.0  ;;  %v165_v24 = vadd.f32 %v385_v20, %v317_v11  ;;  %v197_v25 = vadd.f32 %v393_v21, %v317_v11  ;;  %v156_v26 = vpop.f32.mrb[3].mxu0  ;;  %v188_v27 = vpop.f32.mrb[3].mxu1 }
  0xe1   :  { %v216_v28 = vmax.f32 %v154_v18, 0.0  ;;  %v224_v29 = vmax.f32 %v186_v19, 0.0  ;;  %v157_v30 = vadd.f32 %v317_v11, %v156_v26  ;;  %v189_v31 = vadd.f32 %v317_v11, %v188_v27 }
  0xe2   :  { %v354_v32 = vpack.c.bf16 %v218_v22, %v218_v22  ;;  %v362_v33 = vpack.c.bf16 %v226_v23, %v226_v23  ;;  %v219_v34 = vmax.f32 %v165_v24, 0.0  ;;  %v227_v35 = vmax.f32 %v197_v25, 0.0 }
  0xe3   :  { %v352_v36 = vpack.c.bf16 %v216_v28, %v216_v28  ;;  %v360_v37 = vpack.c.bf16 %v224_v29, %v224_v29  ;;  %v217_v38 = vmax.f32 %v157_v30, 0.0  ;;  %v225_v39 = vmax.f32 %v189_v31, 0.0 }
  0xe4   :  { %299 = vst.msk [vmem:[%s542_s3 + $0x8] sm:$0xf] %vm296_vm2, %v354_v32  ;;  %307 = vst.msk [vmem:[%s542_s3 + $0x28] sm:$0xf] %vm296_vm2, %v362_v33  ;;  %v355_v40 = vpack.c.bf16 %v219_v34, %v219_v34  ;;  %v363_v41 = vpack.c.bf16 %v227_v35, %v227_v35 }
  0xe5   :  { %297 = vst.msk [vmem:[%s542_s3] sm:$0xf] %vm296_vm2, %v352_v36  ;;  %305 = vst.msk [vmem:[%s542_s3 + $0x20] sm:$0xf] %vm296_vm2, %v360_v37  ;;  %v353_v42 = vpack.c.bf16 %v217_v38, %v217_v38  ;;  %v361_v43 = vpack.c.bf16 %v225_v39, %v225_v39  ;;  %v388_v44 = vpop.f32.mrb[4].mxu0  ;;  %v396_v45 = vpop.f32.mrb[4].mxu1 }
  0xe6   :  { %300 = vst.msk [vmem:[%s542_s3 + $0xc] sm:$0xf] %vm296_vm2, %v355_v40  ;;  %308 = vst.msk [vmem:[%s542_s3 + $0x2c] sm:$0xf] %vm296_vm2, %v363_v41  ;;  %v178_v46 = vadd.f32 %v388_v44, %v317_v11  ;;  %v210_v47 = vadd.f32 %v396_v45, %v317_v11  ;;  %v169_v48 = vpop.f32.mrb[5].mxu0  ;;  %v201_v49 = vpop.f32.mrb[5].mxu1 }
  0xe7   :  { %298 = vst.msk [vmem:[%s542_s3 + $0x4] sm:$0xf] %vm296_vm2, %v353_v42  ;;  %306 = vst.msk [vmem:[%s542_s3 + $0x24] sm:$0xf] %vm296_vm2, %v361_v43  ;;  %v170_v50 = vadd.f32 %v317_v11, %v169_v48  ;;  %v202_v51 = vadd.f32 %v317_v11, %v201_v49  ;;  %v389_v52 = vpop.f32.mrb[6].mxu0  ;;  %v397_v53 = vpop.f32.mrb[6].mxu1 }
  0xe8   :  { %v222_v54 = vmax.f32 %v178_v46, 0.0  ;;  %v230_v55 = vmax.f32 %v210_v47, 0.0  ;;  %v181_v56 = vadd.f32 %v389_v52, %v317_v11  ;;  %v213_v57 = vadd.f32 %v397_v53, %v317_v11  ;;  %v172_v58 = vpop.f32.mrb[7].mxu0  ;;  %v204_v59 = vpop.f32.mrb[7].mxu1 }
  0xe9   :  { %v220_v60 = vmax.f32 %v170_v50, 0.0  ;;  %v228_v61 = vmax.f32 %v202_v51, 0.0  ;;  %v173_v62 = vadd.f32 %v317_v11, %v172_v58  ;;  %v205_v63 = vadd.f32 %v317_v11, %v204_v59 }
  0xea   :  { %v358_v0 = vpack.c.bf16 %v222_v54, %v222_v54  ;;  %v366_v1 = vpack.c.bf16 %v230_v55, %v230_v55  ;;  %v223_v2 = vmax.f32 %v181_v56, 0.0  ;;  %v231_v3 = vmax.f32 %v213_v57, 0.0 }
  0xeb   :  { %v356_v4 = vpack.c.bf16 %v220_v60, %v220_v60  ;;  %v364_v5 = vpack.c.bf16 %v228_v61, %v228_v61  ;;  %v221_v6 = vmax.f32 %v173_v62, 0.0  ;;  %v229_v7 = vmax.f32 %v205_v63, 0.0 }
  0xec   :  { %303 = vst.msk [vmem:[%s542_s3 + $0x18] sm:$0xf] %vm296_vm2, %v358_v0  ;;  %311 = vst.msk [vmem:[%s542_s3 + $0x38] sm:$0xf] %vm296_vm2, %v366_v1  ;;  %v359_v8 = vpack.c.bf16 %v223_v2, %v223_v2  ;;  %v367_v9 = vpack.c.bf16 %v231_v3, %v231_v3 }
  0xed   :  { %301 = vst.msk [vmem:[%s542_s3 + $0x10] sm:$0xf] %vm296_vm2, %v356_v4  ;;  %309 = vst.msk [vmem:[%s542_s3 + $0x30] sm:$0xf] %vm296_vm2, %v364_v5  ;;  %v357_v10 = vpack.c.bf16 %v221_v6, %v221_v6  ;;  %v365_v11 = vpack.c.bf16 %v229_v7, %v229_v7 }
  0xee   :  { %304 = vst.msk [vmem:[%s542_s3 + $0x1c] sm:$0xf] %vm296_vm2, %v359_v8  ;;  %312 = vst.msk [vmem:[%s542_s3 + $0x3c] sm:$0xf] %vm296_vm2, %v367_v9 }
  0xef   :  { %302 = vst.msk [vmem:[%s542_s3 + $0x14] sm:$0xf] %vm296_vm2, %v357_v10  ;;  %310 = vst.msk [vmem:[%s542_s3 + $0x34] sm:$0xf] %vm296_vm2, %v365_v11 }

// kernel: _lambda_.19
= control target key start
LH: loop header
LB: loop body
LE: loop exit
PB: predicated region body
PF: predicated region fallthrough
CT: control target
= control target key end

     0   :  { %v842_v0 = vmov 0   ;;  %vm224_vm0 = vcmask 719872   ;;  %vm249_vm1 = vcmask 1043456   ;;  %vm461_vm2 = vcmask 1045504   ;;  %s1106_s1 = inlined_call_operand.vmem [shape: bf16[216,108], index: 1, kind: input, shape index: {}]   ;;  %s1107_s0 = inlined_call_operand.vmem [shape: bf16[128,216], index: 0, kind: input, shape index: {}]   ;;  %s1108_s3 = inlined_call_operand.vmem [shape: bf16[108,8], index: 3, kind: input, shape index: {}]   ;;  %s1109_s2 = inlined_call_operand.vmem [shape: f32[1,108], index: 2, kind: input, shape index: {}]   ;;  %s1110_s4 = inlined_call_operand.vmem [shape: f32[1,8], index: 4, kind: input, shape index: {}]   ;;  %s1111_s5 = inlined_call_operand.vmem [shape: bf16[128,8], index: 5, kind: output, shape index: {}]  }
   0x1   :  { %253 = vmatprep.subr.bf16.mxu0 %v842_v0  ;;  %v797_v1 = vld [vmem:[%s1106_s1] sm:$0xff]   ;;  %v798_v2 = vld [vmem:[%s1106_s1 + $0x8] sm:$0xff]   ;;  %v799_v3 = vld [vmem:[%s1106_s1 + $0x10] sm:$0xff]   ;;  %vm436_vm3 = vcmask 883712   ;;  %vm642_vm4 = vcmask 60416  }
   0x2   :  { %254 = vmatpush1.bf16.msra.mxu0 %v797_v1  ;;  %v800_v4 = vld [vmem:[%s1106_s1 + $0x18] sm:$0xff]   ;;  %v801_v5 = vld [vmem:[%s1106_s1 + $0x20] sm:$0xff]   ;;  %v802_v7 = vld [vmem:[%s1106_s1 + $0x28] sm:$0xff]  }
   0x3   :  { %255 = vmatprep.subr.bf16.mxu0 %v842_v0  ;;  %v813_v6 = vld [vmem:[%s1107_s0 + $0x4] ss:$8 sps:$4 sm:$0xff]   ;;  %v803_v8 = vld [vmem:[%s1106_s1 + $0x30] sm:$0xff]   ;;  %v804_v9 = vld [vmem:[%s1106_s1 + $0x38] sm:$0xff]  }
   0x4   :  { %694 = vmatprep.mubr.msk.bf16.mxu0 %vm224_vm0, %v813_v6  ;;  %v835_v10 = vld [vmem:[%s1108_s3] sm:$0xff]   ;;  %v836_v11 = vld [vmem:[%s1108_s3 + $0x8] sm:$0xff]   ;;  %v837_v12 = vld [vmem:[%s1108_s3 + $0x10] sm:$0xff]  }
   0x5   :  { %765 = vmatprep.subr.bf16.mxu1 %v835_v10  ;;  %v805_v13 = vld [vmem:[%s1106_s1 + $0x40] sm:$0xff]   ;;  %v806_v14 = vld [vmem:[%s1106_s1 + $0x48] sm:$0xff]   ;;  %v807_v15 = vld [vmem:[%s1106_s1 + $0x50] sm:$0xff]  }
   0x6   :  { %256 = vmatpush1.bf16.msra.mxu0 %v798_v2  ;;  %766 = vmatpush3.bf16.msra.mxu1 %v835_v10  ;;  %v808_v16 = vld [vmem:[%s1106_s1 + $0x58] sm:$0xff]   ;;  %v809_v17 = vld [vmem:[%s1106_s1 + $0x60] sm:$0xff]   ;;  %v810_v18 = vld [vmem:[%s1106_s1 + $0x68] ss:$0 sps:$4 sm:$0xff]  }
   0x7   :  { %257 = vmatprep.subr.bf16.mxu0 %v842_v0  ;;  %767 = vmatprep.subr.bf16.mxu1 %v836_v11  ;;  %v251_v19 = vsel %vm249_vm1, %v810_v18, 0  ;;  %v811_v20 = vld [vmem:[%s1107_s0] ss:$8 sps:$4 sm:$0xff]   ;;  %v814_v21 = vld [vmem:[%s1107_s0 + $0x14] ss:$8 sps:$4 sm:$0xff]  }
   0x8   :  { %v816_v22 = vld [vmem:[%s1107_s0 + $0x10] ss:$8 sps:$4 sm:$0xff]   ;;  %v817_v23 = vld [vmem:[%s1107_s0 + $0x24] ss:$8 sps:$4 sm:$0xff]   ;;  %v819_v24 = vld [vmem:[%s1107_s0 + $0x20] ss:$8 sps:$4 sm:$0xff]  }
   0x9   :  { %v820_v25 = vld [vmem:[%s1107_s0 + $0x34] ss:$8 sps:$4 sm:$0xff]   ;;  %v822_v26 = vld [vmem:[%s1107_s0 + $0x30] ss:$8 sps:$4 sm:$0xff]   ;;  %v823_v27 = vld [vmem:[%s1107_s0 + $0x44] ss:$8 sps:$4 sm:$0xff]  }
   0xa   :  { %258 = vmatpush1.bf16.msra.mxu0 %v799_v3  ;;  %768 = vmatpush3.bf16.msra.mxu1 %v836_v11  ;;  %v825_v28 = vld [vmem:[%s1107_s0 + $0x40] ss:$8 sps:$4 sm:$0xff]   ;;  %v826_v29 = vld [vmem:[%s1107_s0 + $0x54] ss:$8 sps:$4 sm:$0xff]   ;;  %v828_v30 = vld [vmem:[%s1107_s0 + $0x50] ss:$8 sps:$4 sm:$0xff]  }
   0xb   :  { %259 = vmatprep.subr.bf16.mxu0 %v842_v0  ;;  %769 = vmatprep.subr.bf16.mxu1 %v837_v12  ;;  %v829_v31 = vld [vmem:[%s1107_s0 + $0x64] ss:$8 sps:$4 sm:$0xff]   ;;  %v831_v32 = vld [vmem:[%s1107_s0 + $0x60] ss:$8 sps:$4 sm:$0xff]   ;;  %v832_v33 = vld [vmem:[%s1107_s0 + $0x74] ss:$8 sps:$4 sm:$0xff]  }
   0xc   :  { %v834_v34 = vld [vmem:[%s1107_s0 + $0x70] ss:$8 sps:$4 sm:$0xff]   ;;  %v839_v36 = vld [vmem:[%s1108_s3 + $0x20] sm:$0xff]   ;;  %v840_v37 = vld [vmem:[%s1108_s3 + $0x28] sm:$0xff]  }
   0xd   :  { %v838_v35 = vld [vmem:[%s1108_s3 + $0x18] sm:$0xff]   ;;  %v841_v38 = vld [vmem:[%s1108_s3 + $0x30] sm:$0x3f]   ;;  %v995_v40 = vld [vmem:[%s1109_s2] ss:$0 sm:$0xff] }
   0xe   :  { %260 = vmatpush1.bf16.msra.mxu0 %v800_v4  ;;  %770 = vmatpush3.bf16.msra.mxu1 %v837_v12  ;;  %v463_v39 = vsel %vm461_vm2, %v841_v38, 0 }
   0xf   :  { %261 = vmatprep.subr.bf16.mxu0 %v842_v0  ;;  %771 = vmatprep.subr.bf16.mxu1 %v838_v35 }
  0x12   :  { %262 = vmatpush1.bf16.msra.mxu0 %v801_v5  ;;  %772 = vmatpush3.bf16.msra.mxu1 %v838_v35 }
  0x13   :  { %263 = vmatprep.subr.bf16.mxu0 %v842_v0  ;;  %773 = vmatprep.subr.bf16.mxu1 %v839_v36 }
  0x16   :  { %264 = vmatpush1.bf16.msra.mxu0 %v802_v7  ;;  %774 = vmatpush3.bf16.msra.mxu1 %v839_v36 }
  0x17   :  { %265 = vmatprep.subr.bf16.mxu0 %v842_v0  ;;  %775 = vmatprep.subr.bf16.mxu1 %v840_v37 }
  0x1a   :  { %266 = vmatpush1.bf16.msra.mxu0 %v803_v8  ;;  %776 = vmatpush3.bf16.msra.mxu1 %v840_v37 }
  0x1b   :  { %267 = vmatprep.subr.bf16.mxu0 %v842_v0  ;;  %795 = vmatprep.subr.msk.bf16.mxu1 %vm461_vm2, %v841_v38 }
  0x1e   :  { %268 = vmatpush1.bf16.msra.mxu0 %v804_v9  ;;  %778 = vmatpush3.bf16.msra.mxu1 %v463_v39 }
  0x1f   :  { %269 = vmatprep.subr.bf16.mxu0 %v842_v0 }
  0x22   :  { %270 = vmatpush1.bf16.msra.mxu0 %v805_v13 }
  0x23   :  { %271 = vmatprep.subr.bf16.mxu0 %v842_v0 }
  0x26   :  { %272 = vmatpush1.bf16.msra.mxu0 %v806_v14 }
  0x27   :  { %273 = vmatprep.subr.bf16.mxu0 %v842_v0 }
  0x2a   :  { %274 = vmatpush1.bf16.msra.mxu0 %v807_v15 }
  0x2b   :  { %275 = vmatprep.subr.bf16.mxu0 %v842_v0 }
  0x2e   :  { %276 = vmatpush1.bf16.msra.mxu0 %v808_v16 }
  0x2f   :  { %277 = vmatprep.subr.bf16.mxu0 %v842_v0 }
  0x32   :  { %278 = vmatpush1.bf16.msra.mxu0 %v809_v17 }
  0x33   :  { %279 = vmatprep.subr.bf16.mxu0 %v842_v0 }
  0x36   :  { %280 = vmatpush1.bf16.msra.mxu0 %v251_v19 }
  0x39   :  { %286 = vmatmul.mubr.bf16.vlgmr.msra.gmra.mrb[0].mxu0 %v811_v20 }
  0x3a   :  { %695 = vmatprep.mubr.msk.bf16.mxu0 %vm224_vm0, %v814_v21 }
  0x41   :  { %294 = vmatmul.mubr.bf16.gmra.mrb[4].mxu0 %v816_v22 }
  0x42   :  { %696 = vmatprep.mubr.msk.bf16.mxu0 %vm224_vm0, %v817_v23 }
  0x49   :  { %302 = vmatmul.mubr.bf16.gmra.mrb[8].mxu0 %v819_v24 }
  0x4a   :  { %697 = vmatprep.mubr.msk.bf16.mxu0 %vm224_vm0, %v820_v25 }
  0x51   :  { %310 = vmatmul.mubr.bf16.gmra.mrb[12].mxu0 %v822_v26 }
  0x52   :  { %698 = vmatprep.mubr.msk.bf16.mxu0 %vm224_vm0, %v823_v27 }
  0x59   :  { %318 = vmatmul.mubr.bf16.gmra.mrb[16].mxu0 %v825_v28 }
  0x5a   :  { %699 = vmatprep.mubr.msk.bf16.mxu0 %vm224_vm0, %v826_v29 }
  0x61   :  { %326 = vmatmul.mubr.bf16.gmra.mrb[20].mxu0 %v828_v30 }
  0x62   :  { %700 = vmatprep.mubr.msk.bf16.mxu0 %vm224_vm0, %v829_v31 }
  0x69   :  { %334 = vmatmul.mubr.bf16.gmra.mrb[24].mxu0 %v831_v32 }
  0x6a   :  { %701 = vmatprep.mubr.msk.bf16.mxu0 %vm224_vm0, %v832_v33 }
  0x71   :  { %342 = vmatmul.mubr.bf16.gmra.mrb[28].mxu0 %v834_v34 }
 0x10c   :  { %v287_v41 = vpop.f32.mrb[0].mxu0 }
 0x10d   :  { %v288_v42 = vadd.f32 %v995_v40, %v287_v41  ;;  %v289_v43 = vpop.f32.mrb[1].mxu0 }
 0x10e   :  { %v290_v44 = vpop.f32.mrb[2].mxu0 }
 0x10f   :  { %v291_v45 = vadd.f32 %v995_v40, %v290_v44  ;;  %v292_v46 = vpop.f32.mrb[3].mxu0  ;;  %v350_v47 = vmax.f32 %v288_v42, 0.0 }
 0x111   :  { %v351_v48 = vmax.f32 %v291_v45, 0.0 }
 0x113   :  { %v366_v49 = vpack.c.bf16 %v351_v48, %v350_v47 }
 0x114   :  { %v295_v50 = vpop.f32.mrb[4].mxu0 }
 0x115   :  { %v296_v51 = vadd.f32 %v995_v40, %v295_v50  ;;  %v297_v52 = vpop.f32.mrb[5].mxu0  ;;  %779 = vmatprep.mubr.msk.bf16.mxu1 %vm436_vm3, %v366_v49  ;;  %v1024_v50 = vld [vmem:[%s1110_s4] ss:$0 sm:$0xff] }
 0x116   :  { %v298_v53 = vpop.f32.mrb[6].mxu0 }
 0x117   :  { %v299_v54 = vadd.f32 %v995_v40, %v298_v53  ;;  %v300_v55 = vpop.f32.mrb[7].mxu0  ;;  %v352_v56 = vmax.f32 %v296_v51, 0.0 }
 0x119   :  { %v353_v57 = vmax.f32 %v299_v54, 0.0 }
 0x11b   :  { %v367_v58 = vpack.c.bf16 %v353_v57, %v352_v56 }
 0x11c   :  { %v303_v59 = vpop.f32.mrb[8].mxu0 }
 0x11d   :  { %v304_v60 = vadd.f32 %v995_v40, %v303_v59  ;;  %v305_v61 = vpop.f32.mrb[9].mxu0  ;;  %780 = vmatmul.mubr.msk.bf16.vlgmr.msra.gmra.mrb[0].mxu1 %vm436_vm3, %v367_v58 }
 0x11e   :  { %v306_v62 = vpop.f32.mrb[10].mxu0 }
 0x11f   :  { %v307_v63 = vadd.f32 %v995_v40, %v306_v62  ;;  %v308_v0 = vpop.f32.mrb[11].mxu0  ;;  %v354_v1 = vmax.f32 %v304_v60, 0.0 }
 0x121   :  { %v355_v2 = vmax.f32 %v307_v63, 0.0 }
 0x123   :  { %v368_v3 = vpack.c.bf16 %v355_v2, %v354_v1 }
 0x124   :  { %v311_v4 = vpop.f32.mrb[12].mxu0 }
 0x125   :  { %v312_v5 = vadd.f32 %v995_v40, %v311_v4  ;;  %v313_v6 = vpop.f32.mrb[13].mxu0  ;;  %783 = vmatprep.mubr.msk.bf16.mxu1 %vm436_vm3, %v368_v3 }
 0x126   :  { %v314_v7 = vpop.f32.mrb[14].mxu0 }
 0x127   :  { %v315_v8 = vadd.f32 %v995_v40, %v314_v7  ;;  %v316_v9 = vpop.f32.mrb[15].mxu0  ;;  %v356_v10 = vmax.f32 %v312_v5, 0.0 }
 0x129   :  { %v357_v11 = vmax.f32 %v315_v8, 0.0 }
 0x12b   :  { %v369_v12 = vpack.c.bf16 %v357_v11, %v356_v10 }
 0x12c   :  { %v319_v13 = vpop.f32.mrb[16].mxu0 }
 0x12d   :  { %v320_v14 = vadd.f32 %v995_v40, %v319_v13  ;;  %v321_v15 = vpop.f32.mrb[17].mxu0  ;;  %784 = vmatmul.mubr.msk.bf16.gmra.mrb[4].mxu1 %vm436_vm3, %v369_v12 }
 0x12e   :  { %v322_v16 = vpop.f32.mrb[18].mxu0 }
 0x12f   :  { %v323_v17 = vadd.f32 %v995_v40, %v322_v16  ;;  %v324_v18 = vpop.f32.mrb[19].mxu0  ;;  %v358_v19 = vmax.f32 %v320_v14, 0.0 }
 0x131   :  { %v359_v20 = vmax.f32 %v323_v17, 0.0 }
 0x133   :  { %v370_v21 = vpack.c.bf16 %v359_v20, %v358_v19 }
 0x134   :  { %v327_v22 = vpop.f32.mrb[20].mxu0 }
 0x135   :  { %v328_v23 = vadd.f32 %v995_v40, %v327_v22  ;;  %v329_v24 = vpop.f32.mrb[21].mxu0  ;;  %787 = vmatprep.mubr.msk.bf16.mxu1 %vm436_vm3, %v370_v21 }
 0x136   :  { %v330_v25 = vpop.f32.mrb[22].mxu0 }
 0x137   :  { %v331_v26 = vadd.f32 %v995_v40, %v330_v25  ;;  %v332_v27 = vpop.f32.mrb[23].mxu0  ;;  %v360_v28 = vmax.f32 %v328_v23, 0.0 }
 0x139   :  { %v361_v29 = vmax.f32 %v331_v26, 0.0 }
 0x13b   :  { %v371_v30 = vpack.c.bf16 %v361_v29, %v360_v28 }
 0x13c   :  { %v335_v31 = vpop.f32.mrb[24].mxu0 }
 0x13d   :  { %v336_v32 = vadd.f32 %v995_v40, %v335_v31  ;;  %v337_v33 = vpop.f32.mrb[25].mxu0  ;;  %788 = vmatmul.mubr.msk.bf16.gmra.mrb[8].mxu1 %vm436_vm3, %v371_v30 }
 0x13e   :  { %v338_v34 = vpop.f32.mrb[26].mxu0 }
 0x13f   :  { %v339_v35 = vadd.f32 %v995_v40, %v338_v34  ;;  %v340_v36 = vpop.f32.mrb[27].mxu0  ;;  %v362_v37 = vmax.f32 %v336_v32, 0.0 }
 0x141   :  { %v363_v38 = vmax.f32 %v339_v35, 0.0 }
 0x143   :  { %v372_v39 = vpack.c.bf16 %v363_v38, %v362_v37 }
 0x144   :  { %v343_v41 = vpop.f32.mrb[28].mxu0 }
 0x145   :  { %v344_v42 = vadd.f32 %v995_v40, %v343_v41  ;;  %v345_v43 = vpop.f32.mrb[29].mxu0  ;;  %791 = vmatprep.mubr.msk.bf16.mxu1 %vm436_vm3, %v372_v39 }
 0x146   :  { %v346_v44 = vpop.f32.mrb[30].mxu0 }
 0x147   :  { %v347_v45 = vadd.f32 %v995_v40, %v346_v44  ;;  %v348_v46 = vpop.f32.mrb[31].mxu0  ;;  %v364_v47 = vmax.f32 %v344_v42, 0.0 }
 0x149   :  { %v365_v48 = vmax.f32 %v347_v45, 0.0 }
 0x14b   :  { %v373_v49 = vpack.c.bf16 %v365_v48, %v364_v47 }
 0x14d   :  { %792 = vmatmul.mubr.msk.bf16.gmra.mrb[12].mxu1 %vm436_vm3, %v373_v49 }
 0x1f0   :  { %v781_v51 = vpop.f32.mrb[0].mxu1 }
 0x1f1   :  { %v508_v52 = vadd.f32 %v781_v51, %v1024_v50  ;;  %v499_v53 = vpop.f32.mrb[1].mxu1 }
 0x1f2   :  { %v500_v54 = vadd.f32 %v1024_v50, %v499_v53  ;;  %v782_v55 = vpop.f32.mrb[2].mxu1 }
 0x1f3   :  { %v564_v56 = vmax.f32 %v508_v52, 0.0  ;;  %v511_v40 = vadd.f32 %v782_v55, %v1024_v50  ;;  %v502_v57 = vpop.f32.mrb[3].mxu1 }
 0x1f4   :  { %v562_v58 = vmax.f32 %v500_v54, 0.0  ;;  %v503_v59 = vadd.f32 %v1024_v50, %v502_v57 }
 0x1f5   :  { %v736_v60 = vpack.c.bf16 %v564_v56, %v564_v56  ;;  %v565_v61 = vmax.f32 %v511_v40, 0.0 }
 0x1f6   :  { %v734_v62 = vpack.c.bf16 %v562_v58, %v562_v58  ;;  %v563_v63 = vmax.f32 %v503_v59, 0.0 }
 0x1f7   :  { %645 = vst.msk [vmem:[%s1111_s5 + $0x8] sm:$0xf] %vm642_vm4, %v736_v60  ;;  %v737_v0 = vpack.c.bf16 %v565_v61, %v565_v61 }
 0x1f8   :  { %643 = vst.msk [vmem:[%s1111_s5] sm:$0xf] %vm642_vm4, %v734_v62  ;;  %v735_v1 = vpack.c.bf16 %v563_v63, %v563_v63 }
 0x1f9   :  { %646 = vst.msk [vmem:[%s1111_s5 + $0xc] sm:$0xf] %vm642_vm4, %v737_v0 }
 0x1fa   :  { %644 = vst.msk [vmem:[%s1111_s5 + $0x4] sm:$0xf] %vm642_vm4, %v735_v1 }
 0x200   :  { %v785_v2 = vpop.f32.mrb[4].mxu1 }
 0x201   :  { %v524_v3 = vadd.f32 %v785_v2, %v1024_v50  ;;  %v515_v4 = vpop.f32.mrb[5].mxu1 }
 0x202   :  { %v516_v5 = vadd.f32 %v1024_v50, %v515_v4  ;;  %v786_v6 = vpop.f32.mrb[6].mxu1 }
 0x203   :  { %v568_v7 = vmax.f32 %v524_v3, 0.0  ;;  %v527_v8 = vadd.f32 %v786_v6, %v1024_v50  ;;  %v518_v9 = vpop.f32.mrb[7].mxu1 }
 0x204   :  { %v566_v10 = vmax.f32 %v516_v5, 0.0  ;;  %v519_v11 = vadd.f32 %v1024_v50, %v518_v9 }
 0x205   :  { %v740_v12 = vpack.c.bf16 %v568_v7, %v568_v7  ;;  %v569_v13 = vmax.f32 %v527_v8, 0.0 }
 0x206   :  { %v738_v14 = vpack.c.bf16 %v566_v10, %v566_v10  ;;  %v567_v15 = vmax.f32 %v519_v11, 0.0 }
 0x207   :  { %649 = vst.msk [vmem:[%s1111_s5 + $0x18] sm:$0xf] %vm642_vm4, %v740_v12  ;;  %v741_v16 = vpack.c.bf16 %v569_v13, %v569_v13 }
 0x208   :  { %647 = vst.msk [vmem:[%s1111_s5 + $0x10] sm:$0xf] %vm642_vm4, %v738_v14  ;;  %v739_v17 = vpack.c.bf16 %v567_v15, %v567_v15 }
 0x209   :  { %650 = vst.msk [vmem:[%s1111_s5 + $0x1c] sm:$0xf] %vm642_vm4, %v741_v16 }
 0x20a   :  { %648 = vst.msk [vmem:[%s1111_s5 + $0x14] sm:$0xf] %vm642_vm4, %v739_v17 }
 0x210   :  { %v789_v18 = vpop.f32.mrb[8].mxu1 }
 0x211   :  { %v540_v19 = vadd.f32 %v789_v18, %v1024_v50  ;;  %v531_v20 = vpop.f32.mrb[9].mxu1 }
 0x212   :  { %v532_v21 = vadd.f32 %v1024_v50, %v531_v20  ;;  %v790_v22 = vpop.f32.mrb[10].mxu1 }
 0x213   :  { %v572_v23 = vmax.f32 %v540_v19, 0.0  ;;  %v543_v24 = vadd.f32 %v790_v22, %v1024_v50  ;;  %v534_v25 = vpop.f32.mrb[11].mxu1 }
 0x214   :  { %v570_v26 = vmax.f32 %v532_v21, 0.0  ;;  %v535_v27 = vadd.f32 %v1024_v50, %v534_v25 }
 0x215   :  { %v744_v28 = vpack.c.bf16 %v572_v23, %v572_v23  ;;  %v573_v29 = vmax.f32 %v543_v24, 0.0 }
 0x216   :  { %v742_v30 = vpack.c.bf16 %v570_v26, %v570_v26  ;;  %v571_v31 = vmax.f32 %v535_v27, 0.0 }
 0x217   :  { %653 = vst.msk [vmem:[%s1111_s5 + $0x28] sm:$0xf] %vm642_vm4, %v744_v28  ;;  %v745_v32 = vpack.c.bf16 %v573_v29, %v573_v29 }
 0x218   :  { %651 = vst.msk [vmem:[%s1111_s5 + $0x20] sm:$0xf] %vm642_vm4, %v742_v30  ;;  %v743_v33 = vpack.c.bf16 %v571_v31, %v571_v31 }
 0x219   :  { %654 = vst.msk [vmem:[%s1111_s5 + $0x2c] sm:$0xf] %vm642_vm4, %v745_v32 }
 0x21a   :  { %652 = vst.msk [vmem:[%s1111_s5 + $0x24] sm:$0xf] %vm642_vm4, %v743_v33 }
 0x220   :  { %v793_v34 = vpop.f32.mrb[12].mxu1 }
 0x221   :  { %v556_v35 = vadd.f32 %v793_v34, %v1024_v50  ;;  %v547_v36 = vpop.f32.mrb[13].mxu1 }
 0x222   :  { %v548_v37 = vadd.f32 %v1024_v50, %v547_v36  ;;  %v794_v38 = vpop.f32.mrb[14].mxu1 }
 0x223   :  { %v576_v39 = vmax.f32 %v556_v35, 0.0  ;;  %v559_v41 = vadd.f32 %v794_v38, %v1024_v50  ;;  %v550_v42 = vpop.f32.mrb[15].mxu1 }
 0x224   :  { %v574_v43 = vmax.f32 %v548_v37, 0.0  ;;  %v551_v44 = vadd.f32 %v1024_v50, %v550_v42 }
 0x225   :  { %v748_v45 = vpack.c.bf16 %v576_v39, %v576_v39  ;;  %v577_v46 = vmax.f32 %v559_v41, 0.0 }
 0x226   :  { %v746_v47 = vpack.c.bf16 %v574_v43, %v574_v43  ;;  %v575_v48 = vmax.f32 %v551_v44, 0.0 }
 0x227   :  { %657 = vst.msk [vmem:[%s1111_s5 + $0x38] sm:$0xf] %vm642_vm4, %v748_v45  ;;  %v749_v49 = vpack.c.bf16 %v577_v46, %v577_v46 }
 0x228   :  { %655 = vst.msk [vmem:[%s1111_s5 + $0x30] sm:$0xf] %vm642_vm4, %v746_v47  ;;  %v747_v51 = vpack.c.bf16 %v575_v48, %v575_v48 }
 0x229   :  { %658 = vst.msk [vmem:[%s1111_s5 + $0x3c] sm:$0xf] %vm642_vm4, %v749_v49 }
 0x22a   :  { %656 = vst.msk [vmem:[%s1111_s5 + $0x34] sm:$0xf] %vm642_vm4, %v747_v51 }

// kernel: _lambda_.21
= control target key start
LH: loop header
LB: loop body
LE: loop exit
PB: predicated region body
PF: predicated region fallthrough
CT: control target
= control target key end

     0   :  { %vm91_vm0 = vcmask 883712   ;;  %vm98_vm1 = vcmask 1045504   ;;  %s305_s1 = inlined_call_operand.vmem [shape: bf16[108,128], index: 1, kind: input, shape index: {}]   ;;  %s306_s0 = inlined_call_operand.vmem [shape: bf16[32,108], index: 0, kind: input, shape index: {}]   ;;  %s307_s2 = inlined_call_operand.vmem [shape: f32[1,128], index: 2, kind: input, shape index: {}]   ;;  %s308_s3 = inlined_call_operand.vmem [shape: bf16[32,128], index: 3, kind: output, shape index: {}]  }
   0x1   :  { %v238_v0 = vld [vmem:[%s305_s1] sm:$0xff]   ;;  %v239_v1 = vld [vmem:[%s305_s1 + $0x8] sm:$0xff]   ;;  %v240_v2 = vld [vmem:[%s305_s1 + $0x10] sm:$0xff]  }
   0x2   :  { %219 = vmatprep.subr.bf16.mxu0 %v238_v0  ;;  %v245_v3 = vld [vmem:[%s306_s0] sm:$0xff]   ;;  %v241_v4 = vld [vmem:[%s305_s1 + $0x18] sm:$0xff]   ;;  %v243_v6 = vld [vmem:[%s305_s1 + $0x28] sm:$0xff]  }
   0x3   :  { %220 = vmatpush3.bf16.msra.mxu0 %v238_v0  ;;  %233 = vmatprep.mubr.msk.bf16.mxu0 %vm91_vm0, %v245_v3  ;;  %v242_v5 = vld [vmem:[%s305_s1 + $0x20] sm:$0xff]   ;;  %v244_v7 = vld [vmem:[%s305_s1 + $0x30] sm:$0x3f]   ;;  %v246_v9 = vld [vmem:[%s306_s0 + $0x8] sm:$0xff]  }
   0x4   :  { %221 = vmatprep.subr.bf16.mxu0 %v239_v1  ;;  %v100_v8 = vsel %vm98_vm1, %v244_v7, 0  ;;  %v179_v10 = vld [vmem:[%s307_s2] ss:$0 sm:$0xff] }
   0x7   :  { %222 = vmatpush3.bf16.msra.mxu0 %v239_v1 }
   0x8   :  { %223 = vmatprep.subr.bf16.mxu0 %v240_v2 }
   0xb   :  { %224 = vmatpush3.bf16.msra.mxu0 %v240_v2 }
   0xc   :  { %225 = vmatprep.subr.bf16.mxu0 %v241_v4 }
   0xf   :  { %226 = vmatpush3.bf16.msra.mxu0 %v241_v4 }
  0x10   :  { %227 = vmatprep.subr.bf16.mxu0 %v242_v5 }
  0x13   :  { %228 = vmatpush3.bf16.msra.mxu0 %v242_v5 }
  0x14   :  { %229 = vmatprep.subr.bf16.mxu0 %v243_v6 }
  0x17   :  { %230 = vmatpush3.bf16.msra.mxu0 %v243_v6 }
  0x18   :  { %237 = vmatprep.subr.msk.bf16.mxu0 %vm98_vm1, %v244_v7 }
  0x1b   :  { %232 = vmatpush3.bf16.msra.mxu0 %v100_v8 }
  0x1e   :  { %234 = vmatmul.mubr.msk.bf16.vlgmr.msra.gmra.mrb[0].mxu0 %vm91_vm0, %v246_v9 }
  0xf1   :  { %v235_v11 = vpop.f32.mrb[0].mxu0 }
  0xf2   :  { %v145_v12 = vadd.f32 %v235_v11, %v179_v10  ;;  %v136_v13 = vpop.f32.mrb[1].mxu0 }
  0xf3   :  { %v137_v14 = vadd.f32 %v179_v10, %v136_v13  ;;  %v236_v15 = vpop.f32.mrb[2].mxu0 }
  0xf4   :  { %v148_v16 = vadd.f32 %v236_v15, %v179_v10  ;;  %v139_v17 = vpop.f32.mrb[3].mxu0  ;;  %v153_v19 = vmax.f32 %v145_v12, 0.0 }
  0xf5   :  { %v140_v18 = vadd.f32 %v179_v10, %v139_v17  ;;  %v151_v21 = vmax.f32 %v137_v14, 0.0 }
  0xf6   :  { %v154_v20 = vmax.f32 %v148_v16, 0.0 }
  0xf7   :  { %v152_v22 = vmax.f32 %v140_v18, 0.0 }
  0xf8   :  { %v207_v23 = vpack.c.bf16 %v154_v20, %v153_v19 }
  0xf9   :  { %v202_v24 = vpack.c.bf16 %v152_v22, %v151_v21 }
  0xfa   :  { %209 = vst [vmem:[%s308_s3 + $0x8] sm:$0xff] %v207_v23  }
  0xfb   :  { %203 = vst [vmem:[%s308_s3] sm:$0xff] %v202_v24  }

// kernel: _lambda_.22
= control target key start
LH: loop header
LB: loop body
LE: loop exit
PB: predicated region body
PF: predicated region fallthrough
CT: control target
= control target key end

     0   :  { %vm1125_vm0 = vmmov 0   ;;  %s1383_s1 = inlined_call_operand.vmem [shape: bf16[1152,128], index: 1, kind: input, shape index: {}]   ;;  %s1384_s0 = inlined_call_operand.vmem [shape: bf16[8,1152], index: 0, kind: input, shape index: {}]   ;;  %s1385_s2 = inlined_call_operand.vmem [shape: f32[1,128], index: 2, kind: input, shape index: {}]   ;;  %s1386_s3 = inlined_call_operand.vmem [shape: bf16[8,128], index: 3, kind: output, shape index: {}]  }
   0x1   :  { %v1043_v0 = vld [vmem:[%s1383_s1 + $0x40] sm:$0xff]   ;;  %v1047_v4 = vld [vmem:[%s1383_s1 + $0x48] sm:$0xff]   ;;  %v1051_v8 = vld [vmem:[%s1383_s1 + $0x50] sm:$0xff]  }
   0x2   :  { %v1044_v1 = vld [vmem:[%s1383_s1] sm:$0xff]   ;;  %924 = vmatprep.subr.bf16.mxu0 %v1043_v0  ;;  %v1048_v5 = vld [vmem:[%s1383_s1 + $0x8] sm:$0xff]   ;;  %v1052_v9 = vld [vmem:[%s1383_s1 + $0x10] sm:$0xff]  }
   0x3   :  { %v1045_v2 = vld [vmem:[%s1383_s1 + $0xc0] sm:$0xff]   ;;  %925 = vmatpush3.bf16.msra.mxu0 %v1044_v1  ;;  %v1049_v6 = vld [vmem:[%s1383_s1 + $0xc8] sm:$0xff]   ;;  %v1053_v10 = vld [vmem:[%s1383_s1 + $0xd0] sm:$0xff]  }
   0x4   :  { %v1046_v3 = vld [vmem:[%s1383_s1 + $0x80] sm:$0xff]   ;;  %946 = vmatprep.subr.bf16.mxu1 %v1045_v2  ;;  %926 = vmatprep.subr.bf16.mxu0 %v1047_v4  ;;  %v1050_v7 = vld [vmem:[%s1383_s1 + $0x88] sm:$0xff]   ;;  %v1054_v11 = vld [vmem:[%s1383_s1 + $0x90] sm:$0xff]  }
   0x5   :  { %947 = vmatpush3.bf16.msra.mxu1 %v1046_v3  ;;  %v1055_v12 = vld [vmem:[%s1383_s1 + $0x58] sm:$0xff]   ;;  %v1059_v16 = vld [vmem:[%s1383_s1 + $0x60] sm:$0xff]   ;;  %v1063_v20 = vld [vmem:[%s1383_s1 + $0x68] sm:$0xff]  }
   0x6   :  { %948 = vmatprep.subr.bf16.mxu1 %v1049_v6  ;;  %v1056_v13 = vld [vmem:[%s1383_s1 + $0x18] sm:$0xff]   ;;  %v1060_v17 = vld [vmem:[%s1383_s1 + $0x20] sm:$0xff]   ;;  %v1064_v21 = vld [vmem:[%s1383_s1 + $0x28] sm:$0xff]  }
   0x7   :  { %927 = vmatpush3.bf16.msra.mxu0 %v1048_v5  ;;  %v1057_v14 = vld [vmem:[%s1383_s1 + $0xd8] sm:$0xff]   ;;  %v1061_v18 = vld [vmem:[%s1383_s1 + $0xe0] sm:$0xff]   ;;  %v1065_v22 = vld [vmem:[%s1383_s1 + $0xe8] sm:$0xff]  }
   0x8   :  { %928 = vmatprep.subr.bf16.mxu0 %v1051_v8  ;;  %v1058_v15 = vld [vmem:[%s1383_s1 + $0x98] sm:$0xff]   ;;  %v1062_v19 = vld [vmem:[%s1383_s1 + $0xa0] sm:$0xff]   ;;  %v1066_v23 = vld [vmem:[%s1383_s1 + $0xa8] sm:$0xff]  }
   0x9   :  { %949 = vmatpush3.bf16.msra.mxu1 %v1050_v7  ;;  %v1067_v24 = vld [vmem:[%s1383_s1 + $0x70] sm:$0xff]   ;;  %v1071_v28 = vld [vmem:[%s1383_s1 + $0x78] sm:$0xff]   ;;  %v15_v31 = vld [vmem:[%s1384_s0] sm:$0xff] }
   0xa   :  { %950 = vmatprep.subr.bf16.mxu1 %v1053_v10  ;;  %v1068_v25 = vld [vmem:[%s1383_s1 + $0x30] sm:$0xff]   ;;  %v1072_v29 = vld [vmem:[%s1383_s1 + $0x38] sm:$0xff]   ;;  %v843_v32 = vcombine.low %v15_v31, %v15_v31  ;;  %v844_v33 = vcombine.high %v15_v31, %v15_v31  ;;  %v1077_v35 = vld [vmem:[%s1383_s1 + $0x140] sm:$0xff]  }
   0xb   :  { %929 = vmatpush3.bf16.msra.mxu0 %v1052_v9  ;;  %v1069_v26 = vld [vmem:[%s1383_s1 + $0xf0] sm:$0xff]   ;;  %v1073_v30 = vld [vmem:[%s1383_s1 + $0xf8] sm:$0xff]   ;;  %v16_v36 = vld [vmem:[%s1384_s0 + $0x8] sm:$0xff]  ;;  %v1124_v9 = vmov 0.0  }
   0xc   :  { %930 = vmatprep.subr.bf16.mxu0 %v1055_v12  ;;  %v1070_v27 = vld [vmem:[%s1383_s1 + $0xb0] sm:$0xff]   ;;  %v1076_v34 = vld [vmem:[%s1383_s1 + $0xb8] sm:$0xff]   ;;  %667 = vmatprep.mubr.bf16.mxu0 %v844_v33  ;;  %v845_v37 = vcombine.low %v16_v36, %v16_v36  ;;  %v846_v38 = vcombine.high %v16_v36, %v16_v36  ;;  %v1080_v39 = vld [vmem:[%s1383_s1 + $0x100] sm:$0xff]  }
   0xd   :  { %951 = vmatpush3.bf16.msra.mxu1 %v1054_v11  ;;  %v1081_v40 = vld [vmem:[%s1383_s1 + $0x1c0] sm:$0xff]   ;;  %v1083_v42 = vld [vmem:[%s1383_s1 + $0x148] sm:$0xff]   ;;  %v1087_v46 = vld [vmem:[%s1383_s1 + $0x150] sm:$0xff]  }
   0xe   :  { %952 = vmatprep.subr.bf16.mxu1 %v1057_v14  ;;  %707 = vmatprep.mubr.bf16.mxu1 %v846_v38  ;;  %v1082_v41 = vld [vmem:[%s1383_s1 + $0x180] sm:$0xff]   ;;  %v1084_v43 = vld [vmem:[%s1383_s1 + $0x108] sm:$0xff]   ;;  %v1088_v47 = vld [vmem:[%s1383_s1 + $0x110] sm:$0xff]  }
   0xf   :  { %931 = vmatpush3.bf16.msra.mxu0 %v1056_v13  ;;  %v1085_v44 = vld [vmem:[%s1383_s1 + $0x1c8] sm:$0xff]   ;;  %v1089_v48 = vld [vmem:[%s1383_s1 + $0x1d0] sm:$0xff]   ;;  %v1091_v50 = vld [vmem:[%s1383_s1 + $0x158] sm:$0xff]  }
  0x10   :  { %932 = vmatprep.subr.bf16.mxu0 %v1059_v16  ;;  %v1086_v45 = vld [vmem:[%s1383_s1 + $0x188] sm:$0xff]   ;;  %v1090_v49 = vld [vmem:[%s1383_s1 + $0x190] sm:$0xff]   ;;  %v1092_v51 = vld [vmem:[%s1383_s1 + $0x118] sm:$0xff]  }
  0x11   :  { %953 = vmatpush3.bf16.msra.mxu1 %v1058_v15  ;;  %v1093_v52 = vld [vmem:[%s1383_s1 + $0x1d8] sm:$0xff]   ;;  %v1095_v54 = vld [vmem:[%s1383_s1 + $0x160] sm:$0xff]   ;;  %v1099_v58 = vld [vmem:[%s1383_s1 + $0x168] sm:$0xff]  }
  0x12   :  { %954 = vmatprep.subr.bf16.mxu1 %v1061_v18  ;;  %v1094_v53 = vld [vmem:[%s1383_s1 + $0x198] sm:$0xff]   ;;  %v1096_v55 = vld [vmem:[%s1383_s1 + $0x120] sm:$0xff]   ;;  %v1100_v59 = vld [vmem:[%s1383_s1 + $0x128] sm:$0xff]  }
  0x13   :  { %933 = vmatpush3.bf16.msra.mxu0 %v1060_v17  ;;  %v1097_v56 = vld [vmem:[%s1383_s1 + $0x1e0] sm:$0xff]   ;;  %v1101_v60 = vld [vmem:[%s1383_s1 + $0x1e8] sm:$0xff]   ;;  %v1103_v62 = vld [vmem:[%s1383_s1 + $0x170] sm:$0xff]  }
  0x14   :  { %934 = vmatprep.subr.bf16.mxu0 %v1063_v20  ;;  %v1098_v57 = vld [vmem:[%s1383_s1 + $0x1a0] sm:$0xff]   ;;  %v1102_v61 = vld [vmem:[%s1383_s1 + $0x1a8] sm:$0xff]   ;;  %v1104_v63 = vld [vmem:[%s1383_s1 + $0x130] sm:$0xff]  }
  0x15   :  { %955 = vmatpush3.bf16.msra.mxu1 %v1062_v19  ;;  %v1105_v0 = vld [vmem:[%s1383_s1 + $0x1f0] sm:$0xff]   ;;  %v1107_v2 = vld [vmem:[%s1383_s1 + $0x178] sm:$0xff]   ;;  %v1115_v13 = vld [vmem:[%s1383_s1 + $0x200] sm:$0xff]  }
  0x16   :  { %956 = vmatprep.subr.bf16.mxu1 %v1065_v22  ;;  %v1106_v1 = vld [vmem:[%s1383_s1 + $0x1b0] sm:$0xff]   ;;  %v1108_v3 = vld [vmem:[%s1383_s1 + $0x138] sm:$0xff]   ;;  %v1116_v14 = vld [vmem:[%s1383_s1 + $0x208] sm:$0xff]  }
  0x17   :  { %935 = vmatpush3.bf16.msra.mxu0 %v1064_v21  ;;  %v1109_v4 = vld [vmem:[%s1383_s1 + $0x1f8] sm:$0xff]   ;;  %v17_v5 = vld [vmem:[%s1384_s0 + $0x10] sm:$0xff]  ;;  %v1119_v17 = vld [vmem:[%s1383_s1 + $0x220] sm:$0xff]  }
  0x18   :  { %936 = vmatprep.subr.bf16.mxu0 %v1067_v24  ;;  %v847_v6 = vcombine.low %v17_v5, %v17_v5  ;;  %v848_v7 = vcombine.high %v17_v5, %v17_v5  ;;  %v1112_v8 = vld [vmem:[%s1383_s1 + $0x1b8] sm:$0xff]   ;;  %v1117_v15 = vld [vmem:[%s1383_s1 + $0x210] sm:$0xff]   ;;  %v1120_v18 = vld [vmem:[%s1383_s1 + $0x228] sm:$0xff]  }
  0x19   :  { %957 = vmatpush3.bf16.msra.mxu1 %v1066_v23  ;;  %v18_v10 = vld [vmem:[%s1384_s0 + $0x18] sm:$0xff]  ;;  %v1121_v19 = vld [vmem:[%s1383_s1 + $0x230] sm:$0xff]   ;;  %v1123_v21 = vld [vmem:[%s1384_s0 + $0x20] ss:$0 sps:$4 sm:$0xff]  }
  0x1a   :  { %958 = vmatprep.subr.bf16.mxu1 %v1069_v26  ;;  %v849_v11 = vcombine.low %v18_v10, %v18_v10  ;;  %v850_v12 = vcombine.high %v18_v10, %v18_v10  ;;  %v1118_v16 = vld [vmem:[%s1383_s1 + $0x218] sm:$0xff]   ;;  %v842_v23 = vld [vmem:[%s1385_s2] ss:$0 sm:$0xff] }
  0x1b   :  { %937 = vmatpush3.bf16.msra.mxu0 %v1068_v25  ;;  %v1122_v20 = vld [vmem:[%s1383_s1 + $0x238] sm:$0xff]  }
  0x1c   :  { %938 = vmatprep.subr.bf16.mxu0 %v1071_v28 }
  0x1d   :  { %959 = vmatpush3.bf16.msra.mxu1 %v1070_v27 }
  0x1e   :  { %960 = vmatprep.subr.bf16.mxu1 %v1073_v30 }
  0x1f   :  { %939 = vmatpush3.bf16.msra.mxu0 %v1072_v29 }
  0x20   :  { %968 = vmatprep.subr.bf16.mxu0 %v1077_v35 }
  0x21   :  { %961 = vmatpush3.bf16.msra.mxu1 %v1076_v34 }
  0x22   :  { %668 = vmatmul.mubr.bf16.vlgmr.msra.gmra.mrb[0].mxu0 %v843_v32  ;;  %990 = vmatprep.subr.bf16.mxu1 %v1081_v40 }
  0x23   :  { %969 = vmatpush3.bf16.msra.mxu0 %v1080_v39  ;;  %747 = vmatprep.mubr.bf16.mxu0 %v848_v7 }
  0x24   :  { %708 = vmatmul.mubr.bf16.vlgmr.msra.gmra.mrb[0].mxu1 %v845_v37  ;;  %970 = vmatprep.subr.bf16.mxu0 %v1083_v42 }
  0x25   :  { %991 = vmatpush3.bf16.msra.mxu1 %v1082_v41  ;;  %787 = vmatprep.mubr.bf16.mxu1 %v850_v12 }
  0x26   :  { %992 = vmatprep.subr.bf16.mxu1 %v1085_v44 }
  0x27   :  { %971 = vmatpush3.bf16.msra.mxu0 %v1084_v43 }
  0x28   :  { %972 = vmatprep.subr.bf16.mxu0 %v1087_v46 }
  0x29   :  { %993 = vmatpush3.bf16.msra.mxu1 %v1086_v45 }
  0x2a   :  { %994 = vmatprep.subr.bf16.mxu1 %v1089_v48 }
  0x2b   :  { %973 = vmatpush3.bf16.msra.mxu0 %v1088_v47 }
  0x2c   :  { %974 = vmatprep.subr.bf16.mxu0 %v1091_v50 }
  0x2d   :  { %995 = vmatpush3.bf16.msra.mxu1 %v1090_v49 }
  0x2e   :  { %996 = vmatprep.subr.bf16.mxu1 %v1093_v52 }
  0x2f   :  { %975 = vmatpush3.bf16.msra.mxu0 %v1092_v51 }
  0x30   :  { %976 = vmatprep.subr.bf16.mxu0 %v1095_v54 }
  0x31   :  { %997 = vmatpush3.bf16.msra.mxu1 %v1094_v53 }
  0x32   :  { %998 = vmatprep.subr.bf16.mxu1 %v1097_v56 }
  0x33   :  { %977 = vmatpush3.bf16.msra.mxu0 %v1096_v55 }
  0x34   :  { %978 = vmatprep.subr.bf16.mxu0 %v1099_v58 }
  0x35   :  { %999 = vmatpush3.bf16.msra.mxu1 %v1098_v57 }
  0x36   :  { %1000 = vmatprep.subr.bf16.mxu1 %v1101_v60 }
  0x37   :  { %979 = vmatpush3.bf16.msra.mxu0 %v1100_v59 }
  0x38   :  { %980 = vmatprep.subr.bf16.mxu0 %v1103_v62 }
  0x39   :  { %1001 = vmatpush3.bf16.msra.mxu1 %v1102_v61 }
  0x3a   :  { %1002 = vmatprep.subr.bf16.mxu1 %v1105_v0 }
  0x3b   :  { %981 = vmatpush3.bf16.msra.mxu0 %v1104_v63 }
  0x3c   :  { %982 = vmatprep.subr.bf16.mxu0 %v1107_v2 }
  0x3d   :  { %1003 = vmatpush3.bf16.msra.mxu1 %v1106_v1 }
  0x3e   :  { %1004 = vmatprep.subr.bf16.mxu1 %v1109_v4 }
  0x3f   :  { %983 = vmatpush3.bf16.msra.mxu0 %v1108_v3 }
  0x40   :  { %1021 = vmatprep.subr.bf16.mxu0 %v1124_v9 }
  0x41   :  { %1005 = vmatpush3.bf16.msra.mxu1 %v1112_v8 }
  0x42   :  { %748 = vmatmul.mubr.bf16.vlgmr.msra.gmra.mrb[4].mxu0 %v847_v6 }
  0x43   :  { %1022 = vmatpush3.bf16.msra.mxu0 %v1115_v13  ;;  %1037 = vmatprep.mubr.msk.bf16.mxu0 %vm1125_vm0, %v1124_v9 }
  0x44   :  { %788 = vmatmul.mubr.bf16.vlgmr.msra.gmra.mrb[4].mxu1 %v849_v11  ;;  %1023 = vmatprep.subr.bf16.mxu0 %v1124_v9 }
  0x47   :  { %1024 = vmatpush3.bf16.msra.mxu0 %v1116_v14 }
  0x48   :  { %1025 = vmatprep.subr.bf16.mxu0 %v1124_v9 }
  0x4b   :  { %1026 = vmatpush3.bf16.msra.mxu0 %v1117_v15 }
  0x4c   :  { %1027 = vmatprep.subr.bf16.mxu0 %v1124_v9 }
  0x4f   :  { %1028 = vmatpush3.bf16.msra.mxu0 %v1118_v16 }
  0x50   :  { %1029 = vmatprep.subr.bf16.mxu0 %v1124_v9 }
  0x53   :  { %1030 = vmatpush3.bf16.msra.mxu0 %v1119_v17 }
  0x54   :  { %1031 = vmatprep.subr.bf16.mxu0 %v1124_v9 }
  0x57   :  { %1032 = vmatpush3.bf16.msra.mxu0 %v1120_v18 }
  0x58   :  { %1033 = vmatprep.subr.bf16.mxu0 %v1124_v9 }
  0x5b   :  { %1034 = vmatpush3.bf16.msra.mxu0 %v1121_v19 }
  0x5c   :  { %1035 = vmatprep.subr.bf16.mxu0 %v1124_v9 }
  0x5f   :  { %1036 = vmatpush3.bf16.msra.mxu0 %v1122_v20 }
  0x62   :  { %1038 = vmatmul.mubr.bf16.vlgmr.msra.gmra.mrb[8].mxu0 %v1123_v21 }
  0xf5   :  { %v940_v22 = vpop.f32.mrb[0].mxu0 }
  0xf6   :  { %v941_v24 = vpop.f32.mrb[1].mxu0 }
  0xf7   :  { %v942_v25 = vadd.f32 %v941_v24, %v940_v22  ;;  %v943_v26 = vpop.f32.mrb[2].mxu0  ;;  %v962_v27 = vpop.f32.mrb[0].mxu1 }
  0xf8   :  { %v944_v28 = vpop.f32.mrb[3].mxu0  ;;  %v963_v29 = vpop.f32.mrb[1].mxu1 }
  0xf9   :  { %v670_v30 = vadd.f32 %v942_v25, %v842_v23  ;;  %v964_v31 = vadd.f32 %v963_v29, %v962_v27  ;;  %v965_v32 = vpop.f32.mrb[2].mxu1 }
  0xfa   :  { %v966_v33 = vpop.f32.mrb[3].mxu1 }
  0xfb   :  { %v710_v34 = vadd.f32 %v964_v31, %v670_v30 }
 0x115   :  { %v984_v35 = vpop.f32.mrb[4].mxu0 }
 0x116   :  { %v985_v36 = vpop.f32.mrb[5].mxu0 }
 0x117   :  { %v986_v37 = vadd.f32 %v985_v36, %v984_v35  ;;  %v987_v38 = vpop.f32.mrb[6].mxu0  ;;  %v1006_v39 = vpop.f32.mrb[4].mxu1 }
 0x118   :  { %v988_v40 = vpop.f32.mrb[7].mxu0  ;;  %v1007_v41 = vpop.f32.mrb[5].mxu1 }
 0x119   :  { %v750_v42 = vadd.f32 %v986_v37, %v710_v34  ;;  %v1008_v43 = vadd.f32 %v1007_v41, %v1006_v39  ;;  %v1009_v44 = vpop.f32.mrb[6].mxu1 }
 0x11a   :  { %v1010_v45 = vpop.f32.mrb[7].mxu1 }
 0x11b   :  { %v790_v46 = vadd.f32 %v1008_v43, %v750_v42 }
 0x135   :  { %v829_v47 = vpop.f32.mrb[8].mxu0 }
 0x136   :  { %v830_v48 = vadd.f32 %v829_v47, %v790_v46  ;;  %v1039_v49 = vpop.f32.mrb[9].mxu0 }
 0x137   :  { %v832_v50 = vpop.f32.mrb[10].mxu0 }
 0x138   :  { %v835_v51 = vmax.f32 %v830_v48, 0.0  ;;  %v1040_v52 = vpop.f32.mrb[11].mxu0 }
 0x13a   :  { %v836_v53 = vpack.c.bf16 %v835_v51, %v835_v51 }
 0x13c   :  { %837 = vst [vmem:[%s1386_s3] sm:$0xf] %v836_v53 }

// kernel: _lambda_.23
= control target key start
LH: loop header
LB: loop body
LE: loop exit
PB: predicated region body
PF: predicated region fallthrough
CT: control target
= control target key end

     0   :  { %11 = vsyncpa [#allocation3], 0  ;;  %v99_v30 = vlaneseq  ;;  %v1031_v34 = vmov 1966171168   ;;  %s1296_s0 = inlined_call_operand.vmem [shape: bf16[2,512], index: 0, kind: input, shape index: {}]   ;;  %s1297_s1 = inlined_call_operand.vmem [shape: bf16[512,128], index: 1, kind: input, shape index: {}]   ;;  %s1298_s2 = inlined_call_operand.vmem [shape: bf16[512,10], index: 2, kind: input, shape index: {}]   ;;  %s1299_s3 = inlined_call_operand.vmem [shape: f32[1,10], index: 3, kind: input, shape index: {}]   ;;  %s1300_s4 = inlined_call_operand.hbm [shape: f32[2,128], index: 4, kind: output, shape index: {0}]   ;;  %s1301_s5 = inlined_call_operand.hbm [shape: f32[2,10], index: 5, kind: output, shape index: {1}]  }
   0x1   :  { %v919_v0 = vld [vmem:[%s1297_s1 + $0x40] sm:$0xff]   ;;  %v923_v4 = vld [vmem:[%s1297_s1 + $0x48] sm:$0xff]   ;;  %v927_v8 = vld [vmem:[%s1297_s1 + $0x50] sm:$0xff]   ;;  %v97_v35 = vunpack.c.l.s4 %v1031_v34 }
   0x2   :  { %v920_v1 = vld [vmem:[%s1297_s1 + $0xc0] sm:$0xff]   ;;  %828 = vmatprep.subr.bf16.mxu0 %v919_v0  ;;  %v924_v5 = vld [vmem:[%s1297_s1 + $0xc8] sm:$0xff]   ;;  %v928_v9 = vld [vmem:[%s1297_s1 + $0xd0] sm:$0xff]   ;;  %v100_v36 = vshrl.u32 %v99_v30, 7 }
   0x3   :  { %v921_v2 = vld [vmem:[%s1297_s1] sm:$0xff]   ;;  %850 = vmatprep.subr.bf16.mxu1 %v920_v1  ;;  %v925_v6 = vld [vmem:[%s1297_s1 + $0x8] sm:$0xff]   ;;  %v929_v10 = vld [vmem:[%s1297_s1 + $0x10] sm:$0xff]   ;;  %v98_v40 = vunpack.c.0.s8 %v97_v35 }
   0x4   :  { %v922_v3 = vld [vmem:[%s1297_s1 + $0x80] sm:$0xff]   ;;  %829 = vmatpush3.bf16.msra.mxu0 %v921_v2  ;;  %v926_v7 = vld [vmem:[%s1297_s1 + $0x88] sm:$0xff]   ;;  %v930_v11 = vld [vmem:[%s1297_s1 + $0x90] sm:$0xff]  }
   0x5   :  { %851 = vmatpush3.bf16.msra.mxu1 %v922_v3  ;;  %830 = vmatprep.subr.bf16.mxu0 %v923_v4  ;;  %v931_v12 = vld [vmem:[%s1297_s1 + $0x58] sm:$0xff]   ;;  %v935_v16 = vld [vmem:[%s1297_s1 + $0x60] sm:$0xff]   ;;  %v939_v20 = vld [vmem:[%s1297_s1 + $0x68] sm:$0xff]   ;;  %v101_v41 = vsub.s32 %v98_v40, %v100_v36 }
   0x6   :  { %852 = vmatprep.subr.bf16.mxu1 %v924_v5  ;;  %v932_v13 = vld [vmem:[%s1297_s1 + $0xd8] sm:$0xff]   ;;  %v936_v17 = vld [vmem:[%s1297_s1 + $0xe0] sm:$0xff]   ;;  %v940_v21 = vld [vmem:[%s1297_s1 + $0xe8] sm:$0xff]  }
   0x7   :  { %v933_v14 = vld [vmem:[%s1297_s1 + $0x18] sm:$0xff]   ;;  %v937_v18 = vld [vmem:[%s1297_s1 + $0x20] sm:$0xff]   ;;  %v941_v22 = vld [vmem:[%s1297_s1 + $0x28] sm:$0xff]  }
   0x8   :  { %831 = vmatpush3.bf16.msra.mxu0 %v925_v6  ;;  %v934_v15 = vld [vmem:[%s1297_s1 + $0x98] sm:$0xff]   ;;  %v938_v19 = vld [vmem:[%s1297_s1 + $0xa0] sm:$0xff]   ;;  %v942_v23 = vld [vmem:[%s1297_s1 + $0xa8] sm:$0xff]  }
   0x9   :  { %853 = vmatpush3.bf16.msra.mxu1 %v926_v7  ;;  %832 = vmatprep.subr.bf16.mxu0 %v927_v8  ;;  %v943_v24 = vld [vmem:[%s1297_s1 + $0x70] sm:$0xff]   ;;  %v947_v28 = vld [vmem:[%s1297_s1 + $0x78] sm:$0xff]   ;;  %v762_v33 = vld.sshfl [vmem:[%s1296_s0] sm:$0x33 pattern:$0x75316420] }
   0xa   :  { %854 = vmatprep.subr.bf16.mxu1 %v928_v9  ;;  %v944_v25 = vld [vmem:[%s1297_s1 + $0xf0] sm:$0xff]   ;;  %v948_v29 = vld [vmem:[%s1297_s1 + $0xf8] sm:$0xff]   ;;  %v951_v37 = vld [vmem:[%s1298_s2 + $0x40] sm:$0xff]   ;;  %v95_v39 = vcombine.high %v762_v33, %v762_v33  ;;  %v1169_v43 = vrot.slane %v762_v33, %v101_v41 }
   0xb   :  { %v945_v26 = vld [vmem:[%s1297_s1 + $0x30] sm:$0xff]   ;;  %v949_v31 = vld [vmem:[%s1297_s1 + $0x38] sm:$0xff]   ;;  %v952_v38 = vld [vmem:[%s1298_s2 + $0xc0] sm:$0xff]  }
   0xc   :  { %833 = vmatpush3.bf16.msra.mxu0 %v929_v10  ;;  %v946_v27 = vld [vmem:[%s1297_s1 + $0xb0] sm:$0xff]   ;;  %v950_v32 = vld [vmem:[%s1297_s1 + $0xb8] sm:$0xff]   ;;  %v109_v42 = vrot.slane %v95_v39, %v101_v41  ;;  %v953_v44 = vld [vmem:[%s1298_s2] sm:$0xff]   ;;  %v1179_v47 = vcombine.high %v1169_v43, %v1169_v43 }
   0xd   :  { %855 = vmatpush3.bf16.msra.mxu1 %v930_v11  ;;  %834 = vmatprep.subr.bf16.mxu0 %v931_v12  ;;  %v955_v45 = vld [vmem:[%s1298_s2 + $0x48] sm:$0xff]   ;;  %v954_v48 = vld [vmem:[%s1298_s2 + $0x80] sm:$0xff]   ;;  %v959_v51 = vld [vmem:[%s1298_s2 + $0x50] sm:$0xff]  }
   0xe   :  { %856 = vmatprep.subr.bf16.mxu1 %v932_v13  ;;  %340 = vmatprep.mubr.bf16.mxu0 %v109_v42  ;;  %v111_v46 = vcombine.high %v109_v42, %v109_v42  ;;  %v956_v49 = vld [vmem:[%s1298_s2 + $0xc8] sm:$0xff]   ;;  %v960_v53 = vld [vmem:[%s1298_s2 + $0xd0] sm:$0xff]   ;;  %v963_v55 = vld [vmem:[%s1298_s2 + $0x58] sm:$0xff]  }
   0xf   :  { %v957_v50 = vld [vmem:[%s1298_s2 + $0x8] sm:$0xff]   ;;  %v961_v54 = vld [vmem:[%s1298_s2 + $0x10] sm:$0xff]   ;;  %v964_v57 = vld [vmem:[%s1298_s2 + $0xd8] sm:$0xff]  }
  0x10   :  { %835 = vmatpush3.bf16.msra.mxu0 %v933_v14  ;;  %380 = vmatprep.mubr.bf16.mxu1 %v111_v46  ;;  %v958_v52 = vld [vmem:[%s1298_s2 + $0x88] sm:$0xff]   ;;  %v962_v56 = vld [vmem:[%s1298_s2 + $0x90] sm:$0xff]   ;;  %v965_v58 = vld [vmem:[%s1298_s2 + $0x18] sm:$0xff]  }
  0x11   :  { %857 = vmatpush3.bf16.msra.mxu1 %v934_v15  ;;  %836 = vmatprep.subr.bf16.mxu0 %v935_v16  ;;  %v967_v59 = vld [vmem:[%s1298_s2 + $0x60] sm:$0xff]   ;;  %v966_v60 = vld [vmem:[%s1298_s2 + $0x98] sm:$0xff]   ;;  %v971_v63 = vld [vmem:[%s1298_s2 + $0x68] sm:$0xff]  }
  0x12   :  { %858 = vmatprep.subr.bf16.mxu1 %v936_v17  ;;  %v968_v61 = vld [vmem:[%s1298_s2 + $0xe0] sm:$0xff]   ;;  %v972_v1 = vld [vmem:[%s1298_s2 + $0xe8] sm:$0xff]   ;;  %v975_v3 = vld [vmem:[%s1298_s2 + $0x70] sm:$0xff]  }
  0x13   :  { %v969_v62 = vld [vmem:[%s1298_s2 + $0x20] sm:$0xff]   ;;  %v973_v2 = vld [vmem:[%s1298_s2 + $0x28] sm:$0xff]   ;;  %v976_v5 = vld [vmem:[%s1298_s2 + $0xf0] sm:$0xff]  }
  0x14   :  { %837 = vmatpush3.bf16.msra.mxu0 %v937_v18  ;;  %v970_v0 = vld [vmem:[%s1298_s2 + $0xa0] sm:$0xff]   ;;  %v974_v4 = vld [vmem:[%s1298_s2 + $0xa8] sm:$0xff]   ;;  %v977_v6 = vld [vmem:[%s1298_s2 + $0x30] sm:$0xff]  }
  0x15   :  { %859 = vmatpush3.bf16.msra.mxu1 %v938_v19  ;;  %838 = vmatprep.subr.bf16.mxu0 %v939_v20  ;;  %v979_v7 = vld [vmem:[%s1298_s2 + $0x78] sm:$0xff]   ;;  %v978_v8 = vld [vmem:[%s1298_s2 + $0xb0] sm:$0xff]  }
  0x16   :  { %860 = vmatprep.subr.bf16.mxu1 %v940_v21 }
  0x18   :  { %839 = vmatpush3.bf16.msra.mxu0 %v941_v22 }
  0x19   :  { %861 = vmatpush3.bf16.msra.mxu1 %v942_v23  ;;  %840 = vmatprep.subr.bf16.mxu0 %v943_v24 }
  0x1a   :  { %862 = vmatprep.subr.bf16.mxu1 %v944_v25 }
  0x1c   :  { %841 = vmatpush3.bf16.msra.mxu0 %v945_v26 }
  0x1d   :  { %863 = vmatpush3.bf16.msra.mxu1 %v946_v27  ;;  %842 = vmatprep.subr.bf16.mxu0 %v947_v28 }
  0x1e   :  { %864 = vmatprep.subr.bf16.mxu1 %v948_v29 }
  0x20   :  { %843 = vmatpush3.bf16.msra.mxu0 %v949_v31 }
  0x21   :  { %865 = vmatpush3.bf16.msra.mxu1 %v950_v32  ;;  %872 = vmatprep.subr.bf16.mxu0 %v951_v37 }
  0x22   :  { %894 = vmatprep.subr.bf16.mxu1 %v952_v38 }
  0x23   :  { %341 = vmatmul.mubr.bf16.vlgmr.msra.gmra.mrb[0].mxu0 %v1169_v43 }
  0x24   :  { %873 = vmatpush3.bf16.msra.mxu0 %v953_v44  ;;  %381 = vmatmul.mubr.bf16.vlgmr.msra.gmra.mrb[0].mxu1 %v1179_v47 }
  0x25   :  { %874 = vmatprep.subr.bf16.mxu0 %v955_v45  ;;  %895 = vmatpush3.bf16.msra.mxu1 %v954_v48 }
  0x26   :  { %684 = vmatprep.mubr.bf16.mxu0 %v109_v42  ;;  %896 = vmatprep.subr.bf16.mxu1 %v956_v49 }
  0x27   :  { %724 = vmatprep.mubr.bf16.mxu1 %v111_v46 }
  0x28   :  { %875 = vmatpush3.bf16.msra.mxu0 %v957_v50 }
  0x29   :  { %876 = vmatprep.subr.bf16.mxu0 %v959_v51  ;;  %897 = vmatpush3.bf16.msra.mxu1 %v958_v52 }
  0x2a   :  { %898 = vmatprep.subr.bf16.mxu1 %v960_v53 }
  0x2c   :  { %877 = vmatpush3.bf16.msra.mxu0 %v961_v54 }
  0x2d   :  { %878 = vmatprep.subr.bf16.mxu0 %v963_v55  ;;  %899 = vmatpush3.bf16.msra.mxu1 %v962_v56 }
  0x2e   :  { %900 = vmatprep.subr.bf16.mxu1 %v964_v57 }
  0x30   :  { %879 = vmatpush3.bf16.msra.mxu0 %v965_v58 }
  0x31   :  { %880 = vmatprep.subr.bf16.mxu0 %v967_v59  ;;  %901 = vmatpush3.bf16.msra.mxu1 %v966_v60 }
  0x32   :  { %902 = vmatprep.subr.bf16.mxu1 %v968_v61 }
  0x34   :  { %881 = vmatpush3.bf16.msra.mxu0 %v969_v62 }
  0x35   :  { %882 = vmatprep.subr.bf16.mxu0 %v971_v63  ;;  %903 = vmatpush3.bf16.msra.mxu1 %v970_v0 }
  0x36   :  { %904 = vmatprep.subr.bf16.mxu1 %v972_v1 }
  0x38   :  { %883 = vmatpush3.bf16.msra.mxu0 %v973_v2 }
  0x39   :  { %884 = vmatprep.subr.bf16.mxu0 %v975_v3  ;;  %905 = vmatpush3.bf16.msra.mxu1 %v974_v4 }
  0x3a   :  { %12 = vsyncpa [#allocation5], 0  ;;  %906 = vmatprep.subr.bf16.mxu1 %v976_v5  ;;  %v980_v9 = vld [vmem:[%s1298_s2 + $0xf8] sm:$0xff]   ;;  %s1032_s17 = smov [#allocation2]  }
  0x3b   :  { %v981_v10 = vld [vmem:[%s1298_s2 + $0x38] sm:$0xff]   ;;  %s740_s18 = sshll.u32 %s1032_s17, 4  ;;  %s741_s18 = int_to_ptr.vmem [resolvable:$true] %s740_s18 }
  0x3c   :  { %885 = vmatpush3.bf16.msra.mxu0 %v977_v6  ;;  %v982_v11 = vld [vmem:[%s1298_s2 + $0xb8] sm:$0xff]   ;;  %s983_s2 = scalar_lea.vmem %s741_s18, 32  ;;  %p988_p1 = scmp.lt.s32.totalorder %s741_s18, %s741_s18 }
  0x3d   :  { %886 = vmatprep.subr.bf16.mxu0 %v979_v7  ;;  %907 = vmatpush3.bf16.msra.mxu1 %v978_v8  ;;  %p984_p0 = scmp.ne.s32.totalorder %s741_s18, %s983_s2  ;;  %p989_p2 = scmp.lt.s32.totalorder %s983_s2, %s983_s2 }
  0x3e   :  { %908 = vmatprep.subr.bf16.mxu1 %v980_v9 }
  0x3f   :  { %p990_p3 = por %p989_p2, %p988_p1 }
  0x40   :  { %887 = vmatpush3.bf16.msra.mxu0 %v981_v10 }
  0x41   :  { %909 = vmatpush3.bf16.msra.mxu1 %v982_v11  ;;  %p991_p4 = pnand %p990_p3, %p984_p0 }
  0x43   :  { %685 = vmatmul.mubr.bf16.vlgmr.msra.gmra.mrb[4].mxu0 %v1169_v43 }
  0x44   :  { %725 = vmatmul.mubr.bf16.vlgmr.msra.gmra.mrb[4].mxu1 %v1179_v47 }
  0xf6   :  { %v844_v12 = vpop.f32.mrb[0].mxu0 }
  0xf7   :  { %v845_v13 = vpop.f32.mrb[1].mxu0  ;;  %v866_v14 = vpop.f32.mrb[0].mxu1 }
  0xf8   :  { %v846_v15 = vadd.f32 %v845_v13, %v844_v12  ;;  %v847_v16 = vpop.f32.mrb[2].mxu0  ;;  %v867_v17 = vpop.f32.mrb[1].mxu1 }
  0xf9   :  { %v848_v18 = vpop.f32.mrb[3].mxu0  ;;  %v868_v19 = vadd.f32 %v867_v17, %v866_v14  ;;  %v869_v20 = vpop.f32.mrb[2].mxu1 }
  0xfa   :  { %v870_v21 = vpop.f32.mrb[3].mxu1 }
  0xfb   :  { %v383_v22 = vadd.f32 %v868_v19, %v846_v15 }
  0xfd   :  { %388 = vst [vmem:[#allocation2] sm:$0x3] %v383_v22 }
  0xfe   :  { %994 = shalt.err (!%p991_p4)
}
  0xff   :  { %s995_s21 = scalar_lea.hbm %s1300_s4, 32 }
 0x100   :  { %p996_p5 = scmp.ne.s32.totalorder %s1300_s4, %s995_s21  ;;  %p999_p6 = scmp.lt.u32.totalorder %s995_s21, %s1300_s4 }
 0x102   :  { %p1001_p7 = pnand %p999_p6, %p996_p5 }
 0x104   :  { %1004 = shalt.err (!%p1001_p7)
}
 0x105   :  { %743 = dma.vmem_to_hbm [thread:$0]  %s741_s18, 32, %s1300_s4, [#allocation3]   ;;  %v795_v24 = vld [vmem:[%s1299_s3] ss:$0 sm:$0xff]  ;;  %vm732_vm0 = vcmask 74752  }
 0x106   :  { %s1033_s30 = smov [#allocation4]  }
 0x107   :  { %s750_s6 = sshll.u32 %s1033_s30, 4  ;;  %s751_s6 = int_to_ptr.vmem [resolvable:$true] %s750_s6 }
 0x108   :  { %s1005_s4 = scalar_lea.vmem %s751_s6, 32  ;;  %p1010_p9 = scmp.lt.s32.totalorder %s751_s6, %s751_s6 }
 0x109   :  { %p1006_p8 = scmp.ne.s32.totalorder %s751_s6, %s1005_s4  ;;  %p1011_p10 = scmp.lt.s32.totalorder %s1005_s4, %s1005_s4 }
 0x10b   :  { %p1012_p11 = por %p1011_p10, %p1010_p9 }
 0x10d   :  { %p1013_p12 = pnand %p1012_p11, %p1006_p8 }
 0x116   :  { %v888_v23 = vpop.f32.mrb[4].mxu0 }
 0x117   :  { %v889_v25 = vpop.f32.mrb[5].mxu0  ;;  %v910_v26 = vpop.f32.mrb[4].mxu1 }
 0x118   :  { %v890_v27 = vadd.f32 %v889_v25, %v888_v23  ;;  %v891_v28 = vpop.f32.mrb[6].mxu0  ;;  %v911_v29 = vpop.f32.mrb[5].mxu1 }
 0x119   :  { %v892_v30 = vpop.f32.mrb[7].mxu0  ;;  %v912_v32 = vadd.f32 %v911_v29, %v910_v26  ;;  %v913_v33 = vpop.f32.mrb[6].mxu1 }
 0x11a   :  { %v687_v31 = vadd.f32 %v890_v27, %v795_v24  ;;  %v914_v34 = vpop.f32.mrb[7].mxu1 }
 0x11c   :  { %v727_v35 = vadd.f32 %v912_v32, %v687_v31 }
 0x11e   :  { %733 = vst.msk [vmem:[#allocation4] sm:$0x3] %vm732_vm0, %v727_v35 }
 0x11f   :  { %1016 = shalt.err (!%p1013_p12)
}
 0x120   :  { %s1017_s8 = scalar_lea.hbm %s1301_s5, 32 }
 0x121   :  { %p1018_p13 = scmp.ne.s32.totalorder %s1301_s5, %s1017_s8  ;;  %p1021_p0 = scmp.lt.u32.totalorder %s1017_s8, %s1301_s5 }
 0x123   :  { %p1023_p1 = pnand %p1021_p0, %p1018_p13 }
 0x125   :  { %1026 = shalt.err (!%p1023_p1)
}
 0x126   :  { %753 = dma.vmem_to_hbm [thread:$0]  %s751_s6, 32, %s1301_s5, [#allocation5]  }
 0x127   :  { %1027 = dma.done.wait [#allocation3], 32  }
 0x128   :  { %1028 = vsyncadd [#allocation3], 4294967264 }
 0x129   :  { %1029 = dma.done.wait [#allocation5], 32  }
 0x12a   :  { %1030 = vsyncadd [#allocation5], 4294967264 }
 0x12b   :  { %760 = vsyncpa [#allocation3], 1 }
 0x12c   :  { %761 = vsyncpa [#allocation5], 1 }

// kernel: _lambda_.16
= control target key start
LH: loop header
LB: loop body
LE: loop exit
PB: predicated region body
PF: predicated region fallthrough
CT: control target
= control target key end

     0   :  { %v269_v0 = vmov 0   ;;  %vm116_vm0 = vcmask 130048   ;;  %s338_s1 = inlined_call_operand.vmem [shape: bf16[144,128], index: 1, kind: input, shape index: {}]   ;;  %s339_s0 = inlined_call_operand.vmem [shape: bf16[32,144], index: 0, kind: input, shape index: {}]   ;;  %s340_s2 = inlined_call_operand.vmem [shape: f32[1,128], index: 2, kind: input, shape index: {}]   ;;  %s341_s3 = inlined_call_operand.vmem [shape: bf16[32,128], index: 3, kind: output, shape index: {}]  }
   0x1   :  { %123 = vmatprep.subr.bf16.mxu0 %v269_v0  ;;  %235 = vmatprep.subr.bf16.mxu1 %v269_v0  ;;  %v254_v1 = vld [vmem:[%s338_s1] sm:$0xff]   ;;  %v255_v2 = vld [vmem:[%s338_s1 + $0x8] sm:$0xff]   ;;  %v256_v3 = vld [vmem:[%s338_s1 + $0x10] sm:$0xff]  }
   0x2   :  { %124 = vmatpush1.bf16.msra.mxu0 %v254_v1  ;;  %244 = vmatpush1.bf16.msra.mxu1 %v254_v1  ;;  %v257_v4 = vld [vmem:[%s338_s1 + $0x18] sm:$0xff]   ;;  %v265_v5 = vld [vmem:[%s339_s0 + $0x4] ss:$8 sps:$4 sm:$0xff]   ;;  %v260_v9 = vld [vmem:[%s338_s1 + $0x30] sm:$0xff]  }
   0x3   :  { %125 = vmatprep.subr.bf16.mxu0 %v269_v0  ;;  %236 = vmatprep.subr.bf16.mxu1 %v269_v0  ;;  %v268_v6 = vld [vmem:[%s339_s0 + $0x14] ss:$8 sps:$4 sm:$0xff]   ;;  %v258_v7 = vld [vmem:[%s338_s1 + $0x20] sm:$0xff]   ;;  %v259_v8 = vld [vmem:[%s338_s1 + $0x28] sm:$0xff]  }
   0x4   :  { %214 = vmatprep.mubr.msk.bf16.mxu0 %vm116_vm0, %v265_v5  ;;  %215 = vmatprep.mubr.msk.bf16.mxu1 %vm116_vm0, %v268_v6  ;;  %v261_v10 = vld [vmem:[%s338_s1 + $0x38] sm:$0xff]   ;;  %v262_v11 = vld [vmem:[%s338_s1 + $0x40] sm:$0xff]  }
   0x5   :  { %v263_v12 = vld [vmem:[%s339_s0] ss:$8 sps:$4 sm:$0xff]   ;;  %v266_v13 = vld [vmem:[%s339_s0 + $0x10] ss:$8 sps:$4 sm:$0xff]  }
   0x6   :  { %126 = vmatpush1.bf16.msra.mxu0 %v255_v2  ;;  %245 = vmatpush1.bf16.msra.mxu1 %v255_v2  ;;  %v200_v14 = vld [vmem:[%s340_s2] ss:$0 sm:$0xff] }
   0x7   :  { %127 = vmatprep.subr.bf16.mxu0 %v269_v0  ;;  %237 = vmatprep.subr.bf16.mxu1 %v269_v0 }
   0xa   :  { %128 = vmatpush1.bf16.msra.mxu0 %v256_v3  ;;  %246 = vmatpush1.bf16.msra.mxu1 %v256_v3 }
   0xb   :  { %129 = vmatprep.subr.bf16.mxu0 %v269_v0  ;;  %238 = vmatprep.subr.bf16.mxu1 %v269_v0 }
   0xe   :  { %130 = vmatpush1.bf16.msra.mxu0 %v257_v4  ;;  %247 = vmatpush1.bf16.msra.mxu1 %v257_v4 }
   0xf   :  { %131 = vmatprep.subr.bf16.mxu0 %v269_v0  ;;  %239 = vmatprep.subr.bf16.mxu1 %v269_v0 }
  0x12   :  { %132 = vmatpush1.bf16.msra.mxu0 %v258_v7  ;;  %248 = vmatpush1.bf16.msra.mxu1 %v258_v7 }
  0x13   :  { %133 = vmatprep.subr.bf16.mxu0 %v269_v0  ;;  %240 = vmatprep.subr.bf16.mxu1 %v269_v0 }
  0x16   :  { %134 = vmatpush1.bf16.msra.mxu0 %v259_v8  ;;  %249 = vmatpush1.bf16.msra.mxu1 %v259_v8 }
  0x17   :  { %135 = vmatprep.subr.bf16.mxu0 %v269_v0  ;;  %241 = vmatprep.subr.bf16.mxu1 %v269_v0 }
  0x1a   :  { %136 = vmatpush1.bf16.msra.mxu0 %v260_v9  ;;  %250 = vmatpush1.bf16.msra.mxu1 %v260_v9 }
  0x1b   :  { %137 = vmatprep.subr.bf16.mxu0 %v269_v0  ;;  %242 = vmatprep.subr.bf16.mxu1 %v269_v0 }
  0x1e   :  { %138 = vmatpush1.bf16.msra.mxu0 %v261_v10  ;;  %251 = vmatpush1.bf16.msra.mxu1 %v261_v10 }
  0x1f   :  { %139 = vmatprep.subr.bf16.mxu0 %v269_v0  ;;  %243 = vmatprep.subr.bf16.mxu1 %v269_v0 }
  0x22   :  { %140 = vmatpush1.bf16.msra.mxu0 %v262_v11  ;;  %252 = vmatpush1.bf16.msra.mxu1 %v262_v11 }
  0x25   :  { %156 = vmatmul.mubr.bf16.vlgmr.msra.gmra.mrb[0].mxu0 %v263_v12  ;;  %164 = vmatmul.mubr.bf16.vlgmr.msra.gmra.mrb[0].mxu1 %v266_v13 }
  0xf8   :  { %v157_v15 = vpop.f32.mrb[0].mxu0  ;;  %v165_v16 = vpop.f32.mrb[0].mxu1 }
  0xf9   :  { %v158_v17 = vadd.f32 %v200_v14, %v157_v15  ;;  %v166_v18 = vadd.f32 %v200_v14, %v165_v16  ;;  %v159_v19 = vpop.f32.mrb[1].mxu0  ;;  %v167_v20 = vpop.f32.mrb[1].mxu1 }
  0xfa   :  { %v160_v21 = vpop.f32.mrb[2].mxu0  ;;  %v168_v22 = vpop.f32.mrb[2].mxu1 }
  0xfb   :  { %v161_v23 = vadd.f32 %v200_v14, %v160_v21  ;;  %v169_v24 = vadd.f32 %v200_v14, %v168_v22  ;;  %v162_v25 = vpop.f32.mrb[3].mxu0  ;;  %v170_v26 = vpop.f32.mrb[3].mxu1  ;;  %v172_v27 = vmax.f32 %v158_v17, 0.0  ;;  %v174_v28 = vmax.f32 %v166_v18, 0.0 }
  0xfd   :  { %v173_v29 = vmax.f32 %v161_v23, 0.0  ;;  %v175_v30 = vmax.f32 %v169_v24, 0.0 }
  0xff   :  { %v227_v31 = vpack.c.bf16 %v173_v29, %v172_v27  ;;  %v232_v32 = vpack.c.bf16 %v175_v30, %v174_v28 }
 0x101   :  { %228 = vst [vmem:[%s341_s3] sm:$0xff] %v227_v31   ;;  %234 = vst [vmem:[%s341_s3 + $0x8] sm:$0xff] %v232_v32  }

</bundles_post_ra>
